<compile_context>
chip_gen: v6e
topology: v6e:2x2x1
jax: 0.10.0
libtpu: 0.0.40
codegen_flags: <defaults>
</compile_context>

<pallas_src>
import functools
import math

import jax
import jax.numpy as jnp
from jax.experimental import pallas as pl
from jax.experimental.pallas import tpu as pltpu


def _round_up(x, m):
    return ((x + m - 1) // m) * m


# ----------------------------------------------------------------------------
# In-kernel building blocks (plain functions, traced inline)
# ----------------------------------------------------------------------------
def _ln(y, gb, eps):
    """Post-LayerNorm in fp32. gb: (2, E) with row0 = gamma, row1 = beta."""
    g = gb[0:1]
    b = gb[1:2]
    mean = jnp.mean(y, axis=-1, keepdims=True)
    c = y - mean
    var = jnp.mean(c * c, axis=-1, keepdims=True)
    return c * jax.lax.rsqrt(var + eps) * g + b


def _ffn(y, w1, b1, w2, b2):
    """linear1 + ReLU + linear2 (bf16 MXU operands, fp32 accumulate / bias)."""
    h = jnp.dot(y.astype(jnp.bfloat16), w1, preferred_element_type=jnp.float32) + b1
    h = jnp.maximum(h, 0.0)
    return jnp.dot(h.astype(jnp.bfloat16), w2, preferred_element_type=jnp.float32) + b2


def _mha(x_q, x_kv, wqkv, bqkv, wo, bo, *, num_heads, scale):
    """Head-batched multi-head attention (no per-head loop, no lane slices).

    x_q : (L, E) f32       x_kv: (S, E) f32
    wqkv: (3H, E, d) bf16  rows [0:H]=Q, [H:2H]=K, [2H:3H]=V, head-major
    bqkv: (3H, 1, d) f32
    wo  : (H, d, E) bf16   head-major out-projection (concat+Wo == sum_h attn_h @ Wo_h)
    bo  : (1, E) f32
    returns (L, E) f32
    """
    H = num_heads
    xq = jnp.broadcast_to(x_q.astype(jnp.bfloat16)[None], (H,) + x_q.shape)    # (H,L,E)
    xkv = jnp.broadcast_to(x_kv.astype(jnp.bfloat16)[None], (H,) + x_kv.shape)  # (H,S,E)

    q = jnp.einsum('hle,hed->hld', xq, wqkv[:H],
                   preferred_element_type=jnp.float32) + bqkv[:H]               # (H,L,d)
    k = jnp.einsum('hse,hed->hsd', xkv, wqkv[H:2 * H],
                   preferred_element_type=jnp.float32) + bqkv[H:2 * H]          # (H,S,d)
    v = jnp.einsum('hse,hed->hsd', xkv, wqkv[2 * H:],
                   preferred_element_type=jnp.float32) + bqkv[2 * H:]           # (H,S,d)

    s = jnp.einsum('hld,hsd->hls', q.astype(jnp.bfloat16), k.astype(jnp.bfloat16),
                   preferred_element_type=jnp.float32) * scale                  # (H,L,S)
    s = s - jnp.max(s, axis=-1, keepdims=True)
    p = jnp.exp(s)
    p = p / jnp.sum(p, axis=-1, keepdims=True)          # exact fp32 softmax

    ctx = jnp.einsum('hls,hsd->hld', p.astype(jnp.bfloat16), v.astype(jnp.bfloat16),
                     preferred_element_type=jnp.float32)                         # (H,L,d)
    out = jnp.einsum('hld,hde->hle', ctx.astype(jnp.bfloat16), wo,
                     preferred_element_type=jnp.float32)                         # (H,L,E)
    return jnp.sum(out, axis=0) + bo                                             # (L,E)


# ----------------------------------------------------------------------------
# Fused encoder-stack kernel: all layers + final encoder LayerNorm
# ----------------------------------------------------------------------------
def _encoder_stack_kernel(x_ref, wqkv_ref, bqkv_ref, wo_ref, bo_ref, ln1_ref,
                          w1_ref, b1_ref, w2_ref, b2_ref, ln2_ref, nf_ref,
                          o_ref, act_ref, *, num_heads, scale, eps):
    l = pl.program_id(1)

    @pl.when(l == 0)
    def _():
        act_ref[...] = x_ref[0]                          # load this batch's embeddings

    x = act_ref[...]                                     # (S, E) fp32, VMEM-resident

    # self-attention sublayer (post-LN)
    a = _mha(x, x, wqkv_ref[0], bqkv_ref[0], wo_ref[0], bo_ref[0],
             num_heads=num_heads, scale=scale)
    y = _ln(x + a, ln1_ref[0], eps)

    # FFN sublayer (post-LN)
    f = _ffn(y, w1_ref[0], b1_ref[0], w2_ref[0], b2_ref[0])
    y = _ln(y + f, ln2_ref[0], eps)

    act_ref[...] = y                                     # carry to next layer

    @pl.when(l == pl.num_programs(1) - 1)
    def _():
        o_ref[0] = _ln(y, nf_ref[...], eps)              # final encoder LayerNorm


def encoder_stack(src_e, enc, enc_norm, num_heads, eps=1e-5):
    """src_e: (N, S, E) fp32 -> memory (N, S, E) fp32. grid = (batch, layer)."""
    N, S, E = src_e.shape
    Lyr = enc["wqkv"].shape[0]
    H = num_heads
    d = E // H
    F = enc["w1"].shape[-1]

    lw3 = lambda n, l: (l, 0, 0)
    lw4 = lambda n, l: (l, 0, 0, 0)
    kernel = functools.partial(_encoder_stack_kernel, num_heads=H,
                               scale=1.0 / math.sqrt(d), eps=eps)
    return pl.pallas_call(
        kernel,
        grid=(N, Lyr),
        in_specs=[
            pl.BlockSpec((1, S, E), lambda n, l: (n, 0, 0)),     # src embeddings
            pl.BlockSpec((1, 3 * H, E, d), lw4),                 # wqkv (bf16, head-major)
            pl.BlockSpec((1, 3 * H, 1, d), lw4),                 # bqkv
            pl.BlockSpec((1, H, d, E), lw4),                     # wo   (bf16, head-major)
            pl.BlockSpec((1, 1, E), lw3),                        # bo
            pl.BlockSpec((1, 2, E), lw3),                        # ln1 gamma/beta
            pl.BlockSpec((1, E, F), lw3),                        # w1 (bf16)
            pl.BlockSpec((1, 1, F), lw3),                        # b1
            pl.BlockSpec((1, F, E), lw3),                        # w2 (bf16)
            pl.BlockSpec((1, 1, E), lw3),                        # b2
            pl.BlockSpec((1, 2, E), lw3),                        # ln2 gamma/beta
            pl.BlockSpec((2, E), lambda n, l: (0, 0)),           # final encoder norm
        ],
        out_specs=pl.BlockSpec((1, S, E), lambda n, l: (n, 0, 0)),
        out_shape=jax.ShapeDtypeStruct((N, S, E), jnp.float32),
        scratch_shapes=[pltpu.VMEM((S, E), jnp.float32)],        # resident activation
        compiler_params=pltpu.CompilerParams(
            dimension_semantics=("parallel", "arbitrary")),
    )(src_e, enc["wqkv"], enc["bqkv"], enc["wo"], enc["bo"], enc["ln1"],
      enc["w1"], enc["b1"], enc["w2"], enc["b2"], enc["ln2"], enc_norm)


# ----------------------------------------------------------------------------
# Fused decoder-stack kernel: all layers + final LayerNorm + fc_out (padded vocab)
# ----------------------------------------------------------------------------
def _decoder_stack_kernel(y_ref, mem_ref,
                          sa_wqkv_ref, sa_bqkv_ref, sa_wo_ref, sa_bo_ref, ln1_ref,
                          ca_wqkv_ref, ca_bqkv_ref, ca_wo_ref, ca_bo_ref, ln2_ref,
                          w1_ref, b1_ref, w2_ref, b2_ref, ln3_ref,
                          nf_ref, fcw_ref, fcb_ref,
                          o_ref, act_ref, *, num_heads, scale, eps):
    l = pl.program_id(1)

    @pl.when(l == 0)
    def _():
        act_ref[...] = y_ref[0]

    y = act_ref[...]                                     # (T, E) fp32
    mem = mem_ref[0]                                     # (S, E) fp32 (resident across layers)

    # self-attention sublayer
    a = _mha(y, y, sa_wqkv_ref[0], sa_bqkv_ref[0], sa_wo_ref[0], sa_bo_ref[0],
             num_heads=num_heads, scale=scale)
    y = _ln(y + a, ln1_ref[0], eps)
    # cross-attention sublayer (keys/values from encoder memory)
    a = _mha(y, mem, ca_wqkv_ref[0], ca_bqkv_ref[0], ca_wo_ref[0], ca_bo_ref[0],
             num_heads=num_heads, scale=scale)
    y = _ln(y + a, ln2_ref[0], eps)
    # FFN sublayer
    f = _ffn(y, w1_ref[0], b1_ref[0], w2_ref[0], b2_ref[0])
    y = _ln(y + f, ln3_ref[0], eps)

    act_ref[...] = y

    @pl.when(l == pl.num_programs(1) - 1)
    def _():
        yn = _ln(y, nf_ref[...], eps)                    # final decoder LayerNorm
        o_ref[0] = (jnp.dot(yn.astype(jnp.bfloat16), fcw_ref[...],     # fused fc_out
                            preferred_element_type=jnp.float32) + fcb_ref[...])


def decoder_stack(tgt_e, memory, dec, dec_norm, fc_w, fc_b, num_heads, eps=1e-5):
    """tgt_e: (N, T, E), memory: (N, S, E) -> padded logits (N, T, Vpad) fp32."""
    N, T, E = tgt_e.shape
    S = memory.shape[1]
    Lyr = dec["sa_wqkv"].shape[0]
    H = num_heads
    d = E // H
    F = dec["w1"].shape[-1]
    Vp = fc_w.shape[-1]

    lw3 = lambda n, l: (l, 0, 0)
    lw4 = lambda n, l: (l, 0, 0, 0)
    c2 = lambda n, l: (0, 0)
    kernel = functools.partial(_decoder_stack_kernel, num_heads=H,
                               scale=1.0 / math.sqrt(d), eps=eps)
    return pl.pallas_call(
        kernel,
        grid=(N, Lyr),
        in_specs=[
            pl.BlockSpec((1, T, E), lambda n, l: (n, 0, 0)),     # tgt embeddings
            pl.BlockSpec((1, S, E), lambda n, l: (n, 0, 0)),     # encoder memory
            pl.BlockSpec((1, 3 * H, E, d), lw4),                 # self-attn wqkv
            pl.BlockSpec((1, 3 * H, 1, d), lw4),
            pl.BlockSpec((1, H, d, E), lw4),
            pl.BlockSpec((1, 1, E), lw3),
            pl.BlockSpec((1, 2, E), lw3),                        # ln1
            pl.BlockSpec((1, 3 * H, E, d), lw4),                 # cross-attn wqkv
            pl.BlockSpec((1, 3 * H, 1, d), lw4),
            pl.BlockSpec((1, H, d, E), lw4),
            pl.BlockSpec((1, 1, E), lw3),
            pl.BlockSpec((1, 2, E), lw3),                        # ln2
            pl.BlockSpec((1, E, F), lw3),                        # w1
            pl.BlockSpec((1, 1, F), lw3),                        # b1
            pl.BlockSpec((1, F, E), lw3),                        # w2
            pl.BlockSpec((1, 1, E), lw3),                        # b2
            pl.BlockSpec((1, 2, E), lw3),                        # ln3
            pl.BlockSpec((2, E), c2),                            # final decoder norm
            pl.BlockSpec((E, Vp), c2),                           # fc_out weight (bf16, lane-dense)
            pl.BlockSpec((1, Vp), c2),                           # fc_out bias
        ],
        out_specs=pl.BlockSpec((1, T, Vp), lambda n, l: (n, 0, 0)),
        out_shape=jax.ShapeDtypeStruct((N, T, Vp), jnp.float32),
        scratch_shapes=[pltpu.VMEM((T, E), jnp.float32)],        # resident activation
        compiler_params=pltpu.CompilerParams(
            dimension_semantics=("parallel", "arbitrary")),
    )(tgt_e, memory,
      dec["sa_wqkv"], dec["sa_bqkv"], dec["sa_wo"], dec["sa_bo"], dec["ln1"],
      dec["ca_wqkv"], dec["ca_bqkv"], dec["ca_wo"], dec["ca_bo"], dec["ln2"],
      dec["w1"], dec["b1"], dec["w2"], dec["b2"], dec["ln3"],
      dec_norm, fc_w, fc_b)


# ----------------------------------------------------------------------------
# Model forward (glue: embedding gather, batch-first transposes, logits slice)
# ----------------------------------------------------------------------------
def text_transformer_forward(params, src, tgt, *, num_heads, vocab_size):
    # src: (S, N) int32, tgt: (T, N) int32 (seq-first, batch_first=False)
    emb = params["embedding"]                            # (V, E) fp32
    src_e = jnp.take(emb, src, axis=0)                   # (S, N, E)  gather = XLA glue
    tgt_e = jnp.take(emb, tgt, axis=0)                   # (T, N, E)

    x = jnp.transpose(src_e, (1, 0, 2))                  # (N, S, E) batch-first
    y = jnp.transpose(tgt_e, (1, 0, 2))                  # (N, T, E)

    memory = encoder_stack(x, params["encoder"], params["enc_norm"], num_heads)
    logits_p = decoder_stack(y, memory, params["decoder"], params["dec_norm"],
                             params["fc_out_w"], params["fc_out_b"], num_heads)
    logits = logits_p[:, :, :vocab_size]                 # drop vocab lane padding (exact)
    return jnp.transpose(logits, (1, 0, 2))              # (T, N, V) seq-first


# ----------------------------------------------------------------------------
# Deterministic parameter init (synthetic — stacked / head-major / bf16 weights)
# ----------------------------------------------------------------------------
def init_params(key, vocab_size, embed_size, num_heads, num_layers, dim_feedforward=2048):
    E, F, H = embed_size, dim_feedforward, num_heads
    d = E // H
    Lyr = num_layers
    Vp = _round_up(vocab_size, 128)
    keys = iter(jax.random.split(key, 64))

    def w(shape, scale=0.02):
        return (scale * jax.random.normal(next(keys), shape, dtype=jnp.float32)
                ).astype(jnp.bfloat16)

    def ln_stack():                                       # (Lyr, 2, E): gamma=1, beta=0
        return jnp.stack([jnp.ones((Lyr, E), jnp.float32),
                          jnp.zeros((Lyr, E), jnp.float32)], axis=1)

    def attn_stack(prefix=""):
        return {
            prefix + "wqkv": w((Lyr, 3 * H, E, d)),       # head-major Q|K|V projections
            prefix + "bqkv": jnp.zeros((Lyr, 3 * H, 1, d), jnp.float32),
            prefix + "wo": w((Lyr, H, d, E)),             # head-major out-projection
            prefix + "bo": jnp.zeros((Lyr, 1, E), jnp.float32),
        }

    encoder = {**attn_stack(),
               "ln1": ln_stack(),
               "w1": w((Lyr, E, F)), "b1": jnp.zeros((Lyr, 1, F), jnp.float32),
               "w2": w((Lyr, F, E)), "b2": jnp.zeros((Lyr, 1, E), jnp.float32),
               "ln2": ln_stack()}

    decoder = {**attn_stack("sa_"), **attn_stack("ca_"),
               "ln1": ln_stack(), "ln2": ln_stack(), "ln3": ln_stack(),
               "w1": w((Lyr, E, F)), "b1": jnp.zeros((Lyr, 1, F), jnp.float32),
               "w2": w((Lyr, F, E)), "b2": jnp.zeros((Lyr, 1, E), jnp.float32)}

    fc_w = 0.02 * jax.random.normal(next(keys), (E, vocab_size), dtype=jnp.float32)
    fc_w = jnp.pad(fc_w, ((0, 0), (0, Vp - vocab_size))).astype(jnp.bfloat16)

    def ln_single():                                      # (2, E)
        return jnp.stack([jnp.ones((E,), jnp.float32),
                          jnp.zeros((E,), jnp.float32)], axis=0)

    return {
        "embedding": jax.random.normal(next(keys), (vocab_size, E), dtype=jnp.float32),
        "encoder": encoder,
        "decoder": decoder,
        "enc_norm": ln_single(),
        "dec_norm": ln_single(),
        "fc_out_w": fc_w,                                 # (E, Vpad) bf16, lane-dense
        "fc_out_b": jnp.zeros((1, Vp), jnp.float32),      # zero padding -> exact sliced logits
    }


# ----------------------------------------------------------------------------
if __name__ == "__main__":
    # Small shapes consistent with the module's forward.
    # NOTE: hidden_size is unused by the PyTorch module (nn.Transformer keeps
    # its default dim_feedforward=2048); we reproduce that behaviour.
    vocab_size, embed_size, num_heads, num_layers, hidden_size = 50, 32, 4, 2, 64
    S, T, N = 8, 8, 2

    key = jax.random.PRNGKey(0)
    pkey, skey, tkey = jax.random.split(key, 3)
    params = init_params(pkey, vocab_size, embed_size, num_heads, num_layers)
    src = jax.random.randint(skey, (S, N), 0, vocab_size, dtype=jnp.int32)
    tgt = jax.random.randint(tkey, (T, N), 0, vocab_size, dtype=jnp.int32)

    fwd = jax.jit(functools.partial(text_transformer_forward,
                                    num_heads=num_heads, vocab_size=vocab_size))
    out = fwd(params, src, tgt)
    jax.block_until_ready(out)

    assert out.shape == (T, N, vocab_size), out.shape
    assert out.dtype == jnp.float32
    assert bool(jnp.all(jnp.isfinite(out)))
    print("KERNEL_OK")
</pallas_src>

<mosaic_0001>
module attributes {stable_mosaic.version = 11 : i64} {
  func.func @_encoder_stack_kernel(%arg0: i32, %arg1: i32, %arg2: memref<1x8x32xf32, #tpu.memory_space<vmem>>, %arg3: memref<1x12x32x8xbf16, #tpu.memory_space<vmem>>, %arg4: memref<1x12x1x8xf32, #tpu.memory_space<vmem>>, %arg5: memref<1x4x8x32xbf16, #tpu.memory_space<vmem>>, %arg6: memref<1x1x32xf32, #tpu.memory_space<vmem>>, %arg7: memref<1x2x32xf32, #tpu.memory_space<vmem>>, %arg8: memref<1x32x2048xbf16, #tpu.memory_space<vmem>>, %arg9: memref<1x1x2048xf32, #tpu.memory_space<vmem>>, %arg10: memref<1x2048x32xbf16, #tpu.memory_space<vmem>>, %arg11: memref<1x1x32xf32, #tpu.memory_space<vmem>>, %arg12: memref<1x2x32xf32, #tpu.memory_space<vmem>>, %arg13: memref<2x32xf32, #tpu.memory_space<vmem>>, %arg14: memref<1x8x32xf32, #tpu.memory_space<vmem>>, %arg15: memref<8x32xf32, #tpu.memory_space<vmem>>) attributes {dimension_semantics = [#tpu.dimension_semantics<parallel>, #tpu.dimension_semantics<arbitrary>], iteration_bounds = array<i64: 2, 2>, scalar_prefetch = 0 : i64, scratch_operands = 1 : i64, tpu.core_type = #tpu.core_type<tc>, window_params = [{transform_indices = @transform_0, window_bounds = array<i64: 1, 8, 32>}, {transform_indices = @transform_1, window_bounds = array<i64: 1, 12, 32, 8>}, {transform_indices = @transform_2, window_bounds = array<i64: 1, 12, 1, 8>}, {transform_indices = @transform_3, window_bounds = array<i64: 1, 4, 8, 32>}, {transform_indices = @transform_4, window_bounds = array<i64: 1, 1, 32>}, {transform_indices = @transform_5, window_bounds = array<i64: 1, 2, 32>}, {transform_indices = @transform_6, window_bounds = array<i64: 1, 32, 2048>}, {transform_indices = @transform_7, window_bounds = array<i64: 1, 1, 2048>}, {transform_indices = @transform_8, window_bounds = array<i64: 1, 2048, 32>}, {transform_indices = @transform_9, window_bounds = array<i64: 1, 1, 32>}, {transform_indices = @transform_10, window_bounds = array<i64: 1, 2, 32>}, {pipeline_mode = #tpu.pipeline_mode<synchronous>, transform_indices = @transform_11, window_bounds = array<i64: 2, 32>}, {transform_indices = @transform_12, window_bounds = array<i64: 1, 8, 32>}]} {
    %c0_i32 = arith.constant 0 : i32
    %0 = arith.cmpi eq, %arg1, %c0_i32 : i32
    %1 = arith.extui %0 : i1 to i32
    %c0_i32_0 = arith.constant 0 : i32
    %2 = arith.cmpi ne, %1, %c0_i32_0 : i32
    scf.if %2 {
      %c0_60 = arith.constant 0 : index
      %c0_61 = arith.constant 0 : index
      %c0_62 = arith.constant 0 : index
      %129 = vector.load %arg2[%c0_60, %c0_61, %c0_62] : memref<1x8x32xf32, #tpu.memory_space<vmem>>, vector<1x8x32xf32>
      %130 = vector.shape_cast %129 : vector<1x8x32xf32> to vector<8x32xf32>
      %c0_63 = arith.constant 0 : index
      %c0_64 = arith.constant 0 : index
      %131 = vector.load %arg15[%c0_63, %c0_64] : memref<8x32xf32, #tpu.memory_space<vmem>>, vector<8x32xf32>
      tpu.vector_store %arg15[%c0_63, %c0_64], %130 {strides = array<i32>} : memref<8x32xf32, #tpu.memory_space<vmem>>, vector<8x32xf32>,
    } else {
    }
    %c0 = arith.constant 0 : index
    %c0_1 = arith.constant 0 : index
    %3 = vector.load %arg15[%c0, %c0_1] : memref<8x32xf32, #tpu.memory_space<vmem>>, vector<8x32xf32>
    %c0_2 = arith.constant 0 : index
    %c0_3 = arith.constant 0 : index
    %c0_4 = arith.constant 0 : index
    %c0_5 = arith.constant 0 : index
    %4 = vector.load %arg3[%c0_2, %c0_3, %c0_4, %c0_5] : memref<1x12x32x8xbf16, #tpu.memory_space<vmem>>, vector<1x12x32x8xbf16>
    %5 = vector.shape_cast %4 : vector<1x12x32x8xbf16> to vector<12x32x8xbf16>
    %c0_6 = arith.constant 0 : index
    %c0_7 = arith.constant 0 : index
    %c0_8 = arith.constant 0 : index
    %c0_9 = arith.constant 0 : index
    %6 = vector.load %arg4[%c0_6, %c0_7, %c0_8, %c0_9] : memref<1x12x1x8xf32, #tpu.memory_space<vmem>>, vector<1x12x1x8xf32>
    %7 = vector.shape_cast %6 : vector<1x12x1x8xf32> to vector<12x1x8xf32>
    %c0_10 = arith.constant 0 : index
    %c0_11 = arith.constant 0 : index
    %c0_12 = arith.constant 0 : index
    %c0_13 = arith.constant 0 : index
    %8 = vector.load %arg5[%c0_10, %c0_11, %c0_12, %c0_13] : memref<1x4x8x32xbf16, #tpu.memory_space<vmem>>, vector<1x4x8x32xbf16>
    %9 = vector.shape_cast %8 : vector<1x4x8x32xbf16> to vector<4x8x32xbf16>
    %c0_14 = arith.constant 0 : index
    %c0_15 = arith.constant 0 : index
    %c0_16 = arith.constant 0 : index
    %10 = vector.load %arg6[%c0_14, %c0_15, %c0_16] : memref<1x1x32xf32, #tpu.memory_space<vmem>>, vector<1x1x32xf32>
    %11 = vector.shape_cast %10 : vector<1x1x32xf32> to vector<1x32xf32>
    %12 = arith.truncf %3 : vector<8x32xf32> to vector<8x32xbf16>
    %13 = vector.shape_cast %12 : vector<8x32xbf16> to vector<1x8x32xbf16>
    %14 = vector.shape_cast %13 : vector<1x8x32xbf16> to vector<1x8x32xbf16>
    %15 = vector.broadcast %14 : vector<1x8x32xbf16> to vector<4x8x32xbf16>
    %16 = arith.truncf %3 : vector<8x32xf32> to vector<8x32xbf16>
    %17 = vector.shape_cast %16 : vector<8x32xbf16> to vector<1x8x32xbf16>
    %18 = vector.shape_cast %17 : vector<1x8x32xbf16> to vector<1x8x32xbf16>
    %19 = vector.broadcast %18 : vector<1x8x32xbf16> to vector<4x8x32xbf16>
    %20 = vector.extract_strided_slice %5 {offsets = [0, 0, 0], sizes = [4, 32, 8], strides = [1, 1, 1]} : vector<12x32x8xbf16> to vector<4x32x8xbf16>
    "tpu.trace_start"() <{level = 10 : i32, message = "hle,hed->hld"}> : () -> ()
    %cst = arith.constant dense<0.000000e+00> : vector<4x8x8xf32>
    %21 = tpu.matmul %15, %20, %cst {dimension_numbers = #tpu.dot_dimension_numbers<[2], [1], [1], [2], [0, 0, 0, 1, 1, 2], [0], [0]>} : vector<4x8x32xbf16>, vector<4x32x8xbf16>, vector<4x8x8xf32> -> vector<4x8x8xf32>
    "tpu.trace_stop"() : () -> ()
    %22 = vector.extract_strided_slice %7 {offsets = [0, 0, 0], sizes = [4, 1, 8], strides = [1, 1, 1]} : vector<12x1x8xf32> to vector<4x1x8xf32>
    %23 = vector.broadcast %22 : vector<4x1x8xf32> to vector<4x8x8xf32>
    %24 = arith.addf %21, %23 : vector<4x8x8xf32>
    %25 = vector.extract_strided_slice %5 {offsets = [4, 0, 0], sizes = [4, 32, 8], strides = [1, 1, 1]} : vector<12x32x8xbf16> to vector<4x32x8xbf16>
    "tpu.trace_start"() <{level = 10 : i32, message = "hse,hed->hsd"}> : () -> ()
    %cst_17 = arith.constant dense<0.000000e+00> : vector<4x8x8xf32>
    %26 = tpu.matmul %19, %25, %cst_17 {dimension_numbers = #tpu.dot_dimension_numbers<[2], [1], [1], [2], [0, 0, 0, 1, 1, 2], [0], [0]>} : vector<4x8x32xbf16>, vector<4x32x8xbf16>, vector<4x8x8xf32> -> vector<4x8x8xf32>
    "tpu.trace_stop"() : () -> ()
    %27 = vector.extract_strided_slice %7 {offsets = [4, 0, 0], sizes = [4, 1, 8], strides = [1, 1, 1]} : vector<12x1x8xf32> to vector<4x1x8xf32>
    %28 = vector.broadcast %27 : vector<4x1x8xf32> to vector<4x8x8xf32>
    %29 = arith.addf %26, %28 : vector<4x8x8xf32>
    %30 = vector.extract_strided_slice %5 {offsets = [8, 0, 0], sizes = [4, 32, 8], strides = [1, 1, 1]} : vector<12x32x8xbf16> to vector<4x32x8xbf16>
    "tpu.trace_start"() <{level = 10 : i32, message = "hse,hed->hsd"}> : () -> ()
    %cst_18 = arith.constant dense<0.000000e+00> : vector<4x8x8xf32>
    %31 = tpu.matmul %19, %30, %cst_18 {dimension_numbers = #tpu.dot_dimension_numbers<[2], [1], [1], [2], [0, 0, 0, 1, 1, 2], [0], [0]>} : vector<4x8x32xbf16>, vector<4x32x8xbf16>, vector<4x8x8xf32> -> vector<4x8x8xf32>
    "tpu.trace_stop"() : () -> ()
    %32 = vector.extract_strided_slice %7 {offsets = [8, 0, 0], sizes = [4, 1, 8], strides = [1, 1, 1]} : vector<12x1x8xf32> to vector<4x1x8xf32>
    %33 = vector.broadcast %32 : vector<4x1x8xf32> to vector<4x8x8xf32>
    %34 = arith.addf %31, %33 : vector<4x8x8xf32>
    %35 = arith.truncf %24 : vector<4x8x8xf32> to vector<4x8x8xbf16>
    %36 = arith.truncf %29 : vector<4x8x8xf32> to vector<4x8x8xbf16>
    "tpu.trace_start"() <{level = 10 : i32, message = "hld,hsd->hls"}> : () -> ()
    %cst_19 = arith.constant dense<0.000000e+00> : vector<4x8x8xf32>
    %37 = tpu.matmul %35, %36, %cst_19 {dimension_numbers = #tpu.dot_dimension_numbers<[2], [2], [1], [1], [0, 0, 0, 1, 1, 1], [0], [0]>} : vector<4x8x8xbf16>, vector<4x8x8xbf16>, vector<4x8x8xf32> -> vector<4x8x8xf32>
    "tpu.trace_stop"() : () -> ()
    %cst_20 = arith.constant 0.353553385 : f32
    %38 = vector.broadcast %cst_20 : f32 to vector<4x8x8xf32>
    %39 = arith.mulf %37, %38 : vector<4x8x8xf32>
    %cst_21 = arith.constant dense<0xFF800000> : vector<4x8xf32>
    %40 = vector.multi_reduction <maximumf>, %39, %cst_21 [2] : vector<4x8x8xf32> to vector<4x8xf32>
    %41 = vector.shape_cast %40 : vector<4x8xf32> to vector<4x8x1xf32>
    %42 = vector.broadcast %41 : vector<4x8x1xf32> to vector<4x8x8xf32>
    %43 = arith.subf %39, %42 : vector<4x8x8xf32>
    %44 = math.exp %43 : vector<4x8x8xf32>
    %cst_22 = arith.constant dense<0.000000e+00> : vector<4x8xf32>
    %45 = vector.multi_reduction <add>, %44, %cst_22 [2] : vector<4x8x8xf32> to vector<4x8xf32>
    %46 = vector.shape_cast %45 : vector<4x8xf32> to vector<4x8x1xf32>
    %47 = vector.broadcast %46 : vector<4x8x1xf32> to vector<4x8x8xf32>
    %48 = arith.divf %44, %47 : vector<4x8x8xf32>
    %49 = arith.truncf %48 : vector<4x8x8xf32> to vector<4x8x8xbf16>
    %50 = arith.truncf %34 : vector<4x8x8xf32> to vector<4x8x8xbf16>
    "tpu.trace_start"() <{level = 10 : i32, message = "hls,hsd->hld"}> : () -> ()
    %cst_23 = arith.constant dense<0.000000e+00> : vector<4x8x8xf32>
    %51 = tpu.matmul %49, %50, %cst_23 {dimension_numbers = #tpu.dot_dimension_numbers<[2], [1], [1], [2], [0, 0, 0, 1, 1, 2], [0], [0]>} : vector<4x8x8xbf16>, vector<4x8x8xbf16>, vector<4x8x8xf32> -> vector<4x8x8xf32>
    "tpu.trace_stop"() : () -> ()
    %52 = arith.truncf %51 : vector<4x8x8xf32> to vector<4x8x8xbf16>
    "tpu.trace_start"() <{level = 10 : i32, message = "hld,hde->hle"}> : () -> ()
    %cst_24 = arith.constant dense<0.000000e+00> : vector<4x8x32xf32>
    %53 = tpu.matmul %52, %9, %cst_24 {dimension_numbers = #tpu.dot_dimension_numbers<[2], [1], [1], [2], [0, 0, 0, 1, 1, 2], [0], [0]>} : vector<4x8x8xbf16>, vector<4x8x32xbf16>, vector<4x8x32xf32> -> vector<4x8x32xf32>
    "tpu.trace_stop"() : () -> ()
    %cst_25 = arith.constant dense<0.000000e+00> : vector<8x32xf32>
    %54 = vector.multi_reduction <add>, %53, %cst_25 [0] : vector<4x8x32xf32> to vector<8x32xf32>
    %55 = vector.broadcast %11 : vector<1x32xf32> to vector<8x32xf32>
    %56 = arith.addf %54, %55 : vector<8x32xf32>
    %57 = arith.addf %3, %56 : vector<8x32xf32>
    %c0_26 = arith.constant 0 : index
    %c0_27 = arith.constant 0 : index
    %c0_28 = arith.constant 0 : index
    %58 = vector.load %arg7[%c0_26, %c0_27, %c0_28] : memref<1x2x32xf32, #tpu.memory_space<vmem>>, vector<1x2x32xf32>
    %59 = vector.shape_cast %58 : vector<1x2x32xf32> to vector<2x32xf32>
    %60 = vector.extract_strided_slice %59 {offsets = [0, 0], sizes = [1, 32], strides = [1, 1]} : vector<2x32xf32> to vector<1x32xf32>
    %61 = vector.extract_strided_slice %59 {offsets = [1, 0], sizes = [1, 32], strides = [1, 1]} : vector<2x32xf32> to vector<1x32xf32>
    %cst_29 = arith.constant dense<0.000000e+00> : vector<8xf32>
    %62 = vector.multi_reduction <add>, %57, %cst_29 [1] : vector<8x32xf32> to vector<8xf32>
    %63 = vector.shape_cast %62 : vector<8xf32> to vector<8x1xf32>
    %cst_30 = arith.constant 3.200000e+01 : f32
    %64 = vector.broadcast %cst_30 : f32 to vector<8x1xf32>
    %65 = arith.divf %63, %64 : vector<8x1xf32>
    %66 = vector.broadcast %65 : vector<8x1xf32> to vector<8x32xf32>
    %67 = arith.subf %57, %66 : vector<8x32xf32>
    %68 = arith.mulf %67, %67 : vector<8x32xf32>
    %cst_31 = arith.constant dense<0.000000e+00> : vector<8xf32>
    %69 = vector.multi_reduction <add>, %68, %cst_31 [1] : vector<8x32xf32> to vector<8xf32>
    %70 = vector.shape_cast %69 : vector<8xf32> to vector<8x1xf32>
    %cst_32 = arith.constant 3.200000e+01 : f32
    %71 = vector.broadcast %cst_32 : f32 to vector<8x1xf32>
    %72 = arith.divf %70, %71 : vector<8x1xf32>
    %cst_33 = arith.constant 9.99999974E-6 : f32
    %73 = vector.broadcast %cst_33 : f32 to vector<8x1xf32>
    %74 = arith.addf %72, %73 : vector<8x1xf32>
    %75 = math.rsqrt %74 : vector<8x1xf32>
    %76 = vector.broadcast %75 : vector<8x1xf32> to vector<8x32xf32>
    %77 = arith.mulf %67, %76 : vector<8x32xf32>
    %78 = vector.broadcast %60 : vector<1x32xf32> to vector<8x32xf32>
    %79 = arith.mulf %77, %78 : vector<8x32xf32>
    %80 = vector.broadcast %61 : vector<1x32xf32> to vector<8x32xf32>
    %81 = arith.addf %79, %80 : vector<8x32xf32>
    %c0_34 = arith.constant 0 : index
    %c0_35 = arith.constant 0 : index
    %c0_36 = arith.constant 0 : index
    %82 = vector.load %arg8[%c0_34, %c0_35, %c0_36] : memref<1x32x2048xbf16, #tpu.memory_space<vmem>>, vector<1x32x2048xbf16>
    %83 = vector.shape_cast %82 : vector<1x32x2048xbf16> to vector<32x2048xbf16>
    %c0_37 = arith.constant 0 : index
    %c0_38 = arith.constant 0 : index
    %c0_39 = arith.constant 0 : index
    %84 = vector.load %arg9[%c0_37, %c0_38, %c0_39] : memref<1x1x2048xf32, #tpu.memory_space<vmem>>, vector<1x1x2048xf32>
    %85 = vector.shape_cast %84 : vector<1x1x2048xf32> to vector<1x2048xf32>
    %c0_40 = arith.constant 0 : index
    %c0_41 = arith.constant 0 : index
    %c0_42 = arith.constant 0 : index
    %86 = vector.load %arg10[%c0_40, %c0_41, %c0_42] : memref<1x2048x32xbf16, #tpu.memory_space<vmem>>, vector<1x2048x32xbf16>
    %87 = vector.shape_cast %86 : vector<1x2048x32xbf16> to vector<2048x32xbf16>
    %c0_43 = arith.constant 0 : index
    %c0_44 = arith.constant 0 : index
    %c0_45 = arith.constant 0 : index
    %88 = vector.load %arg11[%c0_43, %c0_44, %c0_45] : memref<1x1x32xf32, #tpu.memory_space<vmem>>, vector<1x1x32xf32>
    %89 = vector.shape_cast %88 : vector<1x1x32xf32> to vector<1x32xf32>
    %90 = arith.truncf %81 : vector<8x32xf32> to vector<8x32xbf16>
    %cst_46 = arith.constant dense<0.000000e+00> : vector<8x2048xf32>
    %91 = tpu.matmul %90, %83, %cst_46 {dimension_numbers = #tpu.dot_dimension_numbers<[1], [0], [0], [1], [0, 0, 1, 1], [], []>} : vector<8x32xbf16>, vector<32x2048xbf16>, vector<8x2048xf32> -> vector<8x2048xf32>
    %92 = vector.broadcast %85 : vector<1x2048xf32> to vector<8x2048xf32>
    %93 = arith.addf %91, %92 : vector<8x2048xf32>
    %cst_47 = arith.constant 0.000000e+00 : f32
    %94 = vector.broadcast %cst_47 : f32 to vector<8x2048xf32>
    %95 = arith.maximumf %93, %94 : vector<8x2048xf32>
    %96 = arith.truncf %95 : vector<8x2048xf32> to vector<8x2048xbf16>
    %cst_48 = arith.constant dense<0.000000e+00> : vector<8x32xf32>
    %97 = tpu.matmul %96, %87, %cst_48 {dimension_numbers = #tpu.dot_dimension_numbers<[1], [0], [0], [1], [0, 0, 1, 1], [], []>} : vector<8x2048xbf16>, vector<2048x32xbf16>, vector<8x32xf32> -> vector<8x32xf32>
    %98 = vector.broadcast %89 : vector<1x32xf32> to vector<8x32xf32>
    %99 = arith.addf %97, %98 : vector<8x32xf32>
    %100 = arith.addf %81, %99 : vector<8x32xf32>
    %c0_49 = arith.constant 0 : index
    %c0_50 = arith.constant 0 : index
    %c0_51 = arith.constant 0 : index
    %101 = vector.load %arg12[%c0_49, %c0_50, %c0_51] : memref<1x2x32xf32, #tpu.memory_space<vmem>>, vector<1x2x32xf32>
    %102 = vector.shape_cast %101 : vector<1x2x32xf32> to vector<2x32xf32>
    %103 = vector.extract_strided_slice %102 {offsets = [0, 0], sizes = [1, 32], strides = [1, 1]} : vector<2x32xf32> to vector<1x32xf32>
    %104 = vector.extract_strided_slice %102 {offsets = [1, 0], sizes = [1, 32], strides = [1, 1]} : vector<2x32xf32> to vector<1x32xf32>
    %cst_52 = arith.constant dense<0.000000e+00> : vector<8xf32>
    %105 = vector.multi_reduction <add>, %100, %cst_52 [1] : vector<8x32xf32> to vector<8xf32>
    %106 = vector.shape_cast %105 : vector<8xf32> to vector<8x1xf32>
    %cst_53 = arith.constant 3.200000e+01 : f32
    %107 = vector.broadcast %cst_53 : f32 to vector<8x1xf32>
    %108 = arith.divf %106, %107 : vector<8x1xf32>
    %109 = vector.broadcast %108 : vector<8x1xf32> to vector<8x32xf32>
    %110 = arith.subf %100, %109 : vector<8x32xf32>
    %111 = arith.mulf %110, %110 : vector<8x32xf32>
    %cst_54 = arith.constant dense<0.000000e+00> : vector<8xf32>
    %112 = vector.multi_reduction <add>, %111, %cst_54 [1] : vector<8x32xf32> to vector<8xf32>
    %113 = vector.shape_cast %112 : vector<8xf32> to vector<8x1xf32>
    %cst_55 = arith.constant 3.200000e+01 : f32
    %114 = vector.broadcast %cst_55 : f32 to vector<8x1xf32>
    %115 = arith.divf %113, %114 : vector<8x1xf32>
    %cst_56 = arith.constant 9.99999974E-6 : f32
    %116 = vector.broadcast %cst_56 : f32 to vector<8x1xf32>
    %117 = arith.addf %115, %116 : vector<8x1xf32>
    %118 = math.rsqrt %117 : vector<8x1xf32>
    %119 = vector.broadcast %118 : vector<8x1xf32> to vector<8x32xf32>
    %120 = arith.mulf %110, %119 : vector<8x32xf32>
    %121 = vector.broadcast %103 : vector<1x32xf32> to vector<8x32xf32>
    %122 = arith.mulf %120, %121 : vector<8x32xf32>
    %123 = vector.broadcast %104 : vector<1x32xf32> to vector<8x32xf32>
    %124 = arith.addf %122, %123 : vector<8x32xf32>
    %c0_57 = arith.constant 0 : index
    %c0_58 = arith.constant 0 : index
    %125 = vector.load %arg15[%c0_57, %c0_58] : memref<8x32xf32, #tpu.memory_space<vmem>>, vector<8x32xf32>
    tpu.vector_store %arg15[%c0_57, %c0_58], %124 {strides = array<i32>} : memref<8x32xf32, #tpu.memory_space<vmem>>, vector<8x32xf32>,
    %c1_i32 = arith.constant 1 : i32
    %126 = arith.cmpi eq, %arg1, %c1_i32 : i32
    %127 = arith.extui %126 : i1 to i32
    %c0_i32_59 = arith.constant 0 : i32
    %128 = arith.cmpi ne, %127, %c0_i32_59 : i32
    scf.if %128 {
      %c0_60 = arith.constant 0 : index
      %c0_61 = arith.constant 0 : index
      %129 = vector.load %arg13[%c0_60, %c0_61] : memref<2x32xf32, #tpu.memory_space<vmem>>, vector<2x32xf32>
      %130 = vector.extract_strided_slice %129 {offsets = [0, 0], sizes = [1, 32], strides = [1, 1]} : vector<2x32xf32> to vector<1x32xf32>
      %131 = vector.extract_strided_slice %129 {offsets = [1, 0], sizes = [1, 32], strides = [1, 1]} : vector<2x32xf32> to vector<1x32xf32>
      %cst_62 = arith.constant dense<0.000000e+00> : vector<8xf32>
      %132 = vector.multi_reduction <add>, %124, %cst_62 [1] : vector<8x32xf32> to vector<8xf32>
      %133 = vector.shape_cast %132 : vector<8xf32> to vector<8x1xf32>
      %cst_63 = arith.constant 3.200000e+01 : f32
      %134 = vector.broadcast %cst_63 : f32 to vector<8x1xf32>
      %135 = arith.divf %133, %134 : vector<8x1xf32>
      %136 = vector.broadcast %135 : vector<8x1xf32> to vector<8x32xf32>
      %137 = arith.subf %124, %136 : vector<8x32xf32>
      %138 = arith.mulf %137, %137 : vector<8x32xf32>
      %cst_64 = arith.constant dense<0.000000e+00> : vector<8xf32>
      %139 = vector.multi_reduction <add>, %138, %cst_64 [1] : vector<8x32xf32> to vector<8xf32>
      %140 = vector.shape_cast %139 : vector<8xf32> to vector<8x1xf32>
      %cst_65 = arith.constant 3.200000e+01 : f32
      %141 = vector.broadcast %cst_65 : f32 to vector<8x1xf32>
      %142 = arith.divf %140, %141 : vector<8x1xf32>
      %cst_66 = arith.constant 9.99999974E-6 : f32
      %143 = vector.broadcast %cst_66 : f32 to vector<8x1xf32>
      %144 = arith.addf %142, %143 : vector<8x1xf32>
      %145 = math.rsqrt %144 : vector<8x1xf32>
      %146 = vector.broadcast %145 : vector<8x1xf32> to vector<8x32xf32>
      %147 = arith.mulf %137, %146 : vector<8x32xf32>
      %148 = vector.broadcast %130 : vector<1x32xf32> to vector<8x32xf32>
      %149 = arith.mulf %147, %148 : vector<8x32xf32>
      %150 = vector.broadcast %131 : vector<1x32xf32> to vector<8x32xf32>
      %151 = arith.addf %149, %150 : vector<8x32xf32>
      %c0_67 = arith.constant 0 : index
      %c0_68 = arith.constant 0 : index
      %c0_69 = arith.constant 0 : index
      %152 = vector.load %arg14[%c0_67, %c0_68, %c0_69] : memref<1x8x32xf32, #tpu.memory_space<vmem>>, vector<1x8x32xf32>
      %153 = vector.shape_cast %152 : vector<1x8x32xf32> to vector<8x32xf32>
      %154 = vector.shape_cast %151 : vector<8x32xf32> to vector<1x8x32xf32>
      tpu.vector_store %arg14[%c0_67, %c0_68, %c0_69], %154 {strides = array<i32>} : memref<1x8x32xf32, #tpu.memory_space<vmem>>, vector<1x8x32xf32>,
    } else {
    }
    return
  }
  func.func @transform_0(%arg0: i32, %arg1: i32) -> (i32, i32, i32) {
    %c0_i32 = arith.constant 0 : i32
    %c0_i32_0 = arith.constant 0 : i32
    %c0_i32_1 = arith.constant 0 : i32
    return %arg0, %c0_i32, %c0_i32_0 : i32, i32, i32
  }
  func.func @transform_1(%arg0: i32, %arg1: i32) -> (i32, i32, i32, i32) {
    %c0_i32 = arith.constant 0 : i32
    %c0_i32_0 = arith.constant 0 : i32
    %c0_i32_1 = arith.constant 0 : i32
    %c0_i32_2 = arith.constant 0 : i32
    return %arg1, %c0_i32, %c0_i32_0, %c0_i32_1 : i32, i32, i32, i32
  }
  func.func @transform_2(%arg0: i32, %arg1: i32) -> (i32, i32, i32, i32) {
    %c0_i32 = arith.constant 0 : i32
    %c0_i32_0 = arith.constant 0 : i32
    %c0_i32_1 = arith.constant 0 : i32
    %c0_i32_2 = arith.constant 0 : i32
    return %arg1, %c0_i32, %c0_i32_0, %c0_i32_1 : i32, i32, i32, i32
  }
  func.func @transform_3(%arg0: i32, %arg1: i32) -> (i32, i32, i32, i32) {
    %c0_i32 = arith.constant 0 : i32
    %c0_i32_0 = arith.constant 0 : i32
    %c0_i32_1 = arith.constant 0 : i32
    %c0_i32_2 = arith.constant 0 : i32
    return %arg1, %c0_i32, %c0_i32_0, %c0_i32_1 : i32, i32, i32, i32
  }
  func.func @transform_4(%arg0: i32, %arg1: i32) -> (i32, i32, i32) {
    %c0_i32 = arith.constant 0 : i32
    %c0_i32_0 = arith.constant 0 : i32
    %c0_i32_1 = arith.constant 0 : i32
    return %arg1, %c0_i32, %c0_i32_0 : i32, i32, i32
  }
  func.func @transform_5(%arg0: i32, %arg1: i32) -> (i32, i32, i32) {
    %c0_i32 = arith.constant 0 : i32
    %c0_i32_0 = arith.constant 0 : i32
    %c0_i32_1 = arith.constant 0 : i32
    return %arg1, %c0_i32, %c0_i32_0 : i32, i32, i32
  }
  func.func @transform_6(%arg0: i32, %arg1: i32) -> (i32, i32, i32) {
    %c0_i32 = arith.constant 0 : i32
    %c0_i32_0 = arith.constant 0 : i32
    %c0_i32_1 = arith.constant 0 : i32
    return %arg1, %c0_i32, %c0_i32_0 : i32, i32, i32
  }
  func.func @transform_7(%arg0: i32, %arg1: i32) -> (i32, i32, i32) {
    %c0_i32 = arith.constant 0 : i32
    %c0_i32_0 = arith.constant 0 : i32
    %c0_i32_1 = arith.constant 0 : i32
    return %arg1, %c0_i32, %c0_i32_0 : i32, i32, i32
  }
  func.func @transform_8(%arg0: i32, %arg1: i32) -> (i32, i32, i32) {
    %c0_i32 = arith.constant 0 : i32
    %c0_i32_0 = arith.constant 0 : i32
    %c0_i32_1 = arith.constant 0 : i32
    return %arg1, %c0_i32, %c0_i32_0 : i32, i32, i32
  }
  func.func @transform_9(%arg0: i32, %arg1: i32) -> (i32, i32, i32) {
    %c0_i32 = arith.constant 0 : i32
    %c0_i32_0 = arith.constant 0 : i32
    %c0_i32_1 = arith.constant 0 : i32
    return %arg1, %c0_i32, %c0_i32_0 : i32, i32, i32
  }
  func.func @transform_10(%arg0: i32, %arg1: i32) -> (i32, i32, i32) {
    %c0_i32 = arith.constant 0 : i32
    %c0_i32_0 = arith.constant 0 : i32
    %c0_i32_1 = arith.constant 0 : i32
    return %arg1, %c0_i32, %c0_i32_0 : i32, i32, i32
  }
  func.func @transform_11(%arg0: i32, %arg1: i32) -> (i32, i32) {
    %c0_i32 = arith.constant 0 : i32
    %c0_i32_0 = arith.constant 0 : i32
    %c0_i32_1 = arith.constant 0 : i32
    return %c0_i32, %c0_i32_0 : i32, i32
  }
  func.func @transform_12(%arg0: i32, %arg1: i32) -> (i32, i32, i32) {
    %c0_i32 = arith.constant 0 : i32
    %c0_i32_0 = arith.constant 0 : i32
    %c0_i32_1 = arith.constant 0 : i32
    return %arg0, %c0_i32, %c0_i32_0 : i32, i32, i32
  }
}

module attributes {stable_mosaic.version = 11 : i64} {
  func.func @_decoder_stack_kernel(%arg0: i32, %arg1: i32, %arg2: memref<1x8x32xf32, #tpu.memory_space<vmem>>, %arg3: memref<1x8x32xf32, #tpu.memory_space<vmem>>, %arg4: memref<1x12x32x8xbf16, #tpu.memory_space<vmem>>, %arg5: memref<1x12x1x8xf32, #tpu.memory_space<vmem>>, %arg6: memref<1x4x8x32xbf16, #tpu.memory_space<vmem>>, %arg7: memref<1x1x32xf32, #tpu.memory_space<vmem>>, %arg8: memref<1x2x32xf32, #tpu.memory_space<vmem>>, %arg9: memref<1x12x32x8xbf16, #tpu.memory_space<vmem>>, %arg10: memref<1x12x1x8xf32, #tpu.memory_space<vmem>>, %arg11: memref<1x4x8x32xbf16, #tpu.memory_space<vmem>>, %arg12: memref<1x1x32xf32, #tpu.memory_space<vmem>>, %arg13: memref<1x2x32xf32, #tpu.memory_space<vmem>>, %arg14: memref<1x32x2048xbf16, #tpu.memory_space<vmem>>, %arg15: memref<1x1x2048xf32, #tpu.memory_space<vmem>>, %arg16: memref<1x2048x32xbf16, #tpu.memory_space<vmem>>, %arg17: memref<1x1x32xf32, #tpu.memory_space<vmem>>, %arg18: memref<1x2x32xf32, #tpu.memory_space<vmem>>, %arg19: memref<2x32xf32, #tpu.memory_space<vmem>>, %arg20: memref<32x128xbf16, #tpu.memory_space<vmem>>, %arg21: memref<1x128xf32, #tpu.memory_space<vmem>>, %arg22: memref<1x8x128xf32, #tpu.memory_space<vmem>>, %arg23: memref<8x32xf32, #tpu.memory_space<vmem>>) attributes {dimension_semantics = [#tpu.dimension_semantics<parallel>, #tpu.dimension_semantics<arbitrary>], iteration_bounds = array<i64: 2, 2>, scalar_prefetch = 0 : i64, scratch_operands = 1 : i64, tpu.core_type = #tpu.core_type<tc>, window_params = [{transform_indices = @transform_0, window_bounds = array<i64: 1, 8, 32>}, {transform_indices = @transform_1, window_bounds = array<i64: 1, 8, 32>}, {transform_indices = @transform_2, window_bounds = array<i64: 1, 12, 32, 8>}, {transform_indices = @transform_3, window_bounds = array<i64: 1, 12, 1, 8>}, {transform_indices = @transform_4, window_bounds = array<i64: 1, 4, 8, 32>}, {transform_indices = @transform_5, window_bounds = array<i64: 1, 1, 32>}, {transform_indices = @transform_6, window_bounds = array<i64: 1, 2, 32>}, {transform_indices = @transform_7, window_bounds = array<i64: 1, 12, 32, 8>}, {transform_indices = @transform_8, window_bounds = array<i64: 1, 12, 1, 8>}, {transform_indices = @transform_9, window_bounds = array<i64: 1, 4, 8, 32>}, {transform_indices = @transform_10, window_bounds = array<i64: 1, 1, 32>}, {transform_indices = @transform_11, window_bounds = array<i64: 1, 2, 32>}, {transform_indices = @transform_12, window_bounds = array<i64: 1, 32, 2048>}, {transform_indices = @transform_13, window_bounds = array<i64: 1, 1, 2048>}, {transform_indices = @transform_14, window_bounds = array<i64: 1, 2048, 32>}, {transform_indices = @transform_15, window_bounds = array<i64: 1, 1, 32>}, {transform_indices = @transform_16, window_bounds = array<i64: 1, 2, 32>}, {pipeline_mode = #tpu.pipeline_mode<synchronous>, transform_indices = @transform_17, window_bounds = array<i64: 2, 32>}, {pipeline_mode = #tpu.pipeline_mode<synchronous>, transform_indices = @transform_18, window_bounds = array<i64: 32, 128>}, {pipeline_mode = #tpu.pipeline_mode<synchronous>, transform_indices = @transform_19, window_bounds = array<i64: 1, 128>}, {transform_indices = @transform_20, window_bounds = array<i64: 1, 8, 128>}]} {
    %c0_i32 = arith.constant 0 : i32
    %0 = arith.cmpi eq, %arg1, %c0_i32 : i32
    %1 = arith.extui %0 : i1 to i32
    %c0_i32_0 = arith.constant 0 : i32
    %2 = arith.cmpi ne, %1, %c0_i32_0 : i32
    scf.if %2 {
      %c0_96 = arith.constant 0 : index
      %c0_97 = arith.constant 0 : index
      %c0_98 = arith.constant 0 : index
      %209 = vector.load %arg2[%c0_96, %c0_97, %c0_98] : memref<1x8x32xf32, #tpu.memory_space<vmem>>, vector<1x8x32xf32>
      %210 = vector.shape_cast %209 : vector<1x8x32xf32> to vector<8x32xf32>
      %c0_99 = arith.constant 0 : index
      %c0_100 = arith.constant 0 : index
      %211 = vector.load %arg23[%c0_99, %c0_100] : memref<8x32xf32, #tpu.memory_space<vmem>>, vector<8x32xf32>
      tpu.vector_store %arg23[%c0_99, %c0_100], %210 {strides = array<i32>} : memref<8x32xf32, #tpu.memory_space<vmem>>, vector<8x32xf32>,
    } else {
    }
    %c0 = arith.constant 0 : index
    %c0_1 = arith.constant 0 : index
    %3 = vector.load %arg23[%c0, %c0_1] : memref<8x32xf32, #tpu.memory_space<vmem>>, vector<8x32xf32>
    %c0_2 = arith.constant 0 : index
    %c0_3 = arith.constant 0 : index
    %c0_4 = arith.constant 0 : index
    %4 = vector.load %arg3[%c0_2, %c0_3, %c0_4] : memref<1x8x32xf32, #tpu.memory_space<vmem>>, vector<1x8x32xf32>
    %5 = vector.shape_cast %4 : vector<1x8x32xf32> to vector<8x32xf32>
    %c0_5 = arith.constant 0 : index
    %c0_6 = arith.constant 0 : index
    %c0_7 = arith.constant 0 : index
    %c0_8 = arith.constant 0 : index
    %6 = vector.load %arg4[%c0_5, %c0_6, %c0_7, %c0_8] : memref<1x12x32x8xbf16, #tpu.memory_space<vmem>>, vector<1x12x32x8xbf16>
    %7 = vector.shape_cast %6 : vector<1x12x32x8xbf16> to vector<12x32x8xbf16>
    %c0_9 = arith.constant 0 : index
    %c0_10 = arith.constant 0 : index
    %c0_11 = arith.constant 0 : index
    %c0_12 = arith.constant 0 : index
    %8 = vector.load %arg5[%c0_9, %c0_10, %c0_11, %c0_12] : memref<1x12x1x8xf32, #tpu.memory_space<vmem>>, vector<1x12x1x8xf32>
    %9 = vector.shape_cast %8 : vector<1x12x1x8xf32> to vector<12x1x8xf32>
    %c0_13 = arith.constant 0 : index
    %c0_14 = arith.constant 0 : index
    %c0_15 = arith.constant 0 : index
    %c0_16 = arith.constant 0 : index
    %10 = vector.load %arg6[%c0_13, %c0_14, %c0_15, %c0_16] : memref<1x4x8x32xbf16, #tpu.memory_space<vmem>>, vector<1x4x8x32xbf16>
    %11 = vector.shape_cast %10 : vector<1x4x8x32xbf16> to vector<4x8x32xbf16>
    %c0_17 = arith.constant 0 : index
    %c0_18 = arith.constant 0 : index
    %c0_19 = arith.constant 0 : index
    %12 = vector.load %arg7[%c0_17, %c0_18, %c0_19] : memref<1x1x32xf32, #tpu.memory_space<vmem>>, vector<1x1x32xf32>
    %13 = vector.shape_cast %12 : vector<1x1x32xf32> to vector<1x32xf32>
    %14 = arith.truncf %3 : vector<8x32xf32> to vector<8x32xbf16>
    %15 = vector.shape_cast %14 : vector<8x32xbf16> to vector<1x8x32xbf16>
    %16 = vector.shape_cast %15 : vector<1x8x32xbf16> to vector<1x8x32xbf16>
    %17 = vector.broadcast %16 : vector<1x8x32xbf16> to vector<4x8x32xbf16>
    %18 = arith.truncf %3 : vector<8x32xf32> to vector<8x32xbf16>
    %19 = vector.shape_cast %18 : vector<8x32xbf16> to vector<1x8x32xbf16>
    %20 = vector.shape_cast %19 : vector<1x8x32xbf16> to vector<1x8x32xbf16>
    %21 = vector.broadcast %20 : vector<1x8x32xbf16> to vector<4x8x32xbf16>
    %22 = vector.extract_strided_slice %7 {offsets = [0, 0, 0], sizes = [4, 32, 8], strides = [1, 1, 1]} : vector<12x32x8xbf16> to vector<4x32x8xbf16>
    "tpu.trace_start"() <{level = 10 : i32, message = "hle,hed->hld"}> : () -> ()
    %cst = arith.constant dense<0.000000e+00> : vector<4x8x8xf32>
    %23 = tpu.matmul %17, %22, %cst {dimension_numbers = #tpu.dot_dimension_numbers<[2], [1], [1], [2], [0, 0, 0, 1, 1, 2], [0], [0]>} : vector<4x8x32xbf16>, vector<4x32x8xbf16>, vector<4x8x8xf32> -> vector<4x8x8xf32>
    "tpu.trace_stop"() : () -> ()
    %24 = vector.extract_strided_slice %9 {offsets = [0, 0, 0], sizes = [4, 1, 8], strides = [1, 1, 1]} : vector<12x1x8xf32> to vector<4x1x8xf32>
    %25 = vector.broadcast %24 : vector<4x1x8xf32> to vector<4x8x8xf32>
    %26 = arith.addf %23, %25 : vector<4x8x8xf32>
    %27 = vector.extract_strided_slice %7 {offsets = [4, 0, 0], sizes = [4, 32, 8], strides = [1, 1, 1]} : vector<12x32x8xbf16> to vector<4x32x8xbf16>
    "tpu.trace_start"() <{level = 10 : i32, message = "hse,hed->hsd"}> : () -> ()
    %cst_20 = arith.constant dense<0.000000e+00> : vector<4x8x8xf32>
    %28 = tpu.matmul %21, %27, %cst_20 {dimension_numbers = #tpu.dot_dimension_numbers<[2], [1], [1], [2], [0, 0, 0, 1, 1, 2], [0], [0]>} : vector<4x8x32xbf16>, vector<4x32x8xbf16>, vector<4x8x8xf32> -> vector<4x8x8xf32>
    "tpu.trace_stop"() : () -> ()
    %29 = vector.extract_strided_slice %9 {offsets = [4, 0, 0], sizes = [4, 1, 8], strides = [1, 1, 1]} : vector<12x1x8xf32> to vector<4x1x8xf32>
    %30 = vector.broadcast %29 : vector<4x1x8xf32> to vector<4x8x8xf32>
    %31 = arith.addf %28, %30 : vector<4x8x8xf32>
    %32 = vector.extract_strided_slice %7 {offsets = [8, 0, 0], sizes = [4, 32, 8], strides = [1, 1, 1]} : vector<12x32x8xbf16> to vector<4x32x8xbf16>
    "tpu.trace_start"() <{level = 10 : i32, message = "hse,hed->hsd"}> : () -> ()
    %cst_21 = arith.constant dense<0.000000e+00> : vector<4x8x8xf32>
    %33 = tpu.matmul %21, %32, %cst_21 {dimension_numbers = #tpu.dot_dimension_numbers<[2], [1], [1], [2], [0, 0, 0, 1, 1, 2], [0], [0]>} : vector<4x8x32xbf16>, vector<4x32x8xbf16>, vector<4x8x8xf32> -> vector<4x8x8xf32>
    "tpu.trace_stop"() : () -> ()
    %34 = vector.extract_strided_slice %9 {offsets = [8, 0, 0], sizes = [4, 1, 8], strides = [1, 1, 1]} : vector<12x1x8xf32> to vector<4x1x8xf32>
    %35 = vector.broadcast %34 : vector<4x1x8xf32> to vector<4x8x8xf32>
    %36 = arith.addf %33, %35 : vector<4x8x8xf32>
    %37 = arith.truncf %26 : vector<4x8x8xf32> to vector<4x8x8xbf16>
    %38 = arith.truncf %31 : vector<4x8x8xf32> to vector<4x8x8xbf16>
    "tpu.trace_start"() <{level = 10 : i32, message = "hld,hsd->hls"}> : () -> ()
    %cst_22 = arith.constant dense<0.000000e+00> : vector<4x8x8xf32>
    %39 = tpu.matmul %37, %38, %cst_22 {dimension_numbers = #tpu.dot_dimension_numbers<[2], [2], [1], [1], [0, 0, 0, 1, 1, 1], [0], [0]>} : vector<4x8x8xbf16>, vector<4x8x8xbf16>, vector<4x8x8xf32> -> vector<4x8x8xf32>
    "tpu.trace_stop"() : () -> ()
    %cst_23 = arith.constant 0.353553385 : f32
    %40 = vector.broadcast %cst_23 : f32 to vector<4x8x8xf32>
    %41 = arith.mulf %39, %40 : vector<4x8x8xf32>
    %cst_24 = arith.constant dense<0xFF800000> : vector<4x8xf32>
    %42 = vector.multi_reduction <maximumf>, %41, %cst_24 [2] : vector<4x8x8xf32> to vector<4x8xf32>
    %43 = vector.shape_cast %42 : vector<4x8xf32> to vector<4x8x1xf32>
    %44 = vector.broadcast %43 : vector<4x8x1xf32> to vector<4x8x8xf32>
    %45 = arith.subf %41, %44 : vector<4x8x8xf32>
    %46 = math.exp %45 : vector<4x8x8xf32>
    %cst_25 = arith.constant dense<0.000000e+00> : vector<4x8xf32>
    %47 = vector.multi_reduction <add>, %46, %cst_25 [2] : vector<4x8x8xf32> to vector<4x8xf32>
    %48 = vector.shape_cast %47 : vector<4x8xf32> to vector<4x8x1xf32>
    %49 = vector.broadcast %48 : vector<4x8x1xf32> to vector<4x8x8xf32>
    %50 = arith.divf %46, %49 : vector<4x8x8xf32>
    %51 = arith.truncf %50 : vector<4x8x8xf32> to vector<4x8x8xbf16>
    %52 = arith.truncf %36 : vector<4x8x8xf32> to vector<4x8x8xbf16>
    "tpu.trace_start"() <{level = 10 : i32, message = "hls,hsd->hld"}> : () -> ()
    %cst_26 = arith.constant dense<0.000000e+00> : vector<4x8x8xf32>
    %53 = tpu.matmul %51, %52, %cst_26 {dimension_numbers = #tpu.dot_dimension_numbers<[2], [1], [1], [2], [0, 0, 0, 1, 1, 2], [0], [0]>} : vector<4x8x8xbf16>, vector<4x8x8xbf16>, vector<4x8x8xf32> -> vector<4x8x8xf32>
    "tpu.trace_stop"() : () -> ()
    %54 = arith.truncf %53 : vector<4x8x8xf32> to vector<4x8x8xbf16>
    "tpu.trace_start"() <{level = 10 : i32, message = "hld,hde->hle"}> : () -> ()
    %cst_27 = arith.constant dense<0.000000e+00> : vector<4x8x32xf32>
    %55 = tpu.matmul %54, %11, %cst_27 {dimension_numbers = #tpu.dot_dimension_numbers<[2], [1], [1], [2], [0, 0, 0, 1, 1, 2], [0], [0]>} : vector<4x8x8xbf16>, vector<4x8x32xbf16>, vector<4x8x32xf32> -> vector<4x8x32xf32>
    "tpu.trace_stop"() : () -> ()
    %cst_28 = arith.constant dense<0.000000e+00> : vector<8x32xf32>
    %56 = vector.multi_reduction <add>, %55, %cst_28 [0] : vector<4x8x32xf32> to vector<8x32xf32>
    %57 = vector.broadcast %13 : vector<1x32xf32> to vector<8x32xf32>
    %58 = arith.addf %56, %57 : vector<8x32xf32>
    %59 = arith.addf %3, %58 : vector<8x32xf32>
    %c0_29 = arith.constant 0 : index
    %c0_30 = arith.constant 0 : index
    %c0_31 = arith.constant 0 : index
    %60 = vector.load %arg8[%c0_29, %c0_30, %c0_31] : memref<1x2x32xf32, #tpu.memory_space<vmem>>, vector<1x2x32xf32>
    %61 = vector.shape_cast %60 : vector<1x2x32xf32> to vector<2x32xf32>
    %62 = vector.extract_strided_slice %61 {offsets = [0, 0], sizes = [1, 32], strides = [1, 1]} : vector<2x32xf32> to vector<1x32xf32>
    %63 = vector.extract_strided_slice %61 {offsets = [1, 0], sizes = [1, 32], strides = [1, 1]} : vector<2x32xf32> to vector<1x32xf32>
    %cst_32 = arith.constant dense<0.000000e+00> : vector<8xf32>
    %64 = vector.multi_reduction <add>, %59, %cst_32 [1] : vector<8x32xf32> to vector<8xf32>
    %65 = vector.shape_cast %64 : vector<8xf32> to vector<8x1xf32>
    %cst_33 = arith.constant 3.200000e+01 : f32
    %66 = vector.broadcast %cst_33 : f32 to vector<8x1xf32>
    %67 = arith.divf %65, %66 : vector<8x1xf32>
    %68 = vector.broadcast %67 : vector<8x1xf32> to vector<8x32xf32>
    %69 = arith.subf %59, %68 : vector<8x32xf32>
    %70 = arith.mulf %69, %69 : vector<8x32xf32>
    %cst_34 = arith.constant dense<0.000000e+00> : vector<8xf32>
    %71 = vector.multi_reduction <add>, %70, %cst_34 [1] : vector<8x32xf32> to vector<8xf32>
    %72 = vector.shape_cast %71 : vector<8xf32> to vector<8x1xf32>
    %cst_35 = arith.constant 3.200000e+01 : f32
    %73 = vector.broadcast %cst_35 : f32 to vector<8x1xf32>
    %74 = arith.divf %72, %73 : vector<8x1xf32>
    %cst_36 = arith.constant 9.99999974E-6 : f32
    %75 = vector.broadcast %cst_36 : f32 to vector<8x1xf32>
    %76 = arith.addf %74, %75 : vector<8x1xf32>
    %77 = math.rsqrt %76 : vector<8x1xf32>
    %78 = vector.broadcast %77 : vector<8x1xf32> to vector<8x32xf32>
    %79 = arith.mulf %69, %78 : vector<8x32xf32>
    %80 = vector.broadcast %62 : vector<1x32xf32> to vector<8x32xf32>
    %81 = arith.mulf %79, %80 : vector<8x32xf32>
    %82 = vector.broadcast %63 : vector<1x32xf32> to vector<8x32xf32>
    %83 = arith.addf %81, %82 : vector<8x32xf32>
    %c0_37 = arith.constant 0 : index
    %c0_38 = arith.constant 0 : index
    %c0_39 = arith.constant 0 : index
    %c0_40 = arith.constant 0 : index
    %84 = vector.load %arg9[%c0_37, %c0_38, %c0_39, %c0_40] : memref<1x12x32x8xbf16, #tpu.memory_space<vmem>>, vector<1x12x32x8xbf16>
    %85 = vector.shape_cast %84 : vector<1x12x32x8xbf16> to vector<12x32x8xbf16>
    %c0_41 = arith.constant 0 : index
    %c0_42 = arith.constant 0 : index
    %c0_43 = arith.constant 0 : index
    %c0_44 = arith.constant 0 : index
    %86 = vector.load %arg10[%c0_41, %c0_42, %c0_43, %c0_44] : memref<1x12x1x8xf32, #tpu.memory_space<vmem>>, vector<1x12x1x8xf32>
    %87 = vector.shape_cast %86 : vector<1x12x1x8xf32> to vector<12x1x8xf32>
    %c0_45 = arith.constant 0 : index
    %c0_46 = arith.constant 0 : index
    %c0_47 = arith.constant 0 : index
    %c0_48 = arith.constant 0 : index
    %88 = vector.load %arg11[%c0_45, %c0_46, %c0_47, %c0_48] : memref<1x4x8x32xbf16, #tpu.memory_space<vmem>>, vector<1x4x8x32xbf16>
    %89 = vector.shape_cast %88 : vector<1x4x8x32xbf16> to vector<4x8x32xbf16>
    %c0_49 = arith.constant 0 : index
    %c0_50 = arith.constant 0 : index
    %c0_51 = arith.constant 0 : index
    %90 = vector.load %arg12[%c0_49, %c0_50, %c0_51] : memref<1x1x32xf32, #tpu.memory_space<vmem>>, vector<1x1x32xf32>
    %91 = vector.shape_cast %90 : vector<1x1x32xf32> to vector<1x32xf32>
    %92 = arith.truncf %83 : vector<8x32xf32> to vector<8x32xbf16>
    %93 = vector.shape_cast %92 : vector<8x32xbf16> to vector<1x8x32xbf16>
    %94 = vector.shape_cast %93 : vector<1x8x32xbf16> to vector<1x8x32xbf16>
    %95 = vector.broadcast %94 : vector<1x8x32xbf16> to vector<4x8x32xbf16>
    %96 = arith.truncf %5 : vector<8x32xf32> to vector<8x32xbf16>
    %97 = vector.shape_cast %96 : vector<8x32xbf16> to vector<1x8x32xbf16>
    %98 = vector.shape_cast %97 : vector<1x8x32xbf16> to vector<1x8x32xbf16>
    %99 = vector.broadcast %98 : vector<1x8x32xbf16> to vector<4x8x32xbf16>
    %100 = vector.extract_strided_slice %85 {offsets = [0, 0, 0], sizes = [4, 32, 8], strides = [1, 1, 1]} : vector<12x32x8xbf16> to vector<4x32x8xbf16>
    "tpu.trace_start"() <{level = 10 : i32, message = "hle,hed->hld"}> : () -> ()
    %cst_52 = arith.constant dense<0.000000e+00> : vector<4x8x8xf32>
    %101 = tpu.matmul %95, %100, %cst_52 {dimension_numbers = #tpu.dot_dimension_numbers<[2], [1], [1], [2], [0, 0, 0, 1, 1, 2], [0], [0]>} : vector<4x8x32xbf16>, vector<4x32x8xbf16>, vector<4x8x8xf32> -> vector<4x8x8xf32>
    "tpu.trace_stop"() : () -> ()
    %102 = vector.extract_strided_slice %87 {offsets = [0, 0, 0], sizes = [4, 1, 8], strides = [1, 1, 1]} : vector<12x1x8xf32> to vector<4x1x8xf32>
    %103 = vector.broadcast %102 : vector<4x1x8xf32> to vector<4x8x8xf32>
    %104 = arith.addf %101, %103 : vector<4x8x8xf32>
    %105 = vector.extract_strided_slice %85 {offsets = [4, 0, 0], sizes = [4, 32, 8], strides = [1, 1, 1]} : vector<12x32x8xbf16> to vector<4x32x8xbf16>
    "tpu.trace_start"() <{level = 10 : i32, message = "hse,hed->hsd"}> : () -> ()
    %cst_53 = arith.constant dense<0.000000e+00> : vector<4x8x8xf32>
    %106 = tpu.matmul %99, %105, %cst_53 {dimension_numbers = #tpu.dot_dimension_numbers<[2], [1], [1], [2], [0, 0, 0, 1, 1, 2], [0], [0]>} : vector<4x8x32xbf16>, vector<4x32x8xbf16>, vector<4x8x8xf32> -> vector<4x8x8xf32>
    "tpu.trace_stop"() : () -> ()
    %107 = vector.extract_strided_slice %87 {offsets = [4, 0, 0], sizes = [4, 1, 8], strides = [1, 1, 1]} : vector<12x1x8xf32> to vector<4x1x8xf32>
    %108 = vector.broadcast %107 : vector<4x1x8xf32> to vector<4x8x8xf32>
    %109 = arith.addf %106, %108 : vector<4x8x8xf32>
    %110 = vector.extract_strided_slice %85 {offsets = [8, 0, 0], sizes = [4, 32, 8], strides = [1, 1, 1]} : vector<12x32x8xbf16> to vector<4x32x8xbf16>
    "tpu.trace_start"() <{level = 10 : i32, message = "hse,hed->hsd"}> : () -> ()
    %cst_54 = arith.constant dense<0.000000e+00> : vector<4x8x8xf32>
    %111 = tpu.matmul %99, %110, %cst_54 {dimension_numbers = #tpu.dot_dimension_numbers<[2], [1], [1], [2], [0, 0, 0, 1, 1, 2], [0], [0]>} : vector<4x8x32xbf16>, vector<4x32x8xbf16>, vector<4x8x8xf32> -> vector<4x8x8xf32>
    "tpu.trace_stop"() : () -> ()
    %112 = vector.extract_strided_slice %87 {offsets = [8, 0, 0], sizes = [4, 1, 8], strides = [1, 1, 1]} : vector<12x1x8xf32> to vector<4x1x8xf32>
    %113 = vector.broadcast %112 : vector<4x1x8xf32> to vector<4x8x8xf32>
    %114 = arith.addf %111, %113 : vector<4x8x8xf32>
    %115 = arith.truncf %104 : vector<4x8x8xf32> to vector<4x8x8xbf16>
    %116 = arith.truncf %109 : vector<4x8x8xf32> to vector<4x8x8xbf16>
    "tpu.trace_start"() <{level = 10 : i32, message = "hld,hsd->hls"}> : () -> ()
    %cst_55 = arith.constant dense<0.000000e+00> : vector<4x8x8xf32>
    %117 = tpu.matmul %115, %116, %cst_55 {dimension_numbers = #tpu.dot_dimension_numbers<[2], [2], [1], [1], [0, 0, 0, 1, 1, 1], [0], [0]>} : vector<4x8x8xbf16>, vector<4x8x8xbf16>, vector<4x8x8xf32> -> vector<4x8x8xf32>
    "tpu.trace_stop"() : () -> ()
    %cst_56 = arith.constant 0.353553385 : f32
    %118 = vector.broadcast %cst_56 : f32 to vector<4x8x8xf32>
    %119 = arith.mulf %117, %118 : vector<4x8x8xf32>
    %cst_57 = arith.constant dense<0xFF800000> : vector<4x8xf32>
    %120 = vector.multi_reduction <maximumf>, %119, %cst_57 [2] : vector<4x8x8xf32> to vector<4x8xf32>
    %121 = vector.shape_cast %120 : vector<4x8xf32> to vector<4x8x1xf32>
    %122 = vector.broadcast %121 : vector<4x8x1xf32> to vector<4x8x8xf32>
    %123 = arith.subf %119, %122 : vector<4x8x8xf32>
    %124 = math.exp %123 : vector<4x8x8xf32>
    %cst_58 = arith.constant dense<0.000000e+00> : vector<4x8xf32>
    %125 = vector.multi_reduction <add>, %124, %cst_58 [2] : vector<4x8x8xf32> to vector<4x8xf32>
    %126 = vector.shape_cast %125 : vector<4x8xf32> to vector<4x8x1xf32>
    %127 = vector.broadcast %126 : vector<4x8x1xf32> to vector<4x8x8xf32>
    %128 = arith.divf %124, %127 : vector<4x8x8xf32>
    %129 = arith.truncf %128 : vector<4x8x8xf32> to vector<4x8x8xbf16>
    %130 = arith.truncf %114 : vector<4x8x8xf32> to vector<4x8x8xbf16>
    "tpu.trace_start"() <{level = 10 : i32, message = "hls,hsd->hld"}> : () -> ()
    %cst_59 = arith.constant dense<0.000000e+00> : vector<4x8x8xf32>
    %131 = tpu.matmul %129, %130, %cst_59 {dimension_numbers = #tpu.dot_dimension_numbers<[2], [1], [1], [2], [0, 0, 0, 1, 1, 2], [0], [0]>} : vector<4x8x8xbf16>, vector<4x8x8xbf16>, vector<4x8x8xf32> -> vector<4x8x8xf32>
    "tpu.trace_stop"() : () -> ()
    %132 = arith.truncf %131 : vector<4x8x8xf32> to vector<4x8x8xbf16>
    "tpu.trace_start"() <{level = 10 : i32, message = "hld,hde->hle"}> : () -> ()
    %cst_60 = arith.constant dense<0.000000e+00> : vector<4x8x32xf32>
    %133 = tpu.matmul %132, %89, %cst_60 {dimension_numbers = #tpu.dot_dimension_numbers<[2], [1], [1], [2], [0, 0, 0, 1, 1, 2], [0], [0]>} : vector<4x8x8xbf16>, vector<4x8x32xbf16>, vector<4x8x32xf32> -> vector<4x8x32xf32>
    "tpu.trace_stop"() : () -> ()
    %cst_61 = arith.constant dense<0.000000e+00> : vector<8x32xf32>
    %134 = vector.multi_reduction <add>, %133, %cst_61 [0] : vector<4x8x32xf32> to vector<8x32xf32>
    %135 = vector.broadcast %91 : vector<1x32xf32> to vector<8x32xf32>
    %136 = arith.addf %134, %135 : vector<8x32xf32>
    %137 = arith.addf %83, %136 : vector<8x32xf32>
    %c0_62 = arith.constant 0 : index
    %c0_63 = arith.constant 0 : index
    %c0_64 = arith.constant 0 : index
    %138 = vector.load %arg13[%c0_62, %c0_63, %c0_64] : memref<1x2x32xf32, #tpu.memory_space<vmem>>, vector<1x2x32xf32>
    %139 = vector.shape_cast %138 : vector<1x2x32xf32> to vector<2x32xf32>
    %140 = vector.extract_strided_slice %139 {offsets = [0, 0], sizes = [1, 32], strides = [1, 1]} : vector<2x32xf32> to vector<1x32xf32>
    %141 = vector.extract_strided_slice %139 {offsets = [1, 0], sizes = [1, 32], strides = [1, 1]} : vector<2x32xf32> to vector<1x32xf32>
    %cst_65 = arith.constant dense<0.000000e+00> : vector<8xf32>
    %142 = vector.multi_reduction <add>, %137, %cst_65 [1] : vector<8x32xf32> to vector<8xf32>
    %143 = vector.shape_cast %142 : vector<8xf32> to vector<8x1xf32>
    %cst_66 = arith.constant 3.200000e+01 : f32
    %144 = vector.broadcast %cst_66 : f32 to vector<8x1xf32>
    %145 = arith.divf %143, %144 : vector<8x1xf32>
    %146 = vector.broadcast %145 : vector<8x1xf32> to vector<8x32xf32>
    %147 = arith.subf %137, %146 : vector<8x32xf32>
    %148 = arith.mulf %147, %147 : vector<8x32xf32>
    %cst_67 = arith.constant dense<0.000000e+00> : vector<8xf32>
    %149 = vector.multi_reduction <add>, %148, %cst_67 [1] : vector<8x32xf32> to vector<8xf32>
    %150 = vector.shape_cast %149 : vector<8xf32> to vector<8x1xf32>
    %cst_68 = arith.constant 3.200000e+01 : f32
    %151 = vector.broadcast %cst_68 : f32 to vector<8x1xf32>
    %152 = arith.divf %150, %151 : vector<8x1xf32>
    %cst_69 = arith.constant 9.99999974E-6 : f32
    %153 = vector.broadcast %cst_69 : f32 to vector<8x1xf32>
    %154 = arith.addf %152, %153 : vector<8x1xf32>
    %155 = math.rsqrt %154 : vector<8x1xf32>
    %156 = vector.broadcast %155 : vector<8x1xf32> to vector<8x32xf32>
    %157 = arith.mulf %147, %156 : vector<8x32xf32>
    %158 = vector.broadcast %140 : vector<1x32xf32> to vector<8x32xf32>
    %159 = arith.mulf %157, %158 : vector<8x32xf32>
    %160 = vector.broadcast %141 : vector<1x32xf32> to vector<8x32xf32>
    %161 = arith.addf %159, %160 : vector<8x32xf32>
    %c0_70 = arith.constant 0 : index
    %c0_71 = arith.constant 0 : index
    %c0_72 = arith.constant 0 : index
    %162 = vector.load %arg14[%c0_70, %c0_71, %c0_72] : memref<1x32x2048xbf16, #tpu.memory_space<vmem>>, vector<1x32x2048xbf16>
    %163 = vector.shape_cast %162 : vector<1x32x2048xbf16> to vector<32x2048xbf16>
    %c0_73 = arith.constant 0 : index
    %c0_74 = arith.constant 0 : index
    %c0_75 = arith.constant 0 : index
    %164 = vector.load %arg15[%c0_73, %c0_74, %c0_75] : memref<1x1x2048xf32, #tpu.memory_space<vmem>>, vector<1x1x2048xf32>
    %165 = vector.shape_cast %164 : vector<1x1x2048xf32> to vector<1x2048xf32>
    %c0_76 = arith.constant 0 : index
    %c0_77 = arith.constant 0 : index
    %c0_78 = arith.constant 0 : index
    %166 = vector.load %arg16[%c0_76, %c0_77, %c0_78] : memref<1x2048x32xbf16, #tpu.memory_space<vmem>>, vector<1x2048x32xbf16>
    %167 = vector.shape_cast %166 : vector<1x2048x32xbf16> to vector<2048x32xbf16>
    %c0_79 = arith.constant 0 : index
    %c0_80 = arith.constant 0 : index
    %c0_81 = arith.constant 0 : index
    %168 = vector.load %arg17[%c0_79, %c0_80, %c0_81] : memref<1x1x32xf32, #tpu.memory_space<vmem>>, vector<1x1x32xf32>
    %169 = vector.shape_cast %168 : vector<1x1x32xf32> to vector<1x32xf32>
    %170 = arith.truncf %161 : vector<8x32xf32> to vector<8x32xbf16>
    %cst_82 = arith.constant dense<0.000000e+00> : vector<8x2048xf32>
    %171 = tpu.matmul %170, %163, %cst_82 {dimension_numbers = #tpu.dot_dimension_numbers<[1], [0], [0], [1], [0, 0, 1, 1], [], []>} : vector<8x32xbf16>, vector<32x2048xbf16>, vector<8x2048xf32> -> vector<8x2048xf32>
    %172 = vector.broadcast %165 : vector<1x2048xf32> to vector<8x2048xf32>
    %173 = arith.addf %171, %172 : vector<8x2048xf32>
    %cst_83 = arith.constant 0.000000e+00 : f32
    %174 = vector.broadcast %cst_83 : f32 to vector<8x2048xf32>
    %175 = arith.maximumf %173, %174 : vector<8x2048xf32>
    %176 = arith.truncf %175 : vector<8x2048xf32> to vector<8x2048xbf16>
    %cst_84 = arith.constant dense<0.000000e+00> : vector<8x32xf32>
    %177 = tpu.matmul %176, %167, %cst_84 {dimension_numbers = #tpu.dot_dimension_numbers<[1], [0], [0], [1], [0, 0, 1, 1], [], []>} : vector<8x2048xbf16>, vector<2048x32xbf16>, vector<8x32xf32> -> vector<8x32xf32>
    %178 = vector.broadcast %169 : vector<1x32xf32> to vector<8x32xf32>
    %179 = arith.addf %177, %178 : vector<8x32xf32>
    %180 = arith.addf %161, %179 : vector<8x32xf32>
    %c0_85 = arith.constant 0 : index
    %c0_86 = arith.constant 0 : index
    %c0_87 = arith.constant 0 : index
    %181 = vector.load %arg18[%c0_85, %c0_86, %c0_87] : memref<1x2x32xf32, #tpu.memory_space<vmem>>, vector<1x2x32xf32>
    %182 = vector.shape_cast %181 : vector<1x2x32xf32> to vector<2x32xf32>
    %183 = vector.extract_strided_slice %182 {offsets = [0, 0], sizes = [1, 32], strides = [1, 1]} : vector<2x32xf32> to vector<1x32xf32>
    %184 = vector.extract_strided_slice %182 {offsets = [1, 0], sizes = [1, 32], strides = [1, 1]} : vector<2x32xf32> to vector<1x32xf32>
    %cst_88 = arith.constant dense<0.000000e+00> : vector<8xf32>
    %185 = vector.multi_reduction <add>, %180, %cst_88 [1] : vector<8x32xf32> to vector<8xf32>
    %186 = vector.shape_cast %185 : vector<8xf32> to vector<8x1xf32>
    %cst_89 = arith.constant 3.200000e+01 : f32
    %187 = vector.broadcast %cst_89 : f32 to vector<8x1xf32>
    %188 = arith.divf %186, %187 : vector<8x1xf32>
    %189 = vector.broadcast %188 : vector<8x1xf32> to vector<8x32xf32>
    %190 = arith.subf %180, %189 : vector<8x32xf32>
    %191 = arith.mulf %190, %190 : vector<8x32xf32>
    %cst_90 = arith.constant dense<0.000000e+00> : vector<8xf32>
    %192 = vector.multi_reduction <add>, %191, %cst_90 [1] : vector<8x32xf32> to vector<8xf32>
    %193 = vector.shape_cast %192 : vector<8xf32> to vector<8x1xf32>
    %cst_91 = arith.constant 3.200000e+01 : f32
    %194 = vector.broadcast %cst_91 : f32 to vector<8x1xf32>
    %195 = arith.divf %193, %194 : vector<8x1xf32>
    %cst_92 = arith.constant 9.99999974E-6 : f32
    %196 = vector.broadcast %cst_92 : f32 to vector<8x1xf32>
    %197 = arith.addf %195, %196 : vector<8x1xf32>
    %198 = math.rsqrt %197 : vector<8x1xf32>
    %199 = vector.broadcast %198 : vector<8x1xf32> to vector<8x32xf32>
    %200 = arith.mulf %190, %199 : vector<8x32xf32>
    %201 = vector.broadcast %183 : vector<1x32xf32> to vector<8x32xf32>
    %202 = arith.mulf %200, %201 : vector<8x32xf32>
    %203 = vector.broadcast %184 : vector<1x32xf32> to vector<8x32xf32>
    %204 = arith.addf %202, %203 : vector<8x32xf32>
    %c0_93 = arith.constant 0 : index
    %c0_94 = arith.constant 0 : index
    %205 = vector.load %arg23[%c0_93, %c0_94] : memref<8x32xf32, #tpu.memory_space<vmem>>, vector<8x32xf32>
    tpu.vector_store %arg23[%c0_93, %c0_94], %204 {strides = array<i32>} : memref<8x32xf32, #tpu.memory_space<vmem>>, vector<8x32xf32>,
    %c1_i32 = arith.constant 1 : i32
    %206 = arith.cmpi eq, %arg1, %c1_i32 : i32
    %207 = arith.extui %206 : i1 to i32
    %c0_i32_95 = arith.constant 0 : i32
    %208 = arith.cmpi ne, %207, %c0_i32_95 : i32
    scf.if %208 {
      %c0_96 = arith.constant 0 : index
      %c0_97 = arith.constant 0 : index
      %209 = vector.load %arg19[%c0_96, %c0_97] : memref<2x32xf32, #tpu.memory_space<vmem>>, vector<2x32xf32>
      %210 = vector.extract_strided_slice %209 {offsets = [0, 0], sizes = [1, 32], strides = [1, 1]} : vector<2x32xf32> to vector<1x32xf32>
      %211 = vector.extract_strided_slice %209 {offsets = [1, 0], sizes = [1, 32], strides = [1, 1]} : vector<2x32xf32> to vector<1x32xf32>
      %cst_98 = arith.constant dense<0.000000e+00> : vector<8xf32>
      %212 = vector.multi_reduction <add>, %204, %cst_98 [1] : vector<8x32xf32> to vector<8xf32>
      %213 = vector.shape_cast %212 : vector<8xf32> to vector<8x1xf32>
      %cst_99 = arith.constant 3.200000e+01 : f32
      %214 = vector.broadcast %cst_99 : f32 to vector<8x1xf32>
      %215 = arith.divf %213, %214 : vector<8x1xf32>
      %216 = vector.broadcast %215 : vector<8x1xf32> to vector<8x32xf32>
      %217 = arith.subf %204, %216 : vector<8x32xf32>
      %218 = arith.mulf %217, %217 : vector<8x32xf32>
      %cst_100 = arith.constant dense<0.000000e+00> : vector<8xf32>
      %219 = vector.multi_reduction <add>, %218, %cst_100 [1] : vector<8x32xf32> to vector<8xf32>
      %220 = vector.shape_cast %219 : vector<8xf32> to vector<8x1xf32>
      %cst_101 = arith.constant 3.200000e+01 : f32
      %221 = vector.broadcast %cst_101 : f32 to vector<8x1xf32>
      %222 = arith.divf %220, %221 : vector<8x1xf32>
      %cst_102 = arith.constant 9.99999974E-6 : f32
      %223 = vector.broadcast %cst_102 : f32 to vector<8x1xf32>
      %224 = arith.addf %222, %223 : vector<8x1xf32>
      %225 = math.rsqrt %224 : vector<8x1xf32>
      %226 = vector.broadcast %225 : vector<8x1xf32> to vector<8x32xf32>
      %227 = arith.mulf %217, %226 : vector<8x32xf32>
      %228 = vector.broadcast %210 : vector<1x32xf32> to vector<8x32xf32>
      %229 = arith.mulf %227, %228 : vector<8x32xf32>
      %230 = vector.broadcast %211 : vector<1x32xf32> to vector<8x32xf32>
      %231 = arith.addf %229, %230 : vector<8x32xf32>
      %232 = arith.truncf %231 : vector<8x32xf32> to vector<8x32xbf16>
      %c0_103 = arith.constant 0 : index
      %c0_104 = arith.constant 0 : index
      %233 = vector.load %arg20[%c0_103, %c0_104] : memref<32x128xbf16, #tpu.memory_space<vmem>>, vector<32x128xbf16>
      %cst_105 = arith.constant dense<0.000000e+00> : vector<8x128xf32>
      %234 = tpu.matmul %232, %233, %cst_105 {dimension_numbers = #tpu.dot_dimension_numbers<[1], [0], [0], [1], [0, 0, 1, 1], [], []>} : vector<8x32xbf16>, vector<32x128xbf16>, vector<8x128xf32> -> vector<8x128xf32>
      %c0_106 = arith.constant 0 : index
      %c0_107 = arith.constant 0 : index
      %235 = vector.load %arg21[%c0_106, %c0_107] : memref<1x128xf32, #tpu.memory_space<vmem>>, vector<1x128xf32>
      %236 = vector.broadcast %235 : vector<1x128xf32> to vector<8x128xf32>
      %237 = arith.addf %234, %236 : vector<8x128xf32>
      %c0_108 = arith.constant 0 : index
      %c0_109 = arith.constant 0 : index
      %c0_110 = arith.constant 0 : index
      %238 = vector.load %arg22[%c0_108, %c0_109, %c0_110] : memref<1x8x128xf32, #tpu.memory_space<vmem>>, vector<1x8x128xf32>
      %239 = vector.shape_cast %238 : vector<1x8x128xf32> to vector<8x128xf32>
      %240 = vector.shape_cast %237 : vector<8x128xf32> to vector<1x8x128xf32>
      tpu.vector_store %arg22[%c0_108, %c0_109, %c0_110], %240 {strides = array<i32>} : memref<1x8x128xf32, #tpu.memory_space<vmem>>, vector<1x8x128xf32>,
    } else {
    }
    return
  }
  func.func @transform_0(%arg0: i32, %arg1: i32) -> (i32, i32, i32) {
    %c0_i32 = arith.constant 0 : i32
    %c0_i32_0 = arith.constant 0 : i32
    %c0_i32_1 = arith.constant 0 : i32
    return %arg0, %c0_i32, %c0_i32_0 : i32, i32, i32
  }
  func.func @transform_1(%arg0: i32, %arg1: i32) -> (i32, i32, i32) {
    %c0_i32 = arith.constant 0 : i32
    %c0_i32_0 = arith.constant 0 : i32
    %c0_i32_1 = arith.constant 0 : i32
    return %arg0, %c0_i32, %c0_i32_0 : i32, i32, i32
  }
  func.func @transform_2(%arg0: i32, %arg1: i32) -> (i32, i32, i32, i32) {
    %c0_i32 = arith.constant 0 : i32
    %c0_i32_0 = arith.constant 0 : i32
    %c0_i32_1 = arith.constant 0 : i32
    %c0_i32_2 = arith.constant 0 : i32
    return %arg1, %c0_i32, %c0_i32_0, %c0_i32_1 : i32, i32, i32, i32
  }
  func.func @transform_3(%arg0: i32, %arg1: i32) -> (i32, i32, i32, i32) {
    %c0_i32 = arith.constant 0 : i32
    %c0_i32_0 = arith.constant 0 : i32
    %c0_i32_1 = arith.constant 0 : i32
    %c0_i32_2 = arith.constant 0 : i32
    return %arg1, %c0_i32, %c0_i32_0, %c0_i32_1 : i32, i32, i32, i32
  }
  func.func @transform_4(%arg0: i32, %arg1: i32) -> (i32, i32, i32, i32) {
    %c0_i32 = arith.constant 0 : i32
    %c0_i32_0 = arith.constant 0 : i32
    %c0_i32_1 = arith.constant 0 : i32
    %c0_i32_2 = arith.constant 0 : i32
    return %arg1, %c0_i32, %c0_i32_0, %c0_i32_1 : i32, i32, i32, i32
  }
  func.func @transform_5(%arg0: i32, %arg1: i32) -> (i32, i32, i32) {
    %c0_i32 = arith.constant 0 : i32
    %c0_i32_0 = arith.constant 0 : i32
    %c0_i32_1 = arith.constant 0 : i32
    return %arg1, %c0_i32, %c0_i32_0 : i32, i32, i32
  }
  func.func @transform_6(%arg0: i32, %arg1: i32) -> (i32, i32, i32) {
    %c0_i32 = arith.constant 0 : i32
    %c0_i32_0 = arith.constant 0 : i32
    %c0_i32_1 = arith.constant 0 : i32
    return %arg1, %c0_i32, %c0_i32_0 : i32, i32, i32
  }
  func.func @transform_7(%arg0: i32, %arg1: i32) -> (i32, i32, i32, i32) {
    %c0_i32 = arith.constant 0 : i32
    %c0_i32_0 = arith.constant 0 : i32
    %c0_i32_1 = arith.constant 0 : i32
    %c0_i32_2 = arith.constant 0 : i32
    return %arg1, %c0_i32, %c0_i32_0, %c0_i32_1 : i32, i32, i32, i32
  }
  func.func @transform_8(%arg0: i32, %arg1: i32) -> (i32, i32, i32, i32) {
    %c0_i32 = arith.constant 0 : i32
    %c0_i32_0 = arith.constant 0 : i32
    %c0_i32_1 = arith.constant 0 : i32
    %c0_i32_2 = arith.constant 0 : i32
    return %arg1, %c0_i32, %c0_i32_0, %c0_i32_1 : i32, i32, i32, i32
  }
  func.func @transform_9(%arg0: i32, %arg1: i32) -> (i32, i32, i32, i32) {
    %c0_i32 = arith.constant 0 : i32
    %c0_i32_0 = arith.constant 0 : i32
    %c0_i32_1 = arith.constant 0 : i32
    %c0_i32_2 = arith.constant 0 : i32
    return %arg1, %c0_i32, %c0_i32_0, %c0_i32_1 : i32, i32, i32, i32
  }
  func.func @transform_10(%arg0: i32, %arg1: i32) -> (i32, i32, i32) {
    %c0_i32 = arith.constant 0 : i32
    %c0_i32_0 = arith.constant 0 : i32
    %c0_i32_1 = arith.constant 0 : i32
    return %arg1, %c0_i32, %c0_i32_0 : i32, i32, i32
  }
  func.func @transform_11(%arg0: i32, %arg1: i32) -> (i32, i32, i32) {
    %c0_i32 = arith.constant 0 : i32
    %c0_i32_0 = arith.constant 0 : i32
    %c0_i32_1 = arith.constant 0 : i32
    return %arg1, %c0_i32, %c0_i32_0 : i32, i32, i32
  }
  func.func @transform_12(%arg0: i32, %arg1: i32) -> (i32, i32, i32) {
    %c0_i32 = arith.constant 0 : i32
    %c0_i32_0 = arith.constant 0 : i32
    %c0_i32_1 = arith.constant 0 : i32
    return %arg1, %c0_i32, %c0_i32_0 : i32, i32, i32
  }
  func.func @transform_13(%arg0: i32, %arg1: i32) -> (i32, i32, i32) {
    %c0_i32 = arith.constant 0 : i32
    %c0_i32_0 = arith.constant 0 : i32
    %c0_i32_1 = arith.constant 0 : i32
    return %arg1, %c0_i32, %c0_i32_0 : i32, i32, i32
  }
  func.func @transform_14(%arg0: i32, %arg1: i32) -> (i32, i32, i32) {
    %c0_i32 = arith.constant 0 : i32
    %c0_i32_0 = arith.constant 0 : i32
    %c0_i32_1 = arith.constant 0 : i32
    return %arg1, %c0_i32, %c0_i32_0 : i32, i32, i32
  }
  func.func @transform_15(%arg0: i32, %arg1: i32) -> (i32, i32, i32) {
    %c0_i32 = arith.constant 0 : i32
    %c0_i32_0 = arith.constant 0 : i32
    %c0_i32_1 = arith.constant 0 : i32
    return %arg1, %c0_i32, %c0_i32_0 : i32, i32, i32
  }
  func.func @transform_16(%arg0: i32, %arg1: i32) -> (i32, i32, i32) {
    %c0_i32 = arith.constant 0 : i32
    %c0_i32_0 = arith.constant 0 : i32
    %c0_i32_1 = arith.constant 0 : i32
    return %arg1, %c0_i32, %c0_i32_0 : i32, i32, i32
  }
  func.func @transform_17(%arg0: i32, %arg1: i32) -> (i32, i32) {
    %c0_i32 = arith.constant 0 : i32
    %c0_i32_0 = arith.constant 0 : i32
    %c0_i32_1 = arith.constant 0 : i32
    return %c0_i32, %c0_i32_0 : i32, i32
  }
  func.func @transform_18(%arg0: i32, %arg1: i32) -> (i32, i32) {
    %c0_i32 = arith.constant 0 : i32
    %c0_i32_0 = arith.constant 0 : i32
    %c0_i32_1 = arith.constant 0 : i32
    return %c0_i32, %c0_i32_0 : i32, i32
  }
  func.func @transform_19(%arg0: i32, %arg1: i32) -> (i32, i32) {
    %c0_i32 = arith.constant 0 : i32
    %c0_i32_0 = arith.constant 0 : i32
    %c0_i32_1 = arith.constant 0 : i32
    return %c0_i32, %c0_i32_0 : i32, i32
  }
  func.func @transform_20(%arg0: i32, %arg1: i32) -> (i32, i32, i32) {
    %c0_i32 = arith.constant 0 : i32
    %c0_i32_0 = arith.constant 0 : i32
    %c0_i32_1 = arith.constant 0 : i32
    return %arg0, %c0_i32, %c0_i32_0 : i32, i32, i32
  }
}

</mosaic_0001>

<bundles_post_ra>
// kernel: text_transformer_forward.2
= control target key start
LH: loop header
LB: loop body
LE: loop exit
PB: predicated region body
PF: predicated region fallthrough
CT: control target
= control target key end

     0   :  { %s5244_s21 = smov 0   ;;  %s5246_s22 = smov 0   ;;  %s5859_s0 = inlined_call_operand.vmem [shape: f32[2,8,32], index: 0, kind: input, shape index: {}]   ;;  %s5860_s1 = inlined_call_operand.vmem [shape: bf16[2,12,32,8], index: 1, kind: input, shape index: {}]   ;;  %s5861_s2 = inlined_call_operand.vmem [shape: f32[2,12,1,8], index: 2, kind: input, shape index: {}]   ;;  %s5862_s3 = inlined_call_operand.vmem [shape: bf16[2,4,8,32], index: 3, kind: input, shape index: {}]   ;;  %s5863_s4 = inlined_call_operand.vmem [shape: f32[2,1,32], index: 4, kind: input, shape index: {}]   ;;  %s5864_s5 = inlined_call_operand.vmem [shape: f32[2,2,32], index: 5, kind: input, shape index: {}]   ;;  %s5865_s6 = inlined_call_operand.vmem [shape: bf16[2,32,2048], index: 6, kind: input, shape index: {}]   ;;  %s5866_s7 = inlined_call_operand.vmem [shape: f32[2,1,2048], index: 7, kind: input, shape index: {}]   ;;  %s5867_s8 = inlined_call_operand.vmem [shape: bf16[2,2048,32], index: 8, kind: input, shape index: {}]   ;;  %s5868_s9 = inlined_call_operand.vmem [shape: f32[2,1,32], index: 9, kind: input, shape index: {}]   ;;  %s5869_s10 = inlined_call_operand.vmem [shape: f32[2,2,32], index: 10, kind: input, shape index: {}]   ;;  %s5870_s11 = inlined_call_operand.vmem [shape: f32[2,32], index: 11, kind: input, shape index: {}]   ;;  %s5871_s12 = inlined_call_operand.vmem [shape: f32[2,8,32], index: 12, kind: output, shape index: {}]  }
   0x1   :  { %5876 = sst [smem:[#allocation9_spill]] %s5859_s0  ;;  %s5248_s23 = smov 0  }
   0x2   :  { %5877 = sst [smem:[#allocation10_spill]] %s5860_s1  ;;  %s5250_s24 = smov 0  }
   0x3   :  { %5878 = sst [smem:[#allocation11_spill]] %s5861_s2  ;;  %s5252_s25 = smov 0  }
   0x4   :  { %5879 = sst [smem:[#allocation12_spill]] %s5862_s3 }
   0x5   :  { %5880 = sst [smem:[#allocation13_spill]] %s5864_s5 }
   0x6   :  { %5881 = sst [smem:[#allocation14_spill]] %s5870_s11 }
   0x7   :  { %5882 = sst [smem:[#allocation15_spill]] %s5871_s12 }
   0x8 LB: > { %5883 = sst [smem:[#allocation3_spill]] %s5158_s21  ;;  %s31_s26 = sadd.s32 1, %s5166_s23  ;;  %s5174_s25 = sphi %s5252_s25, %s22_s25   ;;  %s5170_s24 = sphi %s5250_s24, %s5903_s24   ;;  %s5166_s23 = sphi %s5248_s23, %s5902_s23   ;;  %s5162_s22 = sphi %s5246_s22, %s5901_s22   ;;  %s5158_s21 = sphi %s5244_s21, %s5900_s21  }
   0x9   : > { %5884 = sst [smem:[#allocation4_spill]] %s5166_s23  ;;  %s34_s27 = sadd.s32 1, %s5170_s24 }
   0xa   : > { %5885 = sst [smem:[#allocation5_spill]] %s5170_s24  ;;  %p32_p0 = scmp.ge.s32.totalorder %s31_s26, 2 }
   0xb   : > { %5886 = sst [smem:[#allocation6_spill]] %s5174_s25  ;;  %p4262_p1 = scmp.ge.s32.totalorder %s5174_s25, 1 }
   0xc   : > { %p465_p2 = scmp.lt.s32.totalorder %s5174_s25, 5  ;;  %s5905_s26 = smov (%p32_p0, %s31_s26), 0 }
   0xd   : > { %5887 = sst [smem:[#allocation7_spill]] %s5905_s26  ;;  %s5907_s27 = smov (!%p32_p0, %s34_s27), %s5170_s24 }
   0xe   : > { %p466_p3 = pnand %p4262_p1, %p465_p2  ;;  %p36_p4 = scmp.ge.s32.totalorder %s5907_s27, 2 }
   0xf   : > { %p547_p5 = scmp.lt.s32.totalorder (!%p466_p3), %s5162_s22, 1  ;;  %p551_p6 = scmp.lt.s32.totalorder (!%p466_p3), %s5158_s21, 1 }
  0x10   : > { %s5909_s27 = smov (%p36_p4, %s5907_s27), 0  ;;  %469 = sbr.rel (%p466_p3) target bundleno = 2623 (0xa3f), region = 68 }
  0x11   : > { %5888 = sst [smem:[#allocation8_spill]] %s5909_s27 }
  0x12   : > { %s5889_s0 = sld [smem:[#allocation9_spill]] (!%p466_p3) }
  0x13   : > { %s5890_s1 = sld [smem:[#allocation10_spill]] (!%p466_p3) }
  0x14   : > { %s5891_s3 = sld [smem:[#allocation12_spill]] (!%p466_p3) }
  0x15   : > { %s5911_s22 = smov (!%p547_p5, %s5162_s22), 1  ;;  %s5892_s2 = sld [smem:[#allocation11_spill]] }
  0x16   : > { %s5278_s28 = scalar_select %p551_p6, %s5158_s21, 1 }
  0x17   : > { %s4263_s29 = sshll.u32 %s5911_s22, 3  ;;  %s5893_s5 = sld [smem:[#allocation13_spill]] }
  0x18   : > { %s550_s14 = scalar_lea.vmem %s5889_s0, %s4263_s29  ;;  %s4916_s15 = smul.u32 192, %s5278_s28 }
  0x19   : > { %s4917_s16 = smul.u32 12, %s5278_s28  ;;  %s4509_s17 = sshll.u32 %s5278_s28, 4 }
  0x1a   : > { %s5289_s20 = scalar_lea.vmem %s5890_s1, %s4916_s15  ;;  %s5294_s24 = scalar_lea.vmem %s5891_s3, %s4509_s17 }
  0x1b   : > { %s5299_s25 = scalar_lea.vmem %s5892_s2, %s4917_s16  ;;  %s4267_s11 = sshll.u32 %s5278_s28, 1 }
  0x1c   : > { %s4510_s21 = sshll.u32 %s5278_s28, 8  ;;  %s5320_s16 = scalar_lea.vmem %s5866_s7, %s4509_s17 }
  0x1d   : > { %s5310_s15 = scalar_lea.vmem %s5893_s5, %s4267_s11  ;;  %s5315_s27 = scalar_lea.vmem %s5865_s6, %s4510_s21 }
  0x1e   : > { %s4511_s22 = sshll.u32 %s5278_s28, 10  ;;  %s588_s18 = scalar_lea.vmem %s5868_s9, %s5278_s28 }
  0x1f   : > { %s5326_s0 = scalar_lea.vmem %s5867_s8, %s4511_s22  ;;  %s5335_s21 = scalar_lea.vmem %s5869_s10, %s4267_s11 }
  0x20   : > { %s5894_s1 = sld [smem:[#allocation15_spill]] }
  0x21   : > { %s5895_s23 = sld [smem:[#allocation3_spill]] }
  0x26   : > { %s5340_s17 = scalar_lea.vmem %s5894_s1, %s4263_s29 }
  0x27   : > { %p4275_p7 = scmp.ne.s32.totalorder %s5895_s23, 0 }
  0x29   : > { %601 = sbr.rel (%p4275_p7) target bundleno = 48 (0x30), region = 72 }
  0x2e   : > { %v602_v0 = vld [vmem:[%s550_s14] sm:$0xff]  ;;  %vm603_vm0 = vcmask 261120  }
  0x2f   : > { %604 = vst.msk [vmem:[#allocation2] sm:$0xff] %vm603_vm0, %v602_v0 }
  0x30 PF: > { %v4961_v1 = vld [vmem:[%s5289_s20 + $0x8] sm:$0xff]   ;;  %v5176_v2 = vmov 0.0   ;;  %v4962_v3 = vld [vmem:[%s5289_s20 + $0x18] sm:$0xff]   ;;  %v4963_v4 = vld [vmem:[%s5289_s20] sm:$0xff]   ;;  %vm5177_vm1 = vmmov 0   ;;  %vm708_vm2 = vcmask 261120   ;;  %s5896_s5 = scalar_lea.vmem %s5863_s4, %s5278_s28 }
  0x31   : > { %4748 = vmatprep.subr.bf16.mxu0 %v5176_v2  ;;  %4756 = vmatprep.subr.bf16.mxu1 %v5176_v2  ;;  %v4964_v5 = vld [vmem:[%s5289_s20 + $0x10] sm:$0xff]   ;;  %v4965_v8 = vld [vmem:[%s5289_s20 + $0x28] sm:$0xff]   ;;  %v4966_v9 = vld [vmem:[%s5289_s20 + $0x38] sm:$0xff]   ;;  %vm1380_vm3 = vcmask 64512   ;;  %vm1624_vm4 = vcmask 1043456  }
  0x32   : > { %4749 = vmatpush3.bf16.msra.mxu0 %v4961_v1  ;;  %4752 = vmatprep.mubr.msk.bf16.mxu0 %vm5177_vm1, %v5176_v2  ;;  %v4967_v10 = vld [vmem:[%s5289_s20 + $0x20] sm:$0xff]   ;;  %v4968_v11 = vld [vmem:[%s5289_s20 + $0x30] sm:$0xff]   ;;  %v4969_v12 = vld [vmem:[%s5289_s20 + $0x48] sm:$0xff]  }
  0x33   : > { %4757 = vmatpush3.bf16.msra.mxu1 %v4962_v3  ;;  %4750 = vmatprep.subr.bf16.mxu0 %v5176_v2  ;;  %v4970_v13 = vld [vmem:[%s5289_s20 + $0x58] sm:$0xff]   ;;  %v4971_v14 = vld [vmem:[%s5289_s20 + $0x40] sm:$0xff]   ;;  %v4972_v15 = vld [vmem:[%s5289_s20 + $0x50] sm:$0xff]  }
  0x34   : > { %4758 = vmatprep.subr.bf16.mxu1 %v5176_v2  ;;  %4760 = vmatprep.mubr.msk.bf16.mxu1 %vm5177_vm1, %v5176_v2  ;;  %v4973_v16 = vld [vmem:[%s5289_s20 + $0x68] sm:$0xff]   ;;  %v4974_v17 = vld [vmem:[%s5289_s20 + $0x78] sm:$0xff]   ;;  %v4975_v18 = vld [vmem:[%s5289_s20 + $0x60] sm:$0xff]  }
  0x35   : > { %v4976_v19 = vld [vmem:[%s5289_s20 + $0x70] sm:$0xff]   ;;  %v4977_v20 = vld [vmem:[%s5289_s20 + $0x88] sm:$0xff]   ;;  %v4978_v21 = vld [vmem:[%s5289_s20 + $0x80] sm:$0xff]  }
  0x36   : > { %v605_v6 = vld [vmem:[#allocation2] sm:$0xff]  ;;  %4751 = vmatpush3.bf16.msra.mxu0 %v4963_v4  ;;  %v4979_v22 = vld [vmem:[%s5289_s20 + $0x98] sm:$0xff]   ;;  %v4980_v23 = vld [vmem:[%s5289_s20 + $0x90] sm:$0xff]  }
  0x37   : > { %v5355_v7 = vpack.c.bf16 %v605_v6, %v605_v6  ;;  %4759 = vmatpush3.bf16.msra.mxu1 %v4964_v5  ;;  %4764 = vmatprep.subr.bf16.mxu0 %v5176_v2  ;;  %v4981_v24 = vld [vmem:[%s5289_s20 + $0xa8] sm:$0xff]   ;;  %v4982_v25 = vld [vmem:[%s5289_s20 + $0xa0] sm:$0xff]   ;;  %v4983_v26 = vld [vmem:[%s5289_s20 + $0xb8] sm:$0xff]  }
  0x38   : > { %4772 = vmatprep.subr.bf16.mxu1 %v5176_v2  ;;  %v4984_v27 = vld [vmem:[%s5289_s20 + $0xb0] sm:$0xff]   ;;  %v4292_v43 = vld [vmem:[%s5299_s25 + $0x4] ss:$0 sm:$0xff]  ;;  %v4293_v45 = vld [vmem:[%s5299_s25 + $0x5] ss:$0 sm:$0xff] }
  0x39   : > { %4753 = vmatmul.mubr.msk.bf16.vlgmr.msra.gmra.mxu0 %vm708_vm2, %v5355_v7  ;;  %v4276_v53 = vld [vmem:[%s5299_s25] ss:$0 sm:$0xff]  ;;  %v4277_v56 = vld [vmem:[%s5299_s25 + $0x1] ss:$0 sm:$0xff]  ;;  %v4294_v61 = vld [vmem:[%s5299_s25 + $0x6] ss:$0 sm:$0xff] }
  0x3a   : > { %4761 = vmatmul.mubr.msk.bf16.vlgmr.msra.gmra.mxu1 %vm708_vm2, %v5355_v7  ;;  %4765 = vmatpush3.bf16.msra.mxu0 %v4965_v8  ;;  %v4295_v0 = vld [vmem:[%s5299_s25 + $0x7] ss:$0 sm:$0xff] }
  0x3b   : > { %4773 = vmatpush3.bf16.msra.mxu1 %v4966_v9  ;;  %4766 = vmatprep.subr.bf16.mxu0 %v5176_v2 }
  0x3c   : > { %4774 = vmatprep.subr.bf16.mxu1 %v5176_v2  ;;  %4768 = vmatprep.mubr.msk.bf16.mxu0 %vm5177_vm1, %v5176_v2 }
  0x3d   : > { %4776 = vmatprep.mubr.msk.bf16.mxu1 %vm5177_vm1, %v5176_v2 }
  0x3e   : > { %4767 = vmatpush3.bf16.msra.mxu0 %v4967_v10 }
  0x3f   : > { %4775 = vmatpush3.bf16.msra.mxu1 %v4968_v11  ;;  %4780 = vmatprep.subr.bf16.mxu0 %v5176_v2 }
  0x40   : > { %4788 = vmatprep.subr.bf16.mxu1 %v5176_v2 }
  0x41   : > { %4769 = vmatmul.mubr.msk.bf16.vlgmr.msra.gmra.mxu0 %vm708_vm2, %v5355_v7 }
  0x42   : > { %4777 = vmatmul.mubr.msk.bf16.vlgmr.msra.gmra.mxu1 %vm708_vm2, %v5355_v7  ;;  %4781 = vmatpush3.bf16.msra.mxu0 %v4969_v12  ;;  %v4278_v12 = vld [vmem:[%s5299_s25 + $0x2] ss:$0 sm:$0xff] }
  0x43   : > { %4789 = vmatpush3.bf16.msra.mxu1 %v4970_v13  ;;  %4782 = vmatprep.subr.bf16.mxu0 %v5176_v2 }
  0x44   : > { %4790 = vmatprep.subr.bf16.mxu1 %v5176_v2  ;;  %4784 = vmatprep.mubr.msk.bf16.mxu0 %vm5177_vm1, %v5176_v2 }
  0x45   : > { %4792 = vmatprep.mubr.msk.bf16.mxu1 %vm5177_vm1, %v5176_v2 }
  0x46   : > { %4783 = vmatpush3.bf16.msra.mxu0 %v4971_v14 }
  0x47   : > { %4791 = vmatpush3.bf16.msra.mxu1 %v4972_v15  ;;  %4796 = vmatprep.subr.bf16.mxu0 %v5176_v2  ;;  %v4279_v15 = vld [vmem:[%s5299_s25 + $0x3] ss:$0 sm:$0xff] }
  0x48   : > { %4804 = vmatprep.subr.bf16.mxu1 %v5176_v2 }
  0x49   : > { %4785 = vmatmul.mubr.msk.bf16.vlgmr.msra.gmra.mxu0 %vm708_vm2, %v5355_v7 }
  0x4a   : > { %4793 = vmatmul.mubr.msk.bf16.vlgmr.msra.gmra.mxu1 %vm708_vm2, %v5355_v7  ;;  %4797 = vmatpush3.bf16.msra.mxu0 %v4973_v16 }
  0x4b   : > { %4805 = vmatpush3.bf16.msra.mxu1 %v4974_v17  ;;  %4798 = vmatprep.subr.bf16.mxu0 %v5176_v2 }
  0x4c   : > { %4806 = vmatprep.subr.bf16.mxu1 %v5176_v2  ;;  %4800 = vmatprep.mubr.msk.bf16.mxu0 %vm5177_vm1, %v5176_v2 }
  0x4d   : > { %4808 = vmatprep.mubr.msk.bf16.mxu1 %vm5177_vm1, %v5176_v2 }
  0x4e   : > { %4799 = vmatpush3.bf16.msra.mxu0 %v4975_v18 }
  0x4f   : > { %4807 = vmatpush3.bf16.msra.mxu1 %v4976_v19  ;;  %4812 = vmatprep.subr.bf16.mxu0 %v5176_v2 }
  0x50   : > { %4820 = vmatprep.subr.bf16.mxu1 %v5176_v2 }
  0x51   : > { %4801 = vmatmul.mubr.msk.bf16.vlgmr.msra.gmra.mxu0 %vm708_vm2, %v5355_v7 }
  0x52   : > { %4809 = vmatmul.mubr.msk.bf16.vlgmr.msra.gmra.mxu1 %vm708_vm2, %v5355_v7  ;;  %4816 = vmatprep.mubr.msk.bf16.mxu0 %vm5177_vm1, %v5176_v2 }
  0x53   : > { %4824 = vmatprep.mubr.msk.bf16.mxu1 %vm5177_vm1, %v5176_v2  ;;  %4813 = vmatpush3.bf16.msra.mxu0 %v4977_v20 }
  0x54   : > { %4814 = vmatprep.subr.bf16.mxu0 %v5176_v2  ;;  %4821 = vmatpush3.bf16.msra.mxu1 %v4979_v22 }
  0x55   : > { %4822 = vmatprep.subr.bf16.mxu1 %v5176_v2 }
  0x57   : > { %4815 = vmatpush3.bf16.msra.mxu0 %v4978_v21 }
  0x58   : > { %4828 = vmatprep.subr.bf16.mxu0 %v5176_v2  ;;  %4823 = vmatpush3.bf16.msra.mxu1 %v4980_v23 }
  0x59   : > { %4836 = vmatprep.subr.bf16.mxu1 %v5176_v2 }
  0x5a   : > { %4817 = vmatmul.mubr.msk.bf16.vlgmr.msra.gmra.mxu0 %vm708_vm2, %v5355_v7 }
  0x5b   : > { %4829 = vmatpush3.bf16.msra.mxu0 %v4981_v24  ;;  %4832 = vmatprep.mubr.msk.bf16.mxu0 %vm5177_vm1, %v5176_v2 }
  0x5c   : > { %4830 = vmatprep.subr.bf16.mxu0 %v5176_v2  ;;  %4825 = vmatmul.mubr.msk.bf16.vlgmr.msra.gmra.mxu1 %vm708_vm2, %v5355_v7 }
  0x5d   : > { %4837 = vmatpush3.bf16.msra.mxu1 %v4983_v26  ;;  %4840 = vmatprep.mubr.msk.bf16.mxu1 %vm5177_vm1, %v5176_v2 }
  0x5e   : > { %4838 = vmatprep.subr.bf16.mxu1 %v5176_v2 }
  0x5f   : > { %4831 = vmatpush3.bf16.msra.mxu0 %v4982_v25  ;;  %v4308_v25 = vld [vmem:[%s5299_s25 + $0x8] ss:$0 sm:$0xff] }
  0x60   : > { %4844 = vmatprep.subr.bf16.mxu0 %v5176_v2 }
  0x61   : > { %4839 = vmatpush3.bf16.msra.mxu1 %v4984_v27 }
  0x62   : > { %4833 = vmatmul.mubr.msk.bf16.vlgmr.msra.gmra.mxu0 %vm708_vm2, %v5355_v7  ;;  %4850 = vmatprep.subr.bf16.mxu1 %v5176_v2 }
  0x63   : > { %4846 = vmatprep.mubr.msk.bf16.mxu0 %vm5177_vm1, %v5176_v2 }
  0x64   : > { %4841 = vmatmul.mubr.msk.bf16.vlgmr.msra.gmra.mxu1 %vm708_vm2, %v5355_v7 }
  0x65   : > { %4852 = vmatprep.mubr.msk.bf16.mxu1 %vm5177_vm1, %v5176_v2 }
  0xf9   : > { %v746_v28 = vpop.f32.mrf.mxu0 }
  0xfa   : > { %v798_v29 = vpop.f32.mrf.mxu1  ;;  %v747_v62 = vadd.f32 %v4276_v53, %v746_v28 }
  0xfb   : > { %v4754_v30 = vpop.f32.mrf.mxu0  ;;  %v799_v1 = vadd.f32 %v4277_v56, %v798_v29  ;;  %v4309_v29 = vld [vmem:[%s5299_s25 + $0x9] ss:$0 sm:$0xff] }
  0xfc   : > { %v4762_v31 = vpop.f32.mrf.mxu1  ;;  %v1372_v8 = vpack.c.bf16 %v747_v62, %v747_v62 }
  0xfd   : > { %v749_v32 = vpop.f32.mrf.mxu0  ;;  %v1373_v11 = vpack.c.bf16 %v799_v1, %v799_v1 }
  0xfe   : > { %v801_v33 = vpop.f32.mrf.mxu1 }
  0xff   : > { %v4755_v34 = vpop.f32.mrf.mxu0 }
 0x100   : > { %v4763_v35 = vpop.f32.mrf.mxu1 }
 0x101   : > { %v850_v36 = vpop.f32.mrf.mxu0 }
 0x102   : > { %v902_v37 = vpop.f32.mrf.mxu1  ;;  %v851_v20 = vadd.f32 %v4278_v12, %v850_v36 }
 0x103   : > { %v4770_v38 = vpop.f32.mrf.mxu0  ;;  %v903_v22 = vadd.f32 %v4279_v15, %v902_v37 }
 0x104   : > { %v4778_v39 = vpop.f32.mrf.mxu1  ;;  %v1374_v23 = vpack.c.bf16 %v851_v20, %v851_v20 }
 0x105   : > { %v853_v40 = vpop.f32.mrf.mxu0  ;;  %v1375_v24 = vpack.c.bf16 %v903_v22, %v903_v22 }
 0x106   : > { %v905_v41 = vpop.f32.mrf.mxu1 }
 0x107   : > { %v4771_v42 = vpop.f32.mrf.mxu0 }
 0x108   : > { %v4779_v44 = vpop.f32.mrf.mxu1 }
 0x109   : > { %v978_v46 = vpop.f32.mrf.mxu0 }
 0x10a   : > { %v979_v47 = vadd.f32 %v4292_v43, %v978_v46  ;;  %v1030_v48 = vpop.f32.mrf.mxu1 }
 0x10b   : > { %v1031_v49 = vadd.f32 %v4293_v45, %v1030_v48  ;;  %v4786_v50 = vpop.f32.mrf.mxu0 }
 0x10c   : > { %v1376_v51 = vpack.c.bf16 %v979_v47, %v979_v47  ;;  %v4794_v52 = vpop.f32.mrf.mxu1 }
 0x10d   : > { %v1377_v54 = vpack.c.bf16 %v1031_v49, %v1031_v49  ;;  %v981_v55 = vpop.f32.mrf.mxu0 }
 0x10e   : > { %v1385_v57 = vsel %vm1380_vm3, %v1376_v51, 0  ;;  %v1033_v58 = vpop.f32.mrf.mxu1 }
 0x10f   : > { %v1431_v59 = vsel %vm1380_vm3, %v1377_v54, 0  ;;  %v4787_v60 = vpop.f32.mrf.mxu0  ;;  %4845 = vmatpush3.bf16.xpose.msra.mxu0 %v1385_v57 }
 0x110   : > { %v4795_v63 = vpop.f32.mrf.mxu1  ;;  %4851 = vmatpush3.bf16.xpose.msra.mxu1 %v1431_v59  ;;  %4856 = vmatprep.subr.bf16.mxu0 %v5176_v2 }
 0x111   : > { %v1082_v3 = vpop.f32.mrf.mxu0  ;;  %4862 = vmatprep.subr.bf16.mxu1 %v5176_v2 }
 0x112   : > { %v1083_v4 = vadd.f32 %v4294_v61, %v1082_v3  ;;  %v1134_v5 = vpop.f32.mrf.mxu1 }
 0x113   : > { %v1135_v6 = vadd.f32 %v4295_v0, %v1134_v5  ;;  %v4802_v7 = vpop.f32.mrf.mxu0 }
 0x114   : > { %v1378_v9 = vpack.c.bf16 %v1083_v4, %v1083_v4  ;;  %v4810_v10 = vpop.f32.mrf.mxu1 }
 0x115   : > { %v1379_v13 = vpack.c.bf16 %v1135_v6, %v1135_v6  ;;  %v1085_v14 = vpop.f32.mrf.mxu0 }
 0x116   : > { %v1477_v16 = vsel %vm1380_vm3, %v1378_v9, 0  ;;  %v1137_v17 = vpop.f32.mrf.mxu1  ;;  %4847 = vmatmul.mubr.msk.bf16.vlgmr.msra.gmra.mxu0 %vm1380_vm3, %v1372_v8 }
 0x117   : > { %v1523_v18 = vsel %vm1380_vm3, %v1379_v13, 0  ;;  %4853 = vmatmul.mubr.msk.bf16.vlgmr.msra.gmra.mxu1 %vm1380_vm3, %v1373_v11  ;;  %v4803_v19 = vpop.f32.mrf.mxu0  ;;  %4857 = vmatpush3.bf16.xpose.msra.mxu0 %v1477_v16 }
 0x118   : > { %v4811_v21 = vpop.f32.mrf.mxu1  ;;  %4863 = vmatpush3.bf16.xpose.msra.mxu1 %v1523_v18  ;;  %4858 = vmatprep.mubr.msk.bf16.mxu0 %vm5177_vm1, %v5176_v2 }
 0x119   : > { %4864 = vmatprep.mubr.msk.bf16.mxu1 %vm5177_vm1, %v5176_v2  ;;  %4868 = vmatprep.subr.bf16.mxu0 %v5176_v2 }
 0x11a   : > { %4874 = vmatprep.subr.bf16.mxu1 %v5176_v2  ;;  %v1210_v26 = vpop.f32.mrf.mxu0 }
 0x11b   : > { %v1211_v27 = vadd.f32 %v4308_v25, %v1210_v26 }
 0x11c   : > { %v4818_v28 = vpop.f32.mrf.mxu0  ;;  %v1262_v32 = vpop.f32.mrf.mxu1 }
 0x11d   : > { %v1617_v30 = vpack.c.bf16 %v1211_v27, %v1211_v27  ;;  %v1263_v34 = vadd.f32 %v4309_v29, %v1262_v32  ;;  %v4310_v32 = vld [vmem:[%s5299_s25 + $0xa] ss:$0 sm:$0xff] }
 0x11e   : > { %4859 = vmatmul.mubr.msk.bf16.vlgmr.msra.gmra.mxu0 %vm1380_vm3, %v1374_v23  ;;  %v1213_v31 = vpop.f32.mrf.mxu0  ;;  %v4826_v36 = vpop.f32.mrf.mxu1 }
 0x11f   : > { %4865 = vmatmul.mubr.msk.bf16.vlgmr.msra.gmra.mxu1 %vm1380_vm3, %v1375_v24  ;;  %4870 = vmatprep.mubr.msk.bf16.mxu0 %vm5177_vm1, %v5176_v2  ;;  %v1626_v33 = vsel %vm1624_vm4, %v1617_v30, 0  ;;  %v1618_v37 = vpack.c.bf16 %v1263_v34, %v1263_v34 }
 0x120   : > { %4876 = vmatprep.mubr.msk.bf16.mxu1 %vm5177_vm1, %v5176_v2  ;;  %v4819_v35 = vpop.f32.mrf.mxu0  ;;  %4869 = vmatpush3.bf16.msra.mxu0 %v1626_v33  ;;  %v1265_v38 = vpop.f32.mrf.mxu1 }
 0x121   : > { %4880 = vmatprep.subr.bf16.mxu0 %v5176_v2  ;;  %v1672_v40 = vsel %vm1624_vm4, %v1618_v37, 0  ;;  %v4311_v35 = vld [vmem:[%s5299_s25 + $0xb] ss:$0 sm:$0xff] }
 0x122   : > { %v5479_v39 = vpop.f32.mrf.mxu0  ;;  %v4827_v41 = vpop.f32.mrf.mxu1  ;;  %4875 = vmatpush3.bf16.msra.mxu1 %v1672_v40 }
 0x123   : > { %4886 = vmatprep.subr.bf16.mxu1 %v5176_v2  ;;  %v1315_v34 = vadd.f32 %v4310_v32, %v5479_v39 }
 0x124   : > { %v4834_v42 = vpop.f32.mrf.mxu0  ;;  %v5483_v44 = vpop.f32.mrf.mxu1 }
 0x125   : > { %v1619_v38 = vpack.c.bf16 %v1315_v34, %v1315_v34  ;;  %v1367_v40 = vadd.f32 %v4311_v35, %v5483_v44  ;;  %v4336_v35 = vld [vmem:[%s5896_s5] ss:$0 sm:$0xff] }
 0x126   : > { %v1317_v43 = vpop.f32.mrf.mxu0  ;;  %v4842_v46 = vpop.f32.mrf.mxu1 }
 0x127   : > { %v1620_v46 = vpack.c.bf16 %v1367_v40, %v1367_v40 }
 0x128   : > { %v4835_v45 = vpop.f32.mrf.mxu0  ;;  %v1369_v47 = vpop.f32.mrf.mxu1 }
 0x129   : > { %v1718_v45 = vsel %vm1624_vm4, %v1619_v38, 0  ;;  %v1764_v44 = vsel %vm1624_vm4, %v1620_v46, 0 }
 0x12a   : > { %v4843_v48 = vpop.f32.mrf.mxu1 }
 0x1d6   : > { %v1421_v49 = vpop.f32.mrf.mxu0 }
 0x1d7   : > { %v1565_v50 = vmul.f32 0.35355338, %v1421_v49  ;;  %v1467_v51 = vpop.f32.mrf.mxu1  ;;  %v666_v49 = vld [vmem:[%s5294_s24] sm:$0xf] }
 0x1d8   : > { %v4848_v52 = vpop.f32.mrf.mxu0  ;;  %v1566_v53 = vmul.f32 0.35355338, %v1467_v51 }
 0x1d9   : > { %v4854_v54 = vpop.f32.mrf.mxu1  ;;  %v1569_v55 = vsel %vm1380_vm3, %v1565_v50, -inf  ;;  %v1814_v52 = vsel %vm1624_vm4, %v666_v49, 0 }
 0x1da   : > { %1570 = vmax.xlane.f32.xlu0 %v1569_v55  ;;  %v1424_v56 = vpop.f32.mrf.mxu0  ;;  %v1572_v60 = vsel %vm1380_vm3, %v1566_v53, -inf }
 0x1db   : > { %v1470_v57 = vpop.f32.mrf.mxu1  ;;  %v667_v56 = vld [vmem:[%s5294_s24 + $0x4] sm:$0xf] }
 0x1dc   : > { %v4849_v58 = vpop.f32.mrf.mxu0  ;;  %v1860_v57 = vsel %vm1624_vm4, %v667_v56, 0 }
 0x1dd   : > { %v4855_v59 = vpop.f32.mrf.mxu1  ;;  %v668_v58 = vld [vmem:[%s5294_s24 + $0x8] sm:$0xf] }
 0x1de   : > { %1573 = vmax.xlane.f32.xlu0 %v1572_v60  ;;  %v1513_v61 = vpop.f32.mrf.mxu0 }
 0x1df   : > { %v1559_v62 = vpop.f32.mrf.mxu1  ;;  %v1567_v63 = vmul.f32 0.35355338, %v1513_v61  ;;  %v1906_v61 = vsel %vm1624_vm4, %v668_v58, 0 }
 0x1e0   : > { %v4860_v0 = vpop.f32.mrf.mxu0  ;;  %v1568_v1 = vmul.f32 0.35355338, %v1559_v62 }
 0x1e1   : > { %v4866_v3 = vpop.f32.mrf.mxu1  ;;  %v1575_v4 = vsel %vm1380_vm3, %v1567_v63, -inf }
 0x1e2   : > { %1576 = vmax.xlane.f32.xlu1 %v1575_v4  ;;  %v1516_v5 = vpop.f32.mrf.mxu0  ;;  %v1578_v9 = vsel %vm1380_vm3, %v1568_v1, -inf }
 0x1e3   : > { %v1562_v6 = vpop.f32.mrf.mxu1 }
 0x1e4   : > { %v4861_v7 = vpop.f32.mrf.mxu0 }
 0x1e5   : > { %v4867_v8 = vpop.f32.mrf.mxu1 }
 0x1e6   : > { %1579 = vmax.xlane.f32.xlu1 %v1578_v9 }
 0x263   : > { %v1571_v10 = vpop.xlane.xlu0 %1570 }
 0x264   : > { %v1581_v11 = vsub.f32 %v1565_v50, %v1571_v10 }
 0x266   : > { %v1585_v12 = vmul.f32 1.442695, %v1581_v11 }
 0x267   : > { %v1574_v13 = vpop.xlane.xlu0 %1573 }
 0x268   : > { %5113 = vpow2.f32 %v1585_v12  ;;  %v1582_v14 = vsub.f32 %v1566_v53, %v1574_v13 }
 0x26a   : > { %v1587_v15 = vmul.f32 1.442695, %v1582_v14 }
 0x26b   : > { %v1577_v16 = vpop.xlane.xlu1 %1576 }
 0x26c   : > { %5115 = vpow2.f32 %v1587_v15  ;;  %v1583_v17 = vsub.f32 %v1567_v63, %v1577_v16  ;;  %v669_v63 = vld [vmem:[%s5294_s24 + $0xc] sm:$0xf] }
 0x26d   : > { %v1952_v4 = vsel %vm1624_vm4, %v669_v63, 0  ;;  %v2043_v63 = vld [vmem:[%s5315_s27 + $0x48] sm:$0xff] }
 0x26e   : > { %v1589_v18 = vmul.f32 1.442695, %v1583_v17 }
 0x26f   : > { %v1580_v19 = vpop.xlane.xlu1 %1579 }
 0x270   : > { %5117 = vpow2.f32 %v1589_v18  ;;  %v1584_v20 = vsub.f32 %v1568_v1, %v1580_v19 }
 0x272   : > { %v1591_v21 = vmul.f32 1.442695, %v1584_v20 }
 0x274   : > { %5119 = vpow2.f32 %v1591_v21 }
 0x275   : > { %v5114_v22 = vpop.eup %5113 }
 0x276   : > { %v1593_v23 = vsel %vm1380_vm3, %v5114_v22, 0.0 }
 0x277   : > { %1594 = vadd.xlane.f32.xlu0 %v1593_v23 }
 0x279   : > { %v5116_v24 = vpop.eup %5115 }
 0x27a   : > { %v1596_v25 = vsel %vm1380_vm3, %v5116_v24, 0.0 }
 0x27b   : > { %1597 = vadd.xlane.f32.xlu1 %v1596_v25 }
 0x27d   : > { %v5118_v26 = vpop.eup %5117 }
 0x27e   : > { %v1599_v27 = vsel %vm1380_vm3, %v5118_v26, 0.0 }
 0x27f   : > { %1600 = vadd.xlane.f32.xlu0 %v1599_v27 }
 0x281   : > { %v5120_v28 = vpop.eup %5119 }
 0x282   : > { %v1602_v29 = vsel %vm1380_vm3, %v5120_v28, 0.0 }
 0x283   : > { %1603 = vadd.xlane.f32.xlu1 %v1602_v29 }
 0x300   : > { %v1595_v30 = vpop.xlane.xlu0 %1594 }
 0x301   : > { %5121 = vrcp.f32 %v1595_v30 }
 0x304   : > { %v1598_v31 = vpop.xlane.xlu1 %1597 }
 0x305   : > { %5123 = vrcp.f32 %v1598_v31 }
 0x308   : > { %v1601_v33 = vpop.xlane.xlu0 %1600 }
 0x309   : > { %5125 = vrcp.f32 %v1601_v33 }
 0x30c   : > { %v1604_v36 = vpop.xlane.xlu1 %1603 }
 0x30d   : > { %5127 = vrcp.f32 %v1604_v36 }
 0x30e   : > { %v5122_v37 = vpop.eup %5121 }
 0x30f   : > { %v1606_v41 = vmul.f32 %v5122_v37, %v5114_v22 }
 0x311   : > { %v1613_v42 = vpack.c.bf16 %v1606_v41, %v1606_v41 }
 0x312   : > { %v5124_v43 = vpop.eup %5123 }
 0x313   : > { %4871 = vmatmul.mubr.msk.bf16.vlgmr.msra.gmra.mxu0 %vm1380_vm3, %v1613_v42  ;;  %v1608_v47 = vmul.f32 %v5124_v43, %v5116_v24 }
 0x314   : > { %4881 = vmatpush3.bf16.msra.mxu0 %v1718_v45  ;;  %4882 = vmatprep.mubr.msk.bf16.mxu0 %vm5177_vm1, %v5176_v2  ;;  %v5133_v45 = vld [vmem:[#allocation2] sm:$0xff] }
 0x315   : > { %v1614_v39 = vpack.c.bf16 %v1608_v47, %v1608_v47  ;;  %4892 = vmatprep.subr.bf16.mxu0 %v5176_v2 }
 0x316   : > { %v5126_v48 = vpop.eup %5125 }
 0x317   : > { %4877 = vmatmul.mubr.msk.bf16.vlgmr.msra.gmra.mxu1 %vm1380_vm3, %v1614_v39  ;;  %v1610_v50 = vmul.f32 %v5126_v48, %v5118_v26 }
 0x318   : > { %4887 = vmatpush3.bf16.msra.mxu1 %v1764_v44  ;;  %4888 = vmatprep.mubr.msk.bf16.mxu1 %vm5177_vm1, %v5176_v2 }
 0x319   : > { %v1615_v51 = vpack.c.bf16 %v1610_v50, %v1610_v50  ;;  %4898 = vmatprep.subr.bf16.mxu1 %v5176_v2 }
 0x31a   : > { %v5128_v53 = vpop.eup %5127 }
 0x31b   : > { %4883 = vmatmul.mubr.msk.bf16.vlgmr.msra.gmra.mxu0 %vm1380_vm3, %v1615_v51  ;;  %v1612_v54 = vmul.f32 %v5128_v53, %v5120_v28  ;;  %v2050_v51 = vld [vmem:[%s5315_s27 + $0x80] sm:$0xff]  ;;  %v2051_v53 = vld [vmem:[%s5315_s27 + $0x88] sm:$0xff] }
 0x31c   : > { %4893 = vmatpush3.bf16.msra.mxu0 %v1814_v52  ;;  %4894 = vmatprep.mubr.msk.bf16.mxu0 %vm5177_vm1, %v5176_v2  ;;  %v2058_v52 = vld [vmem:[%s5315_s27 + $0xc0] sm:$0xff] }
 0x31d   : > { %v1616_v55 = vpack.c.bf16 %v1612_v54, %v1612_v54  ;;  %4904 = vmatprep.subr.bf16.mxu0 %v5176_v2  ;;  %v4354_v54 = vcombine.high %v2050_v51, %v2058_v52  ;;  %v4353_v56 = vcombine.low %v2050_v51, %v2058_v52  ;;  %v2057_v51 = vld [vmem:[%s5315_s27 + $0xb8] sm:$0xff] }
 0x31e   : > { %v2065_v52 = vld [vmem:[%s5315_s27 + $0xf8] sm:$0xff] }
 0x31f   : > { %4889 = vmatmul.mubr.msk.bf16.vlgmr.msra.gmra.mxu1 %vm1380_vm3, %v1616_v55  ;;  %v2059_v55 = vld [vmem:[%s5315_s27 + $0xc8] sm:$0xff] }
 0x320   : > { %4900 = vmatprep.mubr.msk.bf16.mxu1 %vm5177_vm1, %v5176_v2  ;;  %4899 = vmatpush3.bf16.msra.mxu1 %v1860_v57  ;;  %v4355_v57 = vcombine.low %v2051_v53, %v2059_v55  ;;  %v4356_v58 = vcombine.high %v2051_v53, %v2059_v55 }
 0x321   : > { %4910 = vmatprep.subr.bf16.mxu1 %v5176_v2 }
 0x3d3   : > { %v1662_v59 = vpop.f32.mrf.mxu0 }
 0x3d4   : > { %v1806_v60 = vpack.c.bf16 %v1662_v59, %v1662_v59  ;;  %v2034_v59 = vld [vmem:[%s5315_s27] sm:$0xff] }
 0x3d5   : > { %v4872_v62 = vpop.f32.mrf.mxu0 }
 0x3d6   : > { %4895 = vmatmul.mubr.msk.bf16.vlgmr.msra.gmra.mxu0 %vm1380_vm3, %v1806_v60  ;;  %v2042_v60 = vld [vmem:[%s5315_s27 + $0x40] sm:$0xff] }
 0x3d7   : > { %v1665_v0 = vpop.f32.mrf.mxu0  ;;  %v1708_v1 = vpop.f32.mrf.mxu1  ;;  %4905 = vmatpush3.bf16.msra.mxu0 %v1906_v61  ;;  %4906 = vmatprep.mubr.msk.bf16.mxu0 %vm5177_vm1, %v5176_v2  ;;  %v2035_v61 = vld [vmem:[%s5315_s27 + $0x8] sm:$0xff]  ;;  %v4338_v62 = vcombine.high %v2034_v59, %v2042_v60 }
 0x3d8   : > { %v1807_v3 = vpack.c.bf16 %v1708_v1, %v1708_v1  ;;  %2583 = vmatprep.subr.bf16.mxu0 %v4354_v54  ;;  %v4337_v0 = vcombine.low %v2034_v59, %v2042_v60  ;;  %v4339_v1 = vcombine.low %v2035_v61, %v2043_v63  ;;  %v2041_v59 = vld [vmem:[%s5315_s27 + $0x38] sm:$0xff] }
 0x3d9   : > { %v4873_v5 = vpop.f32.mrf.mxu0  ;;  %v4878_v6 = vpop.f32.mrf.mxu1  ;;  %v2049_v60 = vld [vmem:[%s5315_s27 + $0x78] sm:$0xff] }
 0x3da   : > { %4901 = vmatmul.mubr.msk.bf16.vlgmr.msra.gmra.mxu1 %vm1380_vm3, %v1807_v3  ;;  %v4340_v3 = vcombine.high %v2035_v61, %v2043_v63  ;;  %v2060_v5 = vld [vmem:[%s5315_s27 + $0xd0] sm:$0xff]  ;;  %v2053_v6 = vld [vmem:[%s5315_s27 + $0x98] sm:$0xff] }
 0x3db   : > { %v1711_v7 = vpop.f32.mrf.mxu1  ;;  %v1754_v8 = vpop.f32.mrf.mxu0  ;;  %4911 = vmatpush3.bf16.msra.mxu1 %v1952_v4  ;;  %4912 = vmatprep.mubr.msk.bf16.mxu1 %vm5177_vm1, %v5176_v2  ;;  %v2052_v4 = vld [vmem:[%s5315_s27 + $0x90] sm:$0xff] }
 0x3dc   : > { %v1808_v9 = vpack.c.bf16 %v1754_v8, %v1754_v8  ;;  %2624 = vmatprep.subr.bf16.mxu1 %v4356_v58  ;;  %v5178_v7 = vmov 0   ;;  %v4358_v8 = vcombine.high %v2052_v4, %v2060_v5  ;;  %v2048_v58 = vld [vmem:[%s5315_s27 + $0x70] sm:$0xff] }
 0x3dd   : > { %v4879_v10 = vpop.f32.mrf.mxu1  ;;  %v4884_v11 = vpop.f32.mrf.mxu0 }
 0x3de   : > { %4907 = vmatmul.mubr.msk.bf16.vlgmr.msra.gmra.mxu0 %vm1380_vm3, %v1808_v9  ;;  %v2061_v9 = vld [vmem:[%s5315_s27 + $0xd8] sm:$0xff]  ;;  %v4357_v10 = vcombine.low %v2052_v4, %v2060_v5 }
 0x3df   : > { %v1757_v12 = vpop.f32.mrf.mxu0  ;;  %v1800_v13 = vpop.f32.mrf.mxu1  ;;  %2584 = vmatpush1.bf16.msra.mxu0 %v4353_v56  ;;  %2603 = vmatprep.mubr.bf16.mxu0 %v5178_v7  ;;  %v4359_v11 = vcombine.low %v2053_v6, %v2061_v9  ;;  %v4368_v56 = vcombine.high %v2057_v51, %v2065_v52  ;;  %v4985_v4 = vld [vmem:[%s5326_s0 + $0x78] sm:$0xff]  }
 0x3e0   : > { %v1809_v14 = vpack.c.bf16 %v1800_v13, %v1800_v13  ;;  %2585 = vmatprep.subr.bf16.mxu0 %v4338_v62  ;;  %v4360_v12 = vcombine.high %v2053_v6, %v2061_v9  ;;  %v4367_v62 = vcombine.low %v2057_v51, %v2065_v52  ;;  %v4986_v5 = vld [vmem:[%s5326_s0 + $0xf8] sm:$0xff]   ;;  %v4989_v9 = vld [vmem:[%s5326_s0 + $0x70] sm:$0xff]  }
 0x3e1   : > { %v4885_v15 = vpop.f32.mrf.mxu0  ;;  %v4890_v16 = vpop.f32.mrf.mxu1  ;;  %v4987_v6 = vld [vmem:[%s5326_s0 + $0x38] sm:$0xff]  }
 0x3e2   : > { %4913 = vmatmul.mubr.msk.bf16.vlgmr.msra.gmra.mxu1 %vm1380_vm3, %v1809_v14  ;;  %v2024_v16 = vlaneseq }
 0x3e3   : > { %v1803_v17 = vpop.f32.mrf.mxu1  ;;  %2625 = vmatpush1.bf16.msra.mxu1 %v4355_v57  ;;  %2586 = vmatpush1.bf16.msra.mxu0 %v4337_v0  ;;  %v2040_v57 = vld [vmem:[%s5315_s27 + $0x30] sm:$0xff]  ;;  %v4352_v0 = vcombine.high %v2041_v59, %v2049_v60 }
 0x3e4   : > { %2626 = vmatprep.subr.bf16.mxu1 %v4340_v3  ;;  %2644 = vmatprep.mubr.bf16.mxu1 %v5178_v7  ;;  %v5556_v17 = vshrl.u32 %v2024_v16, 7  ;;  %v4350_v63 = vcombine.high %v2040_v57, %v2048_v58  ;;  %v4351_v3 = vcombine.low %v2041_v59, %v2049_v60  ;;  %v4997_v16 = vld [vmem:[%s5326_s0 + $0x60] sm:$0xff]  }
 0x3e5   : > { %v4891_v18 = vpop.f32.mrf.mxu1  ;;  %2665 = vmatprep.subr.bf16.mxu0 %v4358_v8  ;;  %v4988_v8 = vld [vmem:[%s5326_s0 + $0xb8] sm:$0xff]  }
 0x3e6   : > { %v5559_v18 = vsub.s32 0, %v5556_v17  ;;  %v2350_v59 = vsub.s32 5, %v5556_v17  ;;  %v2358_v60 = vsub.s32 7, %v5556_v17 }
 0x3e7   : > { %2627 = vmatpush1.bf16.msra.mxu1 %v4339_v1  ;;  %v4349_v1 = vcombine.low %v2040_v57, %v2048_v58 }
 0x3e8   : > { %2706 = vmatprep.subr.bf16.mxu1 %v4360_v12  ;;  %v4993_v12 = vld [vmem:[%s5326_s0 + $0x68] sm:$0xff]  }
 0x496   : > { %v1850_v19 = vpop.f32.mrf.mxu0 }
 0x497   : > { %v1994_v27 = vsel %vm708_vm2, %v1850_v19, 0.0  ;;  %v2009_v19 = vld [vmem:[%s5310_s15] sm:$0x3] }
 0x498   : > { %v4896_v20 = vpop.f32.mrf.mxu0 }
 0x499   : > { %v5563_v20 = vsub.s32 1, %v5556_v17 }
 0x49a   : > { %v1853_v21 = vpop.f32.mrf.mxu0  ;;  %v1896_v22 = vpop.f32.mrf.mxu1 }
 0x49b   : > { %v1995_v24 = vsel %vm708_vm2, %v1896_v22, 0.0  ;;  %v2027_v21 = vrot.slane %v2009_v19, %v5559_v18 }
 0x49c   : > { %v4897_v2 = vpop.f32.mrf.mxu0  ;;  %v4902_v23 = vpop.f32.mrf.mxu1  ;;  %v1996_v29 = vadd.f32 %v1995_v24, %v1994_v27  ;;  %v2037_v27 = vld [vmem:[%s5315_s27 + $0x18] sm:$0xff] }
 0x49d   : > { %v2032_v2 = vrot.slane %v2009_v19, %v5563_v20  ;;  %v4998_v19 = vld [vmem:[%s5326_s0 + $0xe0] sm:$0xff]  }
 0x49e   : > { %v1899_v25 = vpop.f32.mrf.mxu1  ;;  %v1942_v26 = vpop.f32.mrf.mxu0 }
 0x49f   : > { %v1997_v28 = vsel %vm708_vm2, %v1942_v26, 0.0  ;;  %v2036_v25 = vld [vmem:[%s5315_s27 + $0x10] sm:$0xff] }
 0x4a0   : > { %v4903_v30 = vpop.f32.mrf.mxu1  ;;  %v4908_v31 = vpop.f32.mrf.mxu0  ;;  %v1998_v32 = vadd.f32 %v1997_v28, %v1996_v29  ;;  %v2044_v26 = vld [vmem:[%s5315_s27 + $0x50] sm:$0xff]  ;;  %v2045_v28 = vld [vmem:[%s5315_s27 + $0x58] sm:$0xff] }
 0x4a1   : > { %v4342_v31 = vcombine.high %v2036_v25, %v2044_v26 }
 0x4a2   : > { %v1945_v33 = vpop.f32.mrf.mxu0  ;;  %v1988_v34 = vpop.f32.mrf.mxu1 }
 0x4a3   : > { %v1999_v36 = vsel %vm708_vm2, %v1988_v34, 0.0  ;;  %v2054_v33 = vld [vmem:[%s5315_s27 + $0xa0] sm:$0xff] }
 0x4a4   : > { %v2000_v37 = vadd.f32 %v1999_v36, %v1998_v32  ;;  %v4909_v38 = vpop.f32.mrf.mxu0  ;;  %v4914_v40 = vpop.f32.mrf.mxu1  ;;  %v4344_v32 = vcombine.high %v2037_v27, %v2045_v28  ;;  %v2062_v34 = vld [vmem:[%s5315_s27 + $0xe0] sm:$0xff]  ;;  %v2063_v36 = vld [vmem:[%s5315_s27 + $0xe8] sm:$0xff] }
 0x4a5   : > { %v4343_v38 = vcombine.low %v2037_v27, %v2045_v28  ;;  %v4362_v40 = vcombine.high %v2054_v33, %v2062_v34  ;;  %v5006_v27 = vld [vmem:[%s5326_s0 + $0xd0] sm:$0xff]  }
 0x4a6   : > { %v2007_v41 = vadd.f32 %v4336_v35, %v2000_v37  ;;  %v1991_v42 = vpop.f32.mrf.mxu1  ;;  %v2055_v35 = vld [vmem:[%s5315_s27 + $0xa8] sm:$0xff]  ;;  %v4341_v37 = vcombine.low %v2036_v25, %v2044_v26  ;;  %v5004_v25 = vld [vmem:[%s5326_s0 + $0x98] sm:$0xff]   ;;  %v5005_v26 = vld [vmem:[%s5326_s0 + $0x50] sm:$0xff]  }
 0x4a7   : > { %v2038_v42 = vld [vmem:[%s5315_s27 + $0x20] sm:$0xff]  ;;  %v5007_v28 = vld [vmem:[%s5326_s0 + $0x10] sm:$0xff]  }
 0x4a8   : > { %v4915_v43 = vpop.f32.mrf.mxu1  ;;  %v2008_v46 = vadd.f32 %v5133_v45, %v2007_v41  ;;  %v4364_v41 = vcombine.high %v2055_v35, %v2063_v36  ;;  %v2039_v45 = vld [vmem:[%s5315_s27 + $0x28] sm:$0xff] }
 0x4a9   : > { %v2046_v43 = vld [vmem:[%s5315_s27 + $0x60] sm:$0xff] }
 0x4aa   : > { %v2010_v47 = vsel %vm708_vm2, %v2008_v46, 0.0  ;;  %v4345_v53 = vcombine.low %v2038_v42, %v2046_v43 }
 0x4ab   : > { %2011 = vadd.xlane.f32.xlu0 %v2010_v47  ;;  %v4361_v47 = vcombine.low %v2054_v33, %v2062_v34  ;;  %v5011_v33 = vld [vmem:[%s5326_s0 + $0x8] sm:$0xff]  }
 0x4ac   : > { %v5012_v34 = vld [vmem:[%s5326_s0 + $0x88] sm:$0xff]  }
 0x534   : > { %v2012_v39 = vpop.xlane.xlu0 %2011 }
 0x535   : > { %v2014_v48 = vmul.f32 0.03125, %v2012_v39  ;;  %v4363_v39 = vcombine.low %v2055_v35, %v2063_v36  ;;  %v5013_v35 = vld [vmem:[%s5326_s0 + $0x40] sm:$0xff]  }
 0x536   : > { %v5014_v36 = vld [vmem:[%s5326_s0 + $0xc0] sm:$0xff]  }
 0x537   : > { %v2015_v49 = vsub.f32 %v2008_v46, %v2014_v48  ;;  %v2047_v46 = vld [vmem:[%s5315_s27 + $0x68] sm:$0xff]  ;;  %v4346_v48 = vcombine.high %v2038_v42, %v2046_v43  ;;  %v2354_v42 = vsub.s32 6, %v5556_v17 }
 0x538   : > { %v4347_v54 = vcombine.low %v2039_v45, %v2047_v46  ;;  %v5651_v43 = vld [vmem:[%s5320_s16 + $0x8] sm:$0xff] }
 0x539   : > { %v2016_v44 = vmul.f32 %v2015_v49, %v2015_v49 }
 0x53b   : > { %v2017_v50 = vsel %vm708_vm2, %v2016_v44, 0.0  ;;  %v2056_v44 = vld [vmem:[%s5315_s27 + $0xb0] sm:$0xff] }
 0x53c   : > { %2018 = vadd.xlane.f32.xlu1 %v2017_v50  ;;  %v2064_v50 = vld [vmem:[%s5315_s27 + $0xf0] sm:$0xff] }
 0x53d   : > { %v4366_v55 = vcombine.high %v2056_v44, %v2064_v50  ;;  %v4365_v61 = vcombine.low %v2056_v44, %v2064_v50 }
 0x5c5   : > { %v2019_v13 = vpop.xlane.xlu1 %2018 }
 0x5c6   : > { %v2020_v14 = vmul.f32 0.03125, %v2019_v13  ;;  %v4994_v13 = vld [vmem:[%s5326_s0 + $0xe8] sm:$0xff]  }
 0x5c8   : > { %v2021_v15 = vadd.f32 1e-05, %v2020_v14  ;;  %v4995_v14 = vld [vmem:[%s5326_s0 + $0x28] sm:$0xff]  }
 0x5ca   : > { %5129 = vrsqrt.f32 %v2021_v15  ;;  %v4996_v15 = vld [vmem:[%s5326_s0 + $0xa8] sm:$0xff]  }
 0x5d7   : > { %v5130_v22 = vpop.eup %5129 }
 0x5d8   : > { %v2023_v23 = vmul.f32 %v5130_v22, %v2015_v49  ;;  %v4348_v49 = vcombine.high %v2039_v45, %v2047_v46  ;;  %v5000_v22 = vld [vmem:[%s5326_s0 + $0xa0] sm:$0xff]   ;;  %v5656_v45 = vrot.slane %v5651_v43, %v2354_v42  ;;  %v2338_v46 = vsub.s32 2, %v5556_v17 }
 0x5da   : > { %v2028_v24 = vmul.f32 %v2027_v21, %v2023_v23  ;;  %v4999_v21 = vld [vmem:[%s5326_s0 + $0x20] sm:$0xff]   ;;  %v5002_v23 = vld [vmem:[%s5326_s0 + $0xd8] sm:$0xff]  }
 0x5dc   : > { %v5571_v29 = vadd.f32 %v2032_v2, %v2028_v24  ;;  %v5001_v2 = vld [vmem:[%s5326_s0 + $0x58] sm:$0xff]  }
 0x5dd   : > { %v5003_v24 = vld [vmem:[%s5326_s0 + $0x18] sm:$0xff]  }
 0x5de   : > { %v5575_v30 = vpack.c.bf16 %v5571_v29, %v5571_v29 }
 0x5e0   : > { %4369 = vmatmul.mubr.msk.bf16.vlgmr.msra.gmra.mxu0 %vm708_vm2, %v5575_v30  ;;  %4370 = vmatmul.mubr.msk.bf16.vlgmr.msra.gmra.mxu1 %vm708_vm2, %v5575_v30 }
 0x5e1   : > { %2666 = vmatpush1.bf16.msra.mxu0 %v4357_v10  ;;  %2707 = vmatpush1.bf16.msra.mxu1 %v4359_v11  ;;  %v4990_v10 = vld [vmem:[%s5326_s0 + $0xf0] sm:$0xff]  }
 0x5e2   : > { %2667 = vmatprep.subr.bf16.mxu0 %v4342_v31  ;;  %2708 = vmatprep.subr.bf16.mxu1 %v4344_v32  ;;  %v4992_v11 = vld [vmem:[%s5326_s0 + $0xb0] sm:$0xff]   ;;  %v5009_v31 = vld [vmem:[%s5326_s0 + $0x48] sm:$0xff]  }
 0x5e3   : > { %2685 = vmatprep.mubr.bf16.mxu0 %v5178_v7  ;;  %2726 = vmatprep.mubr.bf16.mxu1 %v5178_v7  ;;  %v5010_v32 = vld [vmem:[%s5326_s0 + $0xc8] sm:$0xff]  }
 0x5e5   : > { %2668 = vmatpush1.bf16.msra.mxu0 %v4341_v37  ;;  %2709 = vmatpush1.bf16.msra.mxu1 %v4343_v38  ;;  %v5015_v37 = vld [vmem:[%s5326_s0] sm:$0xff]  }
 0x5e6   : > { %2747 = vmatprep.subr.bf16.mxu0 %v4362_v40  ;;  %2788 = vmatprep.subr.bf16.mxu1 %v4364_v41  ;;  %v5016_v38 = vld [vmem:[%s5326_s0 + $0x80] sm:$0xff]   ;;  %v5017_v40 = vld [vmem:[%s5326_s0 + $0x178] sm:$0xff]  }
 0x5e7   : > { %v5018_v41 = vld [vmem:[%s5326_s0 + $0x1f8] sm:$0xff]  }
 0x5e8   : > { %4371 = vmatmul.mubr.msk.bf16.vlgmr.msra.gmra.mxu0 %vm708_vm2, %v5575_v30  ;;  %4372 = vmatmul.mubr.msk.bf16.vlgmr.msra.gmra.mxu1 %vm708_vm2, %v5575_v30 }
 0x5e9   : > { %2748 = vmatpush1.bf16.msra.mxu0 %v4361_v47  ;;  %2789 = vmatpush1.bf16.msra.mxu1 %v4363_v39  ;;  %v5660_v47 = vld [vmem:[%s5320_s16] sm:$0xff]  ;;  %v2342_v39 = vsub.s32 3, %v5556_v17 }
 0x5ea   : > { %2749 = vmatprep.subr.bf16.mxu0 %v4346_v48  ;;  %2790 = vmatprep.subr.bf16.mxu1 %v4348_v49  ;;  %v2331_v48 = vrot.slane %v5660_v47, %v5559_v18  ;;  %v2339_v49 = vrot.slane %v5660_v47, %v2338_v46  ;;  %v2335_v44 = vrot.slane %v5660_v47, %v5563_v20 }
 0x5eb   : > { %2767 = vmatprep.mubr.bf16.mxu0 %v5178_v7  ;;  %2808 = vmatprep.mubr.bf16.mxu1 %v5178_v7  ;;  %v2343_v50 = vrot.slane %v5660_v47, %v2342_v39 }
 0x5ed   : > { %2750 = vmatpush1.bf16.msra.mxu0 %v4345_v53  ;;  %2791 = vmatpush1.bf16.msra.mxu1 %v4347_v54 }
 0x5ee   : > { %2829 = vmatprep.subr.bf16.mxu0 %v4366_v55  ;;  %2870 = vmatprep.subr.bf16.mxu1 %v4368_v56 }
 0x5f0   : > { %4373 = vmatmul.mubr.msk.bf16.vlgmr.msra.gmra.mxu0 %vm708_vm2, %v5575_v30  ;;  %4374 = vmatmul.mubr.msk.bf16.vlgmr.msra.gmra.mxu1 %vm708_vm2, %v5575_v30 }
 0x5f1   : > { %2830 = vmatpush1.bf16.msra.mxu0 %v4365_v61  ;;  %2871 = vmatpush1.bf16.msra.mxu1 %v4367_v62 }
 0x5f2   : > { %2831 = vmatprep.subr.bf16.mxu0 %v4350_v63  ;;  %2872 = vmatprep.subr.bf16.mxu1 %v4352_v0 }
 0x5f3   : > { %2849 = vmatprep.mubr.bf16.mxu0 %v5178_v7  ;;  %2890 = vmatprep.mubr.bf16.mxu1 %v5178_v7  ;;  %v4991_v7 = vld [vmem:[%s5326_s0 + $0x30] sm:$0xff]  }
 0x5f5   : > { %2832 = vmatpush1.bf16.msra.mxu0 %v4349_v1  ;;  %2873 = vmatpush1.bf16.msra.mxu1 %v4351_v3 }
 0x5f6   : > { %4572 = vmatprep.subr.bf16.mxu0 %v4985_v4  ;;  %4594 = vmatprep.subr.bf16.mxu1 %v4986_v5 }
 0x5f8   : > { %4375 = vmatmul.mubr.msk.bf16.vlgmr.msra.gmra.mxu0 %vm708_vm2, %v5575_v30  ;;  %4376 = vmatmul.mubr.msk.bf16.vlgmr.msra.gmra.mxu1 %vm708_vm2, %v5575_v30  ;;  %v5008_v30 = vld [vmem:[%s5326_s0 + $0x90] sm:$0xff]  }
 0x5f9   : > { %4573 = vmatpush3.bf16.msra.mxu0 %v4987_v6  ;;  %4595 = vmatpush3.bf16.msra.mxu1 %v4988_v8 }
 0x5fa   : > { %4574 = vmatprep.subr.bf16.mxu0 %v4989_v9  ;;  %4596 = vmatprep.subr.bf16.mxu1 %v4990_v10  ;;  %v2351_v9 = vrot.slane %v5660_v47, %v2350_v59  ;;  %v2359_v10 = vrot.slane %v5660_v47, %v2358_v60 }
 0x5fd   : > { %4575 = vmatpush3.bf16.msra.mxu0 %v4991_v7  ;;  %4597 = vmatpush3.bf16.msra.mxu1 %v4992_v11  ;;  %v5019_v7 = vld [vmem:[%s5326_s0 + $0x138] sm:$0xff]  }
 0x5fe   : > { %4576 = vmatprep.subr.bf16.mxu0 %v4993_v12  ;;  %4598 = vmatprep.subr.bf16.mxu1 %v4994_v13  ;;  %v5020_v11 = vld [vmem:[%s5326_s0 + $0x1b8] sm:$0xff]  }
 0x601   : > { %4577 = vmatpush3.bf16.msra.mxu0 %v4995_v14  ;;  %4599 = vmatpush3.bf16.msra.mxu1 %v4996_v15 }
 0x602   : > { %4578 = vmatprep.subr.bf16.mxu0 %v4997_v16  ;;  %4600 = vmatprep.subr.bf16.mxu1 %v4998_v19  ;;  %v5021_v16 = vld [vmem:[%s5326_s0 + $0x170] sm:$0xff]  }
 0x603   : > { %v5022_v19 = vld [vmem:[%s5326_s0 + $0x1f0] sm:$0xff]  }
 0x605   : > { %4579 = vmatpush3.bf16.msra.mxu0 %v4999_v21  ;;  %4601 = vmatpush3.bf16.msra.mxu1 %v5000_v22 }
 0x606   : > { %4580 = vmatprep.subr.bf16.mxu0 %v5001_v2  ;;  %4602 = vmatprep.subr.bf16.mxu1 %v5002_v23 }
 0x609   : > { %4581 = vmatpush3.bf16.msra.mxu0 %v5003_v24  ;;  %4603 = vmatpush3.bf16.msra.mxu1 %v5004_v25  ;;  %v5023_v24 = vld [vmem:[%s5326_s0 + $0x130] sm:$0xff]  }
 0x60a   : > { %4582 = vmatprep.subr.bf16.mxu0 %v5005_v26  ;;  %4604 = vmatprep.subr.bf16.mxu1 %v5006_v27  ;;  %v5024_v25 = vld [vmem:[%s5326_s0 + $0x1b0] sm:$0xff]  }
 0x60d   : > { %4583 = vmatpush3.bf16.msra.mxu0 %v5007_v28  ;;  %4605 = vmatpush3.bf16.msra.mxu1 %v5008_v30  ;;  %v5025_v28 = vld [vmem:[%s5326_s0 + $0x168] sm:$0xff]  }
 0x60e   : > { %4584 = vmatprep.subr.bf16.mxu0 %v5009_v31  ;;  %4606 = vmatprep.subr.bf16.mxu1 %v5010_v32  ;;  %v5026_v30 = vld [vmem:[%s5326_s0 + $0x1e8] sm:$0xff]  }
 0x611   : > { %4585 = vmatpush3.bf16.msra.mxu0 %v5011_v33  ;;  %4607 = vmatpush3.bf16.msra.mxu1 %v5012_v34 }
 0x612   : > { %4586 = vmatprep.subr.bf16.mxu0 %v5013_v35  ;;  %4608 = vmatprep.subr.bf16.mxu1 %v5014_v36 }
 0x615   : > { %4587 = vmatpush3.bf16.msra.mxu0 %v5015_v37  ;;  %4609 = vmatpush3.bf16.msra.mxu1 %v5016_v38  ;;  %v5027_v37 = vld [vmem:[%s5326_s0 + $0x128] sm:$0xff]  }
 0x616   : > { %4616 = vmatprep.subr.bf16.mxu0 %v5017_v40  ;;  %4638 = vmatprep.subr.bf16.mxu1 %v5018_v41  ;;  %v5028_v38 = vld [vmem:[%s5326_s0 + $0x1a8] sm:$0xff]  }
 0x6a0   : > { %v2605_v51 = vpop.f32.mrf.mxu0  ;;  %v2646_v52 = vpop.f32.mrf.mxu1 }
 0x6a1   : > { %v2606_v53 = vadd.f32 %v2605_v51, %v2331_v48  ;;  %v2647_v54 = vadd.f32 %v2646_v52, %v2339_v49  ;;  %v5029_v48 = vld [vmem:[%s5326_s0 + $0x160] sm:$0xff]   ;;  %v2346_v51 = vsub.s32 4, %v5556_v17 }
 0x6a2   : > { %v2607_v55 = vpop.f32.mrf.mxu0  ;;  %v2648_v56 = vpop.f32.mrf.mxu1  ;;  %v5030_v49 = vld [vmem:[%s5326_s0 + $0x1e0] sm:$0xff]  }
 0x6a3   : > { %v2608_v57 = vadd.f32 %v2607_v55, %v2335_v44  ;;  %v2649_v58 = vadd.f32 %v2648_v56, %v2343_v50  ;;  %v2899_v61 = vmax.f32 %v2606_v53, 0.0  ;;  %v2901_v62 = vmax.f32 %v2647_v54, 0.0  ;;  %v5031_v52 = vld [vmem:[%s5326_s0 + $0x120] sm:$0xff]   ;;  %v5033_v56 = vld [vmem:[%s5326_s0 + $0x158] sm:$0xff]  }
 0x6a4   : > { %v2609_v63 = vpop.f32.mrf.mxu0  ;;  %v2650_v0 = vpop.f32.mrf.mxu1  ;;  %v5032_v53 = vld [vmem:[%s5326_s0 + $0x1a0] sm:$0xff]  }
 0x6a5   : > { %v2900_v1 = vmax.f32 %v2608_v57, 0.0  ;;  %v2902_v3 = vmax.f32 %v2649_v58, 0.0  ;;  %v2915_v12 = vpack.c.bf16 %v2899_v61, %v2899_v61  ;;  %v2917_v13 = vpack.c.bf16 %v2901_v62, %v2901_v62  ;;  %v5034_v57 = vld [vmem:[%s5326_s0 + $0x1d8] sm:$0xff]  }
 0x6a6   : > { %v2610_v4 = vpop.f32.mrf.mxu0  ;;  %v2651_v5 = vpop.f32.mrf.mxu1  ;;  %v2379_v58 = vrot.slane %v5651_v43, %v2346_v51  ;;  %v5035_v63 = vld [vmem:[%s5326_s0 + $0x118] sm:$0xff]  }
 0x6a7   : > { %v2916_v6 = vpack.c.bf16 %v2900_v1, %v2900_v1  ;;  %v2918_v8 = vpack.c.bf16 %v2902_v3, %v2902_v3  ;;  %v5036_v0 = vld [vmem:[%s5326_s0 + $0x198] sm:$0xff]   ;;  %v5037_v4 = vld [vmem:[%s5326_s0 + $0x150] sm:$0xff]  }
 0x6a8   : > { %v5683_v14 = vpop.f32.mrf.mxu0  ;;  %v5685_v15 = vpop.f32.mrf.mxu1  ;;  %v5038_v5 = vld [vmem:[%s5326_s0 + $0x1d0] sm:$0xff]  }
 0x6a9   : > { %3737 = vmatprep.mubr.bf16.mxu0 %v2916_v6  ;;  %3777 = vmatprep.mubr.bf16.mxu1 %v2918_v8 }
 0x6aa   : > { %v2689_v21 = vpop.f32.mrf.mxu0  ;;  %v2730_v22 = vpop.f32.mrf.mxu1  ;;  %3738 = vmatmul.mubr.bf16.vlgmr.msra.gmra.mxu0 %v2915_v12  ;;  %3778 = vmatmul.mubr.bf16.vlgmr.msra.gmra.mxu1 %v2917_v13  ;;  %v2347_v12 = vrot.slane %v5660_v47, %v2346_v51  ;;  %v2355_v13 = vrot.slane %v5660_v47, %v2354_v42  ;;  %v5043_v42 = vld [vmem:[%s5326_s0 + $0x108] sm:$0xff]   ;;  %v5054_v51 = vld [vmem:[%s5326_s0 + $0x2f0] sm:$0xff]  }
 0x6ab   : > { %v2690_v2 = vadd.f32 %v2689_v21, %v2351_v9  ;;  %v2731_v23 = vadd.f32 %v2730_v22, %v2359_v10  ;;  %4617 = vmatpush3.bf16.msra.mxu0 %v5019_v7  ;;  %4639 = vmatpush3.bf16.msra.mxu1 %v5020_v11  ;;  %v5039_v7 = vld [vmem:[%s5326_s0 + $0x110] sm:$0xff]   ;;  %v5042_v21 = vld [vmem:[%s5326_s0 + $0x1c8] sm:$0xff]   ;;  %v2367_v22 = vrot.slane %v5651_v43, %v5563_v20 }
 0x6ac   : > { %v2691_v26 = vpop.f32.mrf.mxu0  ;;  %v2732_v27 = vpop.f32.mrf.mxu1  ;;  %4618 = vmatprep.subr.bf16.mxu0 %v5021_v16  ;;  %4640 = vmatprep.subr.bf16.mxu1 %v5022_v19  ;;  %v5040_v11 = vld [vmem:[%s5326_s0 + $0x190] sm:$0xff]   ;;  %v5044_v47 = vld [vmem:[%s5326_s0 + $0x188] sm:$0xff]  }
 0x6ad   : > { %v2904_v31 = vmax.f32 %v2690_v2, 0.0  ;;  %v2906_v32 = vmax.f32 %v2731_v23, 0.0  ;;  %v2375_v2 = vrot.slane %v5651_v43, %v2342_v39  ;;  %v2729_v26 = vadd.f32 %v5685_v15, %v2355_v13  ;;  %v5045_v27 = vld [vmem:[%s5326_s0 + $0x140] sm:$0xff]   ;;  %v5050_v15 = vld [vmem:[%s5326_s0 + $0x2f8] sm:$0xff]  }
 0x6ae   : > { %v2692_v33 = vpop.f32.mrf.mxu0  ;;  %v2733_v34 = vpop.f32.mrf.mxu1  ;;  %v2363_v13 = vrot.slane %v5651_v43, %v5559_v18 }
 0x6af   : > { %v2920_v35 = vpack.c.bf16 %v2904_v31, %v2904_v31  ;;  %v2922_v36 = vpack.c.bf16 %v2906_v32, %v2906_v32  ;;  %4619 = vmatpush3.bf16.msra.mxu0 %v5023_v24  ;;  %4641 = vmatpush3.bf16.msra.mxu1 %v5024_v25  ;;  %v2688_v25 = vadd.f32 %v5683_v14, %v2347_v12  ;;  %v5047_v31 = vld [vmem:[%s5326_s0 + $0x100] sm:$0xff]   ;;  %v2905_v34 = vmax.f32 %v2729_v26, 0.0  ;;  %v5049_v14 = vld [vmem:[%s5326_s0 + $0x278] sm:$0xff]   ;;  %v5071_v12 = vld [vmem:[%s5326_s0 + $0x210] sm:$0xff]  }
 0x6b0   : > { %v5695_v40 = vpop.f32.mrf.mxu0  ;;  %v5697_v41 = vpop.f32.mrf.mxu1  ;;  %4620 = vmatprep.subr.bf16.mxu0 %v5025_v28  ;;  %4642 = vmatprep.subr.bf16.mxu1 %v5026_v30  ;;  %v5046_v28 = vld [vmem:[%s5326_s0 + $0x1c0] sm:$0xff]   ;;  %v5081_v26 = vld [vmem:[%s5326_s0 + $0x378] sm:$0xff]  }
 0x6b1   : > { %3817 = vmatprep.mubr.bf16.mxu0 %v2920_v35  ;;  %3857 = vmatprep.mubr.bf16.mxu1 %v2922_v36  ;;  %v5048_v32 = vld [vmem:[%s5326_s0 + $0x180] sm:$0xff]   ;;  %v2903_v33 = vmax.f32 %v2688_v25, 0.0 }
 0x6b2   : > { %v2771_v44 = vpop.f32.mrf.mxu0  ;;  %v2812_v50 = vpop.f32.mrf.mxu1  ;;  %v5078_v25 = vld [vmem:[%s5326_s0 + $0x2c0] sm:$0xff]  }
 0x6b3   : > { %4621 = vmatpush3.bf16.msra.mxu0 %v5027_v37  ;;  %4643 = vmatpush3.bf16.msra.mxu1 %v5028_v38  ;;  %v2772_v30 = vadd.f32 %v2771_v44, %v2367_v22  ;;  %v2813_v39 = vadd.f32 %v2812_v50, %v2375_v2  ;;  %v5051_v37 = vld [vmem:[%s5326_s0 + $0x238] sm:$0xff]   ;;  %v2919_v38 = vpack.c.bf16 %v2903_v33, %v2903_v33  ;;  %v5053_v50 = vld [vmem:[%s5326_s0 + $0x270] sm:$0xff]  }
 0x6b4   : > { %v2773_v54 = vpop.f32.mrf.mxu0  ;;  %v2814_v55 = vpop.f32.mrf.mxu1  ;;  %4622 = vmatprep.subr.bf16.mxu0 %v5029_v48  ;;  %4644 = vmatprep.subr.bf16.mxu1 %v5030_v49  ;;  %v2921_v48 = vpack.c.bf16 %v2905_v34, %v2905_v34  ;;  %v5052_v49 = vld [vmem:[%s5326_s0 + $0x2b8] sm:$0xff]   ;;  %v2383_v22 = vrot.slane %v5651_v43, %v2350_v59  ;;  %v2391_v2 = vrot.slane %v5651_v43, %v2358_v60  ;;  %v5079_v59 = vld [vmem:[%s5326_s0 + $0x200] sm:$0xff]   ;;  %v5086_v34 = vld [vmem:[%s5326_s0 + $0x3f0] sm:$0xff]  }
 0x6b5   : > { %v2908_v35 = vmax.f32 %v2772_v30, 0.0  ;;  %v2910_v36 = vmax.f32 %v2813_v39, 0.0  ;;  %v5056_v54 = vld [vmem:[%s5326_s0 + $0x2b0] sm:$0xff]   ;;  %v5057_v55 = vld [vmem:[%s5326_s0 + $0x268] sm:$0xff]  }
 0x6b6   : > { %v2774_v61 = vpop.f32.mrf.mxu0  ;;  %v2815_v62 = vpop.f32.mrf.mxu1 }
 0x6b7   : > { %4623 = vmatpush3.bf16.msra.mxu0 %v5031_v52  ;;  %4645 = vmatpush3.bf16.msra.mxu1 %v5032_v53  ;;  %v2924_v44 = vpack.c.bf16 %v2908_v35, %v2908_v35  ;;  %v2926_v52 = vpack.c.bf16 %v2910_v36, %v2910_v36  ;;  %v5055_v53 = vld [vmem:[%s5326_s0 + $0x230] sm:$0xff]   ;;  %v5061_v61 = vld [vmem:[%s5326_s0 + $0x260] sm:$0xff]   ;;  %v5089_v36 = vld [vmem:[%s5326_s0 + $0x368] sm:$0xff]  }
 0x6b8   : > { %v2851_v1 = vpop.f32.mrf.mxu0  ;;  %v2892_v3 = vpop.f32.mrf.mxu1  ;;  %4624 = vmatprep.subr.bf16.mxu0 %v5033_v56  ;;  %4646 = vmatprep.subr.bf16.mxu1 %v5034_v57  ;;  %v5058_v56 = vld [vmem:[%s5326_s0 + $0x2e8] sm:$0xff]   ;;  %v5062_v62 = vld [vmem:[%s5326_s0 + $0x2e0] sm:$0xff]   ;;  %v5088_v35 = vld [vmem:[%s5326_s0 + $0x3b0] sm:$0xff]  }
 0x6b9   : > { %v5711_v6 = vadd.f32 %v2851_v1, %v2379_v58  ;;  %v5714_v8 = vadd.f32 %v2892_v3, %v5656_v45  ;;  %v5041_v45 = vld [vmem:[%s5326_s0 + $0x148] sm:$0xff]   ;;  %v5065_v1 = vld [vmem:[%s5326_s0 + $0x258] sm:$0xff]  }
 0x6ba   : > { %v5716_v9 = vpop.f32.mrf.mxu0  ;;  %v5718_v10 = vpop.f32.mrf.mxu1  ;;  %v5059_v57 = vld [vmem:[%s5326_s0 + $0x228] sm:$0xff]   ;;  %v5066_v3 = vld [vmem:[%s5326_s0 + $0x2d8] sm:$0xff]  }
 0x6bb   : > { %4625 = vmatpush3.bf16.msra.mxu0 %v5035_v63  ;;  %4647 = vmatpush3.bf16.msra.mxu1 %v5036_v0  ;;  %v5060_v58 = vld [vmem:[%s5326_s0 + $0x2a8] sm:$0xff]   ;;  %v5063_v63 = vld [vmem:[%s5326_s0 + $0x220] sm:$0xff]   ;;  %v2854_v17 = vadd.f32 %v5716_v9, %v2383_v22  ;;  %v5083_v9 = vld [vmem:[%s5326_s0 + $0x338] sm:$0xff]  }
 0x6bc   : > { %v2855_v16 = vpop.f32.mrf.mxu0  ;;  %v2896_v19 = vpop.f32.mrf.mxu1  ;;  %4626 = vmatprep.subr.bf16.mxu0 %v5037_v4  ;;  %4648 = vmatprep.subr.bf16.mxu1 %v5038_v5  ;;  %v5064_v0 = vld [vmem:[%s5326_s0 + $0x2a0] sm:$0xff]   ;;  %v5067_v4 = vld [vmem:[%s5326_s0 + $0x218] sm:$0xff]  }
 0x6bd   : > { %v5068_v5 = vld [vmem:[%s5326_s0 + $0x298] sm:$0xff]   ;;  %v5072_v16 = vld [vmem:[%s5326_s0 + $0x290] sm:$0xff]   ;;  %v5073_v19 = vld [vmem:[%s5326_s0 + $0x248] sm:$0xff]  }
 0x6be   : > { %v2856_v23 = vpop.f32.mrf.mxu0  ;;  %v2897_v24 = vpop.f32.mrf.mxu1 }
 0x6bf   : > { %4627 = vmatpush3.bf16.msra.mxu0 %v5039_v7  ;;  %4649 = vmatpush3.bf16.msra.mxu1 %v5040_v11  ;;  %v5069_v7 = vld [vmem:[%s5326_s0 + $0x250] sm:$0xff]   ;;  %v5075_v23 = vld [vmem:[%s5326_s0 + $0x208] sm:$0xff]   ;;  %v2770_v24 = vadd.f32 %v5695_v40, %v2363_v13  ;;  %v5080_v40 = vld [vmem:[%s5326_s0 + $0x280] sm:$0xff]  }
 0x6c0   : > { %4628 = vmatprep.subr.bf16.mxu0 %v5041_v45  ;;  %4650 = vmatprep.subr.bf16.mxu1 %v5042_v21  ;;  %v5070_v11 = vld [vmem:[%s5326_s0 + $0x2d0] sm:$0xff]   ;;  %v2371_v45 = vrot.slane %v5651_v43, %v2338_v46  ;;  %v5074_v21 = vld [vmem:[%s5326_s0 + $0x2c8] sm:$0xff]   ;;  %v2895_v43 = vadd.f32 %v5718_v10, %v2391_v2  ;;  %v5084_v10 = vld [vmem:[%s5326_s0 + $0x3b8] sm:$0xff]  }
 0x6c1   : > { %v5076_v46 = vld [vmem:[%s5326_s0 + $0x288] sm:$0xff]   ;;  %v2907_v60 = vmax.f32 %v2770_v24, 0.0 }
 0x6c2   : > { %v2914_v30 = vmax.f32 %v2895_v43, 0.0 }
 0x6c3   : > { %4629 = vmatpush3.bf16.msra.mxu0 %v5043_v42  ;;  %4651 = vmatpush3.bf16.msra.mxu1 %v5044_v47  ;;  %v5077_v42 = vld [vmem:[%s5326_s0 + $0x240] sm:$0xff]   ;;  %v2811_v47 = vadd.f32 %v5697_v41, %v2371_v45  ;;  %v5082_v41 = vld [vmem:[%s5326_s0 + $0x3f8] sm:$0xff]   ;;  %v2923_v39 = vpack.c.bf16 %v2907_v60, %v2907_v60 }
 0x6c4   : > { %4630 = vmatprep.subr.bf16.mxu0 %v5045_v27  ;;  %4652 = vmatprep.subr.bf16.mxu1 %v5046_v28  ;;  %v2912_v28 = vmax.f32 %v2854_v17, 0.0 }
 0x6c5   : > { %v2909_v27 = vmax.f32 %v2811_v47, 0.0 }
 0x6c6   : > { %v2928_v33 = vpack.c.bf16 %v2912_v28, %v2912_v28 }
 0x6c7   : > { %4631 = vmatpush3.bf16.msra.mxu0 %v5047_v31  ;;  %4653 = vmatpush3.bf16.msra.mxu1 %v5048_v32  ;;  %v2925_v31 = vpack.c.bf16 %v2909_v27, %v2909_v27  ;;  %v5085_v32 = vld [vmem:[%s5326_s0 + $0x370] sm:$0xff]  }
 0x6c8   : > { %4660 = vmatprep.subr.bf16.mxu0 %v5049_v14  ;;  %4682 = vmatprep.subr.bf16.mxu1 %v5050_v15  ;;  %v2930_v14 = vpack.c.bf16 %v2914_v30, %v2914_v30  ;;  %v5087_v15 = vld [vmem:[%s5326_s0 + $0x330] sm:$0xff]  }
 0x6ca   : > { %3818 = vmatmul.mubr.bf16.vlgmr.msra.gmra.mxu0 %v2919_v38  ;;  %3858 = vmatmul.mubr.bf16.vlgmr.msra.gmra.mxu1 %v2921_v48  ;;  %v5091_v38 = vld [vmem:[%s5326_s0 + $0x328] sm:$0xff]  }
 0x6cb   : > { %4661 = vmatpush3.bf16.msra.mxu0 %v5051_v37  ;;  %3897 = vmatprep.mubr.bf16.mxu0 %v2924_v44  ;;  %v5090_v37 = vld [vmem:[%s5326_s0 + $0x3e8] sm:$0xff]   ;;  %v5094_v44 = vld [vmem:[%s5326_s0 + $0x3e0] sm:$0xff]  }
 0x6cc   : > { %4683 = vmatpush3.bf16.msra.mxu1 %v5052_v49  ;;  %3937 = vmatprep.mubr.bf16.mxu1 %v2926_v52  ;;  %v5092_v48 = vld [vmem:[%s5326_s0 + $0x3a8] sm:$0xff]   ;;  %v5093_v49 = vld [vmem:[%s5326_s0 + $0x360] sm:$0xff]   ;;  %v5097_v52 = vld [vmem:[%s5326_s0 + $0x358] sm:$0xff]  }
 0x6cd   : > { %4662 = vmatprep.subr.bf16.mxu0 %v5053_v50  ;;  %4684 = vmatprep.subr.bf16.mxu1 %v5054_v51  ;;  %v5095_v50 = vld [vmem:[%s5326_s0 + $0x320] sm:$0xff]  }
 0x6ce   : > { %v5096_v51 = vld [vmem:[%s5326_s0 + $0x3a0] sm:$0xff]  }
 0x6cf   : > { %4663 = vmatpush3.bf16.msra.mxu0 %v5055_v53  ;;  %v5098_v53 = vld [vmem:[%s5326_s0 + $0x3d8] sm:$0xff]  }
 0x6d0   : > { %4685 = vmatpush3.bf16.msra.mxu1 %v5056_v54  ;;  %4664 = vmatprep.subr.bf16.mxu0 %v5057_v55  ;;  %v5099_v54 = vld [vmem:[%s5326_s0 + $0x318] sm:$0xff]  }
 0x6d1   : > { %4686 = vmatprep.subr.bf16.mxu1 %v5058_v56  ;;  %v5100_v55 = vld [vmem:[%s5326_s0 + $0x398] sm:$0xff]   ;;  %v5101_v56 = vld [vmem:[%s5326_s0 + $0x350] sm:$0xff]  }
 0x6d3   : > { %4665 = vmatpush3.bf16.msra.mxu0 %v5059_v57  ;;  %v5102_v57 = vld [vmem:[%s5326_s0 + $0x3d0] sm:$0xff]  }
 0x6d4   : > { %4687 = vmatpush3.bf16.msra.mxu1 %v5060_v58  ;;  %4666 = vmatprep.subr.bf16.mxu0 %v5061_v61  ;;  %v5103_v58 = vld [vmem:[%s5326_s0 + $0x310] sm:$0xff]  }
 0x6d5   : > { %4688 = vmatprep.subr.bf16.mxu1 %v5062_v62  ;;  %v5104_v61 = vld [vmem:[%s5326_s0 + $0x390] sm:$0xff]   ;;  %v5105_v62 = vld [vmem:[%s5326_s0 + $0x348] sm:$0xff]  }
 0x6d7   : > { %4667 = vmatpush3.bf16.msra.mxu0 %v5063_v63  ;;  %v5106_v63 = vld [vmem:[%s5326_s0 + $0x3c8] sm:$0xff]  }
 0x6d8   : > { %4689 = vmatpush3.bf16.msra.mxu1 %v5064_v0  ;;  %4668 = vmatprep.subr.bf16.mxu0 %v5065_v1  ;;  %v5107_v0 = vld [vmem:[%s5326_s0 + $0x308] sm:$0xff]  }
 0x6d9   : > { %4690 = vmatprep.subr.bf16.mxu1 %v5066_v3  ;;  %v5108_v1 = vld [vmem:[%s5326_s0 + $0x388] sm:$0xff]   ;;  %v5109_v3 = vld [vmem:[%s5326_s0 + $0x340] sm:$0xff]  }
 0x6db   : > { %4669 = vmatpush3.bf16.msra.mxu0 %v5067_v4  ;;  %v5110_v4 = vld [vmem:[%s5326_s0 + $0x3c0] sm:$0xff]  }
 0x6dc   : > { %4691 = vmatpush3.bf16.msra.mxu1 %v5068_v5  ;;  %4670 = vmatprep.subr.bf16.mxu0 %v5069_v7  ;;  %v5111_v5 = vld [vmem:[%s5326_s0 + $0x300] sm:$0xff]   ;;  %v2911_v7 = vmax.f32 %v5711_v6, 0.0 }
 0x6dd   : > { %4692 = vmatprep.subr.bf16.mxu1 %v5070_v11  ;;  %v5112_v11 = vld [vmem:[%s5326_s0 + $0x380] sm:$0xff]   ;;  %s5897_s0 = sld [smem:[#allocation3_spill]] }
 0x6de   : > { %v2927_v13 = vpack.c.bf16 %v2911_v7, %v2911_v7 }
 0x6df   : > { %4671 = vmatpush3.bf16.msra.mxu0 %v5071_v12  ;;  %v2913_v12 = vmax.f32 %v5714_v8, 0.0 }
 0x6e0   : > { %4693 = vmatpush3.bf16.msra.mxu1 %v5072_v16  ;;  %4672 = vmatprep.subr.bf16.mxu0 %v5073_v19 }
 0x6e1   : > { %4694 = vmatprep.subr.bf16.mxu1 %v5074_v21  ;;  %v2929_v16 = vpack.c.bf16 %v2913_v12, %v2913_v12  ;;  %v4377_v21 = vld [vmem:[%s588_s18] ss:$0 sm:$0xff] }
 0x6e3   : > { %4673 = vmatpush3.bf16.msra.mxu0 %v5075_v23  ;;  %p4506_p8 = scmp.ne.s32.totalorder %s5897_s0, 1 }
 0x6e4   : > { %4695 = vmatpush3.bf16.msra.mxu1 %v5076_v46  ;;  %4674 = vmatprep.subr.bf16.mxu0 %v5077_v42  ;;  %s5898_s29 = sld [smem:[#allocation14_spill]] (!%p4506_p8) }
 0x6e5   : > { %4696 = vmatprep.subr.bf16.mxu1 %v5078_v25 }
 0x6e7   : > { %4675 = vmatpush3.bf16.msra.mxu0 %v5079_v59 }
 0x6e8   : > { %4697 = vmatpush3.bf16.msra.mxu1 %v5080_v40  ;;  %4704 = vmatprep.subr.bf16.mxu0 %v5081_v26 }
 0x6e9   : > { %4726 = vmatprep.subr.bf16.mxu1 %v5082_v41 }
 0x6ea   : > { %3898 = vmatmul.mubr.bf16.vlgmr.msra.gmra.mxu0 %v2923_v39 }
 0x6eb   : > { %3938 = vmatmul.mubr.bf16.vlgmr.msra.gmra.mxu1 %v2925_v31  ;;  %4705 = vmatpush3.bf16.msra.mxu0 %v5083_v9 }
 0x6ec   : > { %3977 = vmatprep.mubr.bf16.mxu0 %v2928_v33  ;;  %4727 = vmatpush3.bf16.msra.mxu1 %v5084_v10 }
 0x6ed   : > { %4017 = vmatprep.mubr.bf16.mxu1 %v2930_v14  ;;  %4706 = vmatprep.subr.bf16.mxu0 %v5085_v32 }
 0x6ee   : > { %4728 = vmatprep.subr.bf16.mxu1 %v5086_v34 }
 0x6ef   : > { %4707 = vmatpush3.bf16.msra.mxu0 %v5087_v15 }
 0x6f0   : > { %4729 = vmatpush3.bf16.msra.mxu1 %v5088_v35  ;;  %4708 = vmatprep.subr.bf16.mxu0 %v5089_v36 }
 0x6f1   : > { %4730 = vmatprep.subr.bf16.mxu1 %v5090_v37 }
 0x6f3   : > { %4709 = vmatpush3.bf16.msra.mxu0 %v5091_v38 }
 0x6f4   : > { %4731 = vmatpush3.bf16.msra.mxu1 %v5092_v48  ;;  %4710 = vmatprep.subr.bf16.mxu0 %v5093_v49 }
 0x6f5   : > { %4732 = vmatprep.subr.bf16.mxu1 %v5094_v44 }
 0x6f7   : > { %4711 = vmatpush3.bf16.msra.mxu0 %v5095_v50 }
 0x6f8   : > { %4733 = vmatpush3.bf16.msra.mxu1 %v5096_v51  ;;  %4712 = vmatprep.subr.bf16.mxu0 %v5097_v52 }
 0x6f9   : > { %4734 = vmatprep.subr.bf16.mxu1 %v5098_v53 }
 0x6fb   : > { %4713 = vmatpush3.bf16.msra.mxu0 %v5099_v54 }
 0x6fc   : > { %4735 = vmatpush3.bf16.msra.mxu1 %v5100_v55  ;;  %4714 = vmatprep.subr.bf16.mxu0 %v5101_v56 }
 0x6fd   : > { %4736 = vmatprep.subr.bf16.mxu1 %v5102_v57 }
 0x6ff   : > { %4715 = vmatpush3.bf16.msra.mxu0 %v5103_v58 }
 0x700   : > { %4737 = vmatpush3.bf16.msra.mxu1 %v5104_v61  ;;  %4716 = vmatprep.subr.bf16.mxu0 %v5105_v62 }
 0x701   : > { %4738 = vmatprep.subr.bf16.mxu1 %v5106_v63 }
 0x703   : > { %4717 = vmatpush3.bf16.msra.mxu0 %v5107_v0 }
 0x704   : > { %4739 = vmatpush3.bf16.msra.mxu1 %v5108_v1  ;;  %4718 = vmatprep.subr.bf16.mxu0 %v5109_v3 }
 0x705   : > { %4740 = vmatprep.subr.bf16.mxu1 %v5110_v4 }
 0x707   : > { %4719 = vmatpush3.bf16.msra.mxu0 %v5111_v5 }
 0x708   : > { %4741 = vmatpush3.bf16.msra.mxu1 %v5112_v11 }
 0x70a   : > { %3978 = vmatmul.mubr.bf16.vlgmr.msra.gmra.mxu0 %v2927_v13  ;;  %v4026_v13 = vld [vmem:[%s5335_s21] sm:$0x3] }
 0x70b   : > { %4018 = vmatmul.mubr.bf16.vlgmr.msra.gmra.mxu1 %v2929_v16  ;;  %v4043_v16 = vrot.slane %v4026_v13, %v5559_v18 }
 0x76a   : > { %v4588_v19 = vpop.f32.mrf.mxu0  ;;  %v4610_v45 = vpop.f32.mrf.mxu1 }
 0x76c   : > { %v4589_v6 = vpop.f32.mrf.mxu0  ;;  %v4611_v22 = vpop.f32.mrf.mxu1 }
 0x76d   : > { %v4590_v2 = vadd.f32 %v4589_v6, %v4588_v19  ;;  %v4612_v23 = vadd.f32 %v4611_v22, %v4610_v45 }
 0x76e   : > { %v4591_v24 = vpop.f32.mrf.mxu0  ;;  %v4613_v8 = vpop.f32.mrf.mxu1 }
 0x76f   : > { %v3740_v46 = vadd.f32 %v4590_v2, %v4377_v21 }
 0x770   : > { %v4592_v42 = vpop.f32.mrf.mxu0  ;;  %v4614_v47 = vpop.f32.mrf.mxu1 }
 0x771   : > { %v3780_v25 = vadd.f32 %v4612_v23, %v3740_v46 }
 0x78a   : > { %v4632_v17 = vpop.f32.mrf.mxu0  ;;  %v4654_v43 = vpop.f32.mrf.mxu1 }
 0x78c   : > { %v4633_v59 = vpop.f32.mrf.mxu0  ;;  %v4655_v60 = vpop.f32.mrf.mxu1 }
 0x78d   : > { %v4634_v34 = vadd.f32 %v4633_v59, %v4632_v17  ;;  %v4656_v15 = vadd.f32 %v4655_v60, %v4654_v43 }
 0x78e   : > { %v4635_v40 = vpop.f32.mrf.mxu0  ;;  %v4657_v26 = vpop.f32.mrf.mxu1 }
 0x78f   : > { %v3820_v14 = vadd.f32 %v4634_v34, %v3780_v25 }
 0x790   : > { %v4636_v27 = vpop.f32.mrf.mxu0  ;;  %v4658_v41 = vpop.f32.mrf.mxu1 }
 0x791   : > { %v3860_v36 = vadd.f32 %v4656_v15, %v3820_v14 }
 0x7aa   : > { %v4676_v28 = vpop.f32.mrf.mxu0 }
 0x7ab   : > { %v4698_v30 = vpop.f32.mrf.mxu1 }
 0x7ac   : > { %v4677_v9 = vpop.f32.mrf.mxu0 }
 0x7ad   : > { %v4699_v39 = vpop.f32.mrf.mxu1  ;;  %v4678_v35 = vadd.f32 %v4677_v9, %v4676_v28 }
 0x7ae   : > { %v4679_v10 = vpop.f32.mrf.mxu0  ;;  %v4700_v48 = vadd.f32 %v4699_v39, %v4698_v30 }
 0x7af   : > { %v4701_v31 = vpop.f32.mrf.mxu1  ;;  %v3900_v37 = vadd.f32 %v4678_v35, %v3860_v36 }
 0x7b0   : > { %v4680_v32 = vpop.f32.mrf.mxu0 }
 0x7b1   : > { %v4702_v33 = vpop.f32.mrf.mxu1  ;;  %v3940_v50 = vadd.f32 %v4700_v48, %v3900_v37 }
 0x7ca   : > { %v4720_v38 = vpop.f32.mrf.mxu0 }
 0x7cb   : > { %v4742_v49 = vpop.f32.mrf.mxu1 }
 0x7cc   : > { %v4721_v44 = vpop.f32.mrf.mxu0 }
 0x7cd   : > { %v4722_v51 = vadd.f32 %v4721_v44, %v4720_v38  ;;  %v4743_v52 = vpop.f32.mrf.mxu1 }
 0x7ce   : > { %v4723_v53 = vpop.f32.mrf.mxu0  ;;  %v4744_v55 = vadd.f32 %v4743_v52, %v4742_v49 }
 0x7cf   : > { %v3980_v54 = vadd.f32 %v4722_v51, %v3940_v50  ;;  %v4745_v56 = vpop.f32.mrf.mxu1 }
 0x7d0   : > { %v4724_v57 = vpop.f32.mrf.mxu0 }
 0x7d1   : > { %v4020_v58 = vadd.f32 %v4744_v55, %v3980_v54  ;;  %v4746_v61 = vpop.f32.mrf.mxu1 }
 0x7d3   : > { %v4025_v62 = vadd.f32 %v4020_v58, %v5571_v29  ;;  %v4048_v29 = vrot.slane %v4026_v13, %v5563_v20 }
 0x7d5   : > { %v4027_v63 = vsel %vm708_vm2, %v4025_v62, 0.0 }
 0x7d6   : > { %4028 = vadd.xlane.f32.xlu0 %v4027_v63 }
 0x85f   : > { %v4029_v0 = vpop.xlane.xlu0 %4028 }
 0x860   : > { %v4030_v1 = vmul.f32 0.03125, %v4029_v0 }
 0x862   : > { %v4031_v3 = vsub.f32 %v4025_v62, %v4030_v1 }
 0x864   : > { %v4032_v4 = vmul.f32 %v4031_v3, %v4031_v3 }
 0x866   : > { %v4033_v5 = vsel %vm708_vm2, %v4032_v4, 0.0 }
 0x867   : > { %4034 = vadd.xlane.f32.xlu1 %v4033_v5 }
 0x8f0   : > { %v4035_v7 = vpop.xlane.xlu1 %4034 }
 0x8f1   : > { %v4036_v11 = vmul.f32 0.03125, %v4035_v7 }
 0x8f3   : > { %v4037_v12 = vadd.f32 1e-05, %v4036_v11 }
 0x8f5   : > { %5131 = vrsqrt.f32 %v4037_v12 }
 0x902   : > { %v5132_v19 = vpop.eup %5131 }
 0x903   : > { %v4039_v45 = vmul.f32 %v5132_v19, %v4031_v3 }
 0x905   : > { %v4044_v21 = vmul.f32 %v4043_v16, %v4039_v45  ;;  %4054 = sbr.rel (%p4506_p8) target bundleno = 2623 (0xa3f), region = 76 }
 0x907   : > { %v4049_v6 = vadd.f32 %v4048_v29, %v4044_v21 }
 0x909   : > { %4050 = vst.msk [vmem:[#allocation2] sm:$0xff] %vm708_vm2, %v4049_v6 }
 0x90a   : > { %v4056_v22 = vsel %vm708_vm2, %v4049_v6, 0.0  ;;  %v4055_v17 = vld [vmem:[%s5898_s29] sm:$0x3] }
 0x90b   : > { %4057 = vadd.xlane.f32.xlu0 %v4056_v22  ;;  %v4072_v43 = vrot.slane %v4055_v17, %v5559_v18  ;;  %v4077_v40 = vrot.slane %v4055_v17, %v5563_v20 }
 0x994   : > { %v4058_v2 = vpop.xlane.xlu0 %4057 }
 0x995   : > { %v4059_v23 = vmul.f32 0.03125, %v4058_v2 }
 0x997   : > { %v4060_v24 = vsub.f32 %v4049_v6, %v4059_v23 }
 0x999   : > { %v4061_v8 = vmul.f32 %v4060_v24, %v4060_v24 }
 0x99b   : > { %v4062_v46 = vsel %vm708_vm2, %v4061_v8, 0.0 }
 0x99c   : > { %4063 = vadd.xlane.f32.xlu0 %v4062_v46 }
 0xa25   : > { %v4064_v42 = vpop.xlane.xlu0 %4063 }
 0xa26   : > { %v4065_v47 = vmul.f32 0.03125, %v4064_v42 }
 0xa28   : > { %v4066_v25 = vadd.f32 1e-05, %v4065_v47 }
 0xa2a   : > { %5134 = vrsqrt.f32 %v4066_v25 }
 0xa37   : > { %v5135_v59 = vpop.eup %5134 }
 0xa38   : > { %v4068_v60 = vmul.f32 %v5135_v59, %v4060_v24 }
 0xa3a   : > { %v4073_v26 = vmul.f32 %v4072_v43, %v4068_v60 }
 0xa3c   : > { %v4078_v27 = vadd.f32 %v4077_v40, %v4073_v26 }
 0xa3e   : > { %4079 = vst.msk [vmem:[%s5340_s17] sm:$0xff] %vm708_vm2, %v4078_v27 }
 0xa3f PF: > { %s5899_s14 = sld [smem:[#allocation6_spill]] }
 0xa40   : > { %s5900_s21 = sld [smem:[#allocation4_spill]] }
 0xa41   : > { %s5901_s22 = sld [smem:[#allocation5_spill]] }
 0xa42   : > { %s5902_s23 = sld [smem:[#allocation7_spill]] }
 0xa43   : > { %s5903_s24 = sld [smem:[#allocation8_spill]] }
 0xa45   : > { %s22_s25 = sadd.s32 1, %s5899_s14  }
 0xa46   : > { %p19_p9 = scmp.ge.s32.totalorder %s22_s25, 6  }
 0xa48   :  { %21 = sbr.rel (!%p19_p9) target bundleno = 8 (0x8), region = 136 }

// kernel: text_transformer_forward.3
= control target key start
LH: loop header
LB: loop body
LE: loop exit
PB: predicated region body
PF: predicated region fallthrough
CT: control target
= control target key end

     0   :  { %s7530_s22 = smov 0   ;;  %s7532_s23 = smov 0   ;;  %s8395_s0 = inlined_call_operand.vmem [shape: f32[2,8,32], index: 0, kind: input, shape index: {}]   ;;  %s8396_s1 = inlined_call_operand.vmem [shape: f32[2,8,32], index: 1, kind: input, shape index: {}]   ;;  %s8397_s2 = inlined_call_operand.vmem [shape: bf16[2,12,32,8], index: 2, kind: input, shape index: {}]   ;;  %s8398_s3 = inlined_call_operand.vmem [shape: f32[2,12,1,8], index: 3, kind: input, shape index: {}]   ;;  %s8399_s4 = inlined_call_operand.vmem [shape: bf16[2,4,8,32], index: 4, kind: input, shape index: {}]   ;;  %s8400_s5 = inlined_call_operand.vmem [shape: f32[2,1,32], index: 5, kind: input, shape index: {}]   ;;  %s8401_s6 = inlined_call_operand.vmem [shape: f32[2,2,32], index: 6, kind: input, shape index: {}]   ;;  %s8402_s7 = inlined_call_operand.vmem [shape: bf16[2,12,32,8], index: 7, kind: input, shape index: {}]   ;;  %s8403_s8 = inlined_call_operand.vmem [shape: f32[2,12,1,8], index: 8, kind: input, shape index: {}]   ;;  %s8404_s9 = inlined_call_operand.vmem [shape: bf16[2,4,8,32], index: 9, kind: input, shape index: {}]   ;;  %s8405_s10 = inlined_call_operand.vmem [shape: f32[2,1,32], index: 10, kind: input, shape index: {}]   ;;  %s8406_s11 = inlined_call_operand.vmem [shape: f32[2,2,32], index: 11, kind: input, shape index: {}]   ;;  %s8407_s12 = inlined_call_operand.vmem [shape: bf16[2,32,2048], index: 12, kind: input, shape index: {}]   ;;  %s8408_s13 = inlined_call_operand.vmem [shape: f32[2,1,2048], index: 13, kind: input, shape index: {}]   ;;  %s8409_s14 = inlined_call_operand.vmem [shape: bf16[2,2048,32], index: 14, kind: input, shape index: {}]   ;;  %s8410_s15 = inlined_call_operand.vmem [shape: f32[2,1,32], index: 15, kind: input, shape index: {}]   ;;  %s8411_s16 = inlined_call_operand.vmem [shape: f32[2,2,32], index: 16, kind: input, shape index: {}]   ;;  %s8412_s17 = inlined_call_operand.vmem [shape: f32[2,32], index: 17, kind: input, shape index: {}]   ;;  %s8413_s18 = inlined_call_operand.vmem [shape: bf16[32,128], index: 18, kind: input, shape index: {}]   ;;  %s8414_s19 = inlined_call_operand.vmem [shape: f32[1,128], index: 19, kind: input, shape index: {}]   ;;  %s8415_s20 = inlined_call_operand.vmem [shape: f32[2,8,128], index: 20, kind: output, shape index: {}]  }
   0x1   :  { %8422 = sst [smem:[#allocation10_spill]] %s8395_s0  ;;  %s7534_s24 = smov 0  }
   0x2   :  { %8423 = sst [smem:[#allocation11_spill]] %s8396_s1  ;;  %s7528_s1 = smov 0  }
   0x3   :  { %8424 = sst [smem:[#allocation12_spill]] %s8397_s2  ;;  %s7536_s2 = smov 0  }
   0x4   :  { %8425 = sst [smem:[#allocation13_spill]] %s8398_s3 }
   0x5   :  { %8426 = sst [smem:[#allocation14_spill]] %s8399_s4 }
   0x6   :  { %8427 = sst [smem:[#allocation15_spill]] %s8400_s5 }
   0x7   :  { %8428 = sst [smem:[#allocation16_spill]] %s8401_s6 }
   0x8   :  { %8429 = sst [smem:[#allocation17_spill]] %s8402_s7 }
   0x9   :  { %8430 = sst [smem:[#allocation18_spill]] %s8403_s8 }
   0xa   :  { %8431 = sst [smem:[#allocation19_spill]] %s8404_s9 }
   0xb   :  { %8432 = sst [smem:[#allocation20_spill]] %s8405_s10 }
   0xc   :  { %8433 = sst [smem:[#allocation21_spill]] %s8406_s11 }
   0xd   :  { %8434 = sst [smem:[#allocation22_spill]] %s8408_s13 }
   0xe   :  { %8435 = sst [smem:[#allocation23_spill]] %s8409_s14 }
   0xf   :  { %8436 = sst [smem:[#allocation24_spill]] %s8410_s15 }
  0x10   :  { %8437 = sst [smem:[#allocation25_spill]] %s8411_s16 }
  0x11   :  { %8438 = sst [smem:[#allocation26_spill]] %s8412_s17 }
  0x12   :  { %8439 = sst [smem:[#allocation27_spill]] %s8413_s18 }
  0x13   :  { %8440 = sst [smem:[#allocation28_spill]] %s8414_s19 }
  0x14   :  { %8441 = sst [smem:[#allocation29_spill]] %s8415_s20 }
  0x15 LB: > { %8442 = sst [smem:[#allocation3_spill]] %s7400_s1  ;;  %s39_s25 = sadd.s32 1, %s7408_s23  ;;  %s7416_s2 = sphi %s7536_s2, %s30_s2   ;;  %s7412_s24 = sphi %s7534_s24, %s8489_s24   ;;  %s7408_s23 = sphi %s7532_s23, %s8488_s23   ;;  %s7404_s22 = sphi %s7530_s22, %s8487_s22   ;;  %s7400_s1 = sphi %s7528_s1, %s8486_s1  }
  0x16   : > { %8443 = sst [smem:[#allocation4_spill]] %s7408_s23  ;;  %s42_s3 = sadd.s32 1, %s7412_s24 }
  0x17   : > { %8444 = sst [smem:[#allocation5_spill]] %s7412_s24  ;;  %p40_p0 = scmp.ge.s32.totalorder %s39_s25, 2 }
  0x18   : > { %8445 = sst [smem:[#allocation6_spill]] %s7416_s2  ;;  %p6148_p1 = scmp.ge.s32.totalorder %s7416_s2, 1 }
  0x19   : > { %p720_p2 = scmp.lt.s32.totalorder %s7416_s2, 5  ;;  %s8491_s25 = smov (%p40_p0, %s39_s25), 0 }
  0x1a   : > { %8446 = sst [smem:[#allocation7_spill]] %s8491_s25  ;;  %s8493_s3 = smov (!%p40_p0, %s42_s3), %s7412_s24 }
  0x1b   : > { %p721_p3 = pnand %p6148_p1, %p720_p2  ;;  %p44_p4 = scmp.ge.s32.totalorder %s8493_s3, 2 }
  0x1d   : > { %s8495_s3 = smov (%p44_p4, %s8493_s3), 0  ;;  %724 = sbr.rel (%p721_p3) target bundleno = 4287 (0x10bf), region = 100 }
  0x1e   : > { %8447 = sst [smem:[#allocation8_spill]] %s8495_s3 }
  0x22   : > { %p843_p5 = scmp.lt.s32.totalorder %s7404_s22, 1  ;;  %p851_p6 = scmp.lt.s32.totalorder %s7400_s1, 1 }
  0x23   : > { %s8448_s29 = sld [smem:[#allocation10_spill]] }
  0x24   : > { %s8497_s22 = smov (!%p843_p5, %s7404_s22), 1  ;;  %s8450_s18 = sld [smem:[#allocation14_spill]] }
  0x25   : > { %s7562_s26 = scalar_select %p851_p6, %s7400_s1, 1 }
  0x26   : > { %s7564_s27 = sshll.u32 %s8497_s22, 3  ;;  %s8451_s16 = sld [smem:[#allocation12_spill]] }
  0x27   : > { %s7112_s24 = smul.u32 192, %s7562_s26  ;;  %s6465_s23 = sshll.u32 %s7562_s26, 4 }
  0x28   : > { %s7113_s2 = smul.u32 12, %s7562_s26  ;;  %s8453_s25 = sld [smem:[#allocation13_spill]] }
  0x29   : > { %s846_s30 = scalar_lea.vmem %s8448_s29, %s7564_s27  ;;  %s7597_s14 = sshll.u32 %s7562_s26, 1 }
  0x2a   : > { %s7580_s22 = scalar_lea.vmem %s8450_s18, %s6465_s23  ;;  %s8455_s7 = sld [smem:[#allocation17_spill]] }
  0x2b   : > { %s8456_s8 = sld [smem:[#allocation18_spill]]  ;;  %s6468_s21 = sshll.u32 %s7562_s26, 10 }
  0x2c   : > { %s7585_s28 = scalar_lea.vmem %s8451_s16, %s7112_s24  ;;  %s8457_s9 = sld [smem:[#allocation19_spill]] }
  0x2d   : > { %s8460_s13 = sld [smem:[#allocation22_spill]] }
  0x2e   : > { %s7594_s15 = scalar_lea.vmem %s8453_s25, %s7113_s2  ;;  %s8462_s5 = sld [smem:[#allocation23_spill]] }
  0x2f   : > { %s8463_s16 = sld [smem:[#allocation24_spill]] }
  0x30   : > { %s7606_s1 = scalar_lea.vmem %s8455_s7, %s7112_s24  ;;  %s6467_s24 = sshll.u32 %s7562_s26, 8 }
  0x31   : > { %s7611_s3 = scalar_lea.vmem %s8456_s8, %s7113_s2  ;;  %s7635_s25 = scalar_lea.vmem %s8407_s12, %s6467_s24 }
  0x32   : > { %s7616_s0 = scalar_lea.vmem %s8457_s9, %s6465_s23  ;;  %s8464_s7 = sld [smem:[#allocation25_spill]] }
  0x33   : > { %s7630_s4 = scalar_lea.vmem %s8460_s13, %s6465_s23  ;;  %s8466_s24 = sld [smem:[#allocation3_spill]] }
  0x34   : > { %8461 = sst [smem:[#allocation9_spill]] %s7630_s4  ;;  %s7641_s17 = scalar_lea.vmem %s8462_s5, %s6468_s21 }
  0x35   : > { %s909_s19 = scalar_lea.vmem %s8463_s16, %s7562_s26  ;;  %s8465_s4 = sld [smem:[#allocation29_spill]] }
  0x38   : > { %s913_s23 = scalar_lea.vmem %s8464_s7, %s7597_s14 }
  0x39   : > { %p6166_p7 = scmp.ne.s32.totalorder %s8466_s24, 0 }
  0x3b   : > { %s917_s2 = scalar_lea.vmem %s8465_s4, %s7564_s27  ;;  %922 = sbr.rel (%p6166_p7) target bundleno = 66 (0x42), region = 104 }
  0x40   : > { %v923_v0 = vld [vmem:[%s846_s30] sm:$0xff]  ;;  %vm924_vm0 = vcmask 261120  }
  0x41   : > { %925 = vst.msk [vmem:[#allocation2] sm:$0xff] %vm924_vm0, %v923_v0 }
  0x42 PF: > { %v7159_v1 = vld [vmem:[%s7585_s28 + $0x8] sm:$0xff]   ;;  %v7418_v2 = vmov 0.0   ;;  %v7160_v3 = vld [vmem:[%s7585_s28 + $0x18] sm:$0xff]   ;;  %v7161_v4 = vld [vmem:[%s7585_s28] sm:$0xff]   ;;  %vm7419_vm1 = vmmov 0   ;;  %vm1030_vm2 = vcmask 261120  }
  0x43   : > { %6768 = vmatprep.subr.bf16.mxu0 %v7418_v2  ;;  %6776 = vmatprep.subr.bf16.mxu1 %v7418_v2  ;;  %v7162_v5 = vld [vmem:[%s7585_s28 + $0x10] sm:$0xff]   ;;  %v7163_v8 = vld [vmem:[%s7585_s28 + $0x28] sm:$0xff]   ;;  %v7164_v9 = vld [vmem:[%s7585_s28 + $0x38] sm:$0xff]   ;;  %vm1702_vm3 = vcmask 64512   ;;  %vm1946_vm4 = vcmask 1043456   ;;  %s8467_s10 = sld [smem:[#allocation15_spill]] }
  0x44   : > { %6769 = vmatpush3.bf16.msra.mxu0 %v7159_v1  ;;  %6772 = vmatprep.mubr.msk.bf16.mxu0 %vm7419_vm1, %v7418_v2  ;;  %v7165_v10 = vld [vmem:[%s7585_s28 + $0x20] sm:$0xff]   ;;  %v7166_v11 = vld [vmem:[%s7585_s28 + $0x30] sm:$0xff]   ;;  %v7167_v12 = vld [vmem:[%s7585_s28 + $0x48] sm:$0xff]   ;;  %s8469_s30 = sld [smem:[#allocation16_spill]] }
  0x45   : > { %6777 = vmatpush3.bf16.msra.mxu1 %v7160_v3  ;;  %6770 = vmatprep.subr.bf16.mxu0 %v7418_v2  ;;  %v7168_v13 = vld [vmem:[%s7585_s28 + $0x58] sm:$0xff]   ;;  %v7169_v14 = vld [vmem:[%s7585_s28 + $0x40] sm:$0xff]   ;;  %v7170_v15 = vld [vmem:[%s7585_s28 + $0x50] sm:$0xff]   ;;  %s8471_s4 = sld [smem:[#allocation11_spill]] }
  0x46   : > { %6778 = vmatprep.subr.bf16.mxu1 %v7418_v2  ;;  %6780 = vmatprep.mubr.msk.bf16.mxu1 %vm7419_vm1, %v7418_v2  ;;  %v7171_v16 = vld [vmem:[%s7585_s28 + $0x68] sm:$0xff]   ;;  %v7172_v17 = vld [vmem:[%s7585_s28 + $0x78] sm:$0xff]   ;;  %v7173_v18 = vld [vmem:[%s7585_s28 + $0x60] sm:$0xff]   ;;  %s8475_s16 = sld [smem:[#allocation21_spill]] }
  0x47   : > { %v7174_v19 = vld [vmem:[%s7585_s28 + $0x70] sm:$0xff]   ;;  %v7175_v20 = vld [vmem:[%s7585_s28 + $0x88] sm:$0xff]   ;;  %v7176_v21 = vld [vmem:[%s7585_s28 + $0x80] sm:$0xff]   ;;  %s8480_s9 = sld [smem:[#allocation3_spill]] }
  0x48   : > { %v926_v6 = vld [vmem:[#allocation2] sm:$0xff]  ;;  %6771 = vmatpush3.bf16.msra.mxu0 %v7161_v4  ;;  %v7177_v22 = vld [vmem:[%s7585_s28 + $0x98] sm:$0xff]   ;;  %v7178_v23 = vld [vmem:[%s7585_s28 + $0x90] sm:$0xff]  }
  0x49   : > { %v7668_v7 = vpack.c.bf16 %v926_v6, %v926_v6  ;;  %6779 = vmatpush3.bf16.msra.mxu1 %v7162_v5  ;;  %6784 = vmatprep.subr.bf16.mxu0 %v7418_v2  ;;  %v7179_v24 = vld [vmem:[%s7585_s28 + $0xa8] sm:$0xff]   ;;  %v7180_v25 = vld [vmem:[%s7585_s28 + $0xa0] sm:$0xff]   ;;  %v7181_v26 = vld [vmem:[%s7585_s28 + $0xb8] sm:$0xff]   ;;  %s8468_s11 = scalar_lea.vmem %s8467_s10, %s7562_s26 }
  0x4a   : > { %6792 = vmatprep.subr.bf16.mxu1 %v7418_v2  ;;  %v7182_v27 = vld [vmem:[%s7585_s28 + $0xb0] sm:$0xff]   ;;  %v6183_v43 = vld [vmem:[%s7594_s15 + $0x4] ss:$0 sm:$0xff]  ;;  %v6184_v45 = vld [vmem:[%s7594_s15 + $0x5] ss:$0 sm:$0xff] }
  0x4b   : > { %6773 = vmatmul.mubr.msk.bf16.vlgmr.msra.gmra.mxu0 %vm1030_vm2, %v7668_v7  ;;  %v6167_v53 = vld [vmem:[%s7594_s15] ss:$0 sm:$0xff]  ;;  %v6168_v56 = vld [vmem:[%s7594_s15 + $0x1] ss:$0 sm:$0xff]  ;;  %v6185_v61 = vld [vmem:[%s7594_s15 + $0x6] ss:$0 sm:$0xff]  ;;  %s8472_s29 = scalar_lea.vmem %s8471_s4, %s7564_s27 }
  0x4c   : > { %6781 = vmatmul.mubr.msk.bf16.vlgmr.msra.gmra.mxu1 %vm1030_vm2, %v7668_v7  ;;  %6785 = vmatpush3.bf16.msra.mxu0 %v7163_v8  ;;  %v6186_v0 = vld [vmem:[%s7594_s15 + $0x7] ss:$0 sm:$0xff]  ;;  %s8476_s7 = scalar_lea.vmem %s8475_s16, %s7597_s14 }
  0x4d   : > { %6793 = vmatpush3.bf16.msra.mxu1 %v7164_v9  ;;  %6786 = vmatprep.subr.bf16.mxu0 %v7418_v2  ;;  %p6458_p8 = scmp.ne.s32.totalorder %s8480_s9, 1 }
  0x4e   : > { %6794 = vmatprep.subr.bf16.mxu1 %v7418_v2  ;;  %6788 = vmatprep.mubr.msk.bf16.mxu0 %vm7419_vm1, %v7418_v2  ;;  %s8481_s10 = sld [smem:[#allocation27_spill]] (!%p6458_p8) }
  0x4f   : > { %6796 = vmatprep.mubr.msk.bf16.mxu1 %vm7419_vm1, %v7418_v2  ;;  %s8483_s4 = sld [smem:[#allocation28_spill]] (!%p6458_p8) }
  0x50   : > { %6787 = vmatpush3.bf16.msra.mxu0 %v7165_v10 }
  0x51   : > { %6795 = vmatpush3.bf16.msra.mxu1 %v7166_v11  ;;  %6800 = vmatprep.subr.bf16.mxu0 %v7418_v2 }
  0x52   : > { %6808 = vmatprep.subr.bf16.mxu1 %v7418_v2 }
  0x53   : > { %6789 = vmatmul.mubr.msk.bf16.vlgmr.msra.gmra.mxu0 %vm1030_vm2, %v7668_v7 }
  0x54   : > { %6797 = vmatmul.mubr.msk.bf16.vlgmr.msra.gmra.mxu1 %vm1030_vm2, %v7668_v7  ;;  %6801 = vmatpush3.bf16.msra.mxu0 %v7167_v12  ;;  %v6169_v12 = vld [vmem:[%s7594_s15 + $0x2] ss:$0 sm:$0xff] }
  0x55   : > { %6809 = vmatpush3.bf16.msra.mxu1 %v7168_v13  ;;  %6802 = vmatprep.subr.bf16.mxu0 %v7418_v2 }
  0x56   : > { %6810 = vmatprep.subr.bf16.mxu1 %v7418_v2  ;;  %6804 = vmatprep.mubr.msk.bf16.mxu0 %vm7419_vm1, %v7418_v2 }
  0x57   : > { %6812 = vmatprep.mubr.msk.bf16.mxu1 %vm7419_vm1, %v7418_v2 }
  0x58   : > { %6803 = vmatpush3.bf16.msra.mxu0 %v7169_v14 }
  0x59   : > { %6811 = vmatpush3.bf16.msra.mxu1 %v7170_v15  ;;  %6816 = vmatprep.subr.bf16.mxu0 %v7418_v2  ;;  %v6170_v15 = vld [vmem:[%s7594_s15 + $0x3] ss:$0 sm:$0xff] }
  0x5a   : > { %6824 = vmatprep.subr.bf16.mxu1 %v7418_v2 }
  0x5b   : > { %6805 = vmatmul.mubr.msk.bf16.vlgmr.msra.gmra.mxu0 %vm1030_vm2, %v7668_v7 }
  0x5c   : > { %6813 = vmatmul.mubr.msk.bf16.vlgmr.msra.gmra.mxu1 %vm1030_vm2, %v7668_v7  ;;  %6817 = vmatpush3.bf16.msra.mxu0 %v7171_v16 }
  0x5d   : > { %6825 = vmatpush3.bf16.msra.mxu1 %v7172_v17  ;;  %6818 = vmatprep.subr.bf16.mxu0 %v7418_v2 }
  0x5e   : > { %6826 = vmatprep.subr.bf16.mxu1 %v7418_v2  ;;  %6820 = vmatprep.mubr.msk.bf16.mxu0 %vm7419_vm1, %v7418_v2 }
  0x5f   : > { %6828 = vmatprep.mubr.msk.bf16.mxu1 %vm7419_vm1, %v7418_v2 }
  0x60   : > { %6819 = vmatpush3.bf16.msra.mxu0 %v7173_v18 }
  0x61   : > { %6827 = vmatpush3.bf16.msra.mxu1 %v7174_v19  ;;  %6832 = vmatprep.subr.bf16.mxu0 %v7418_v2 }
  0x62   : > { %6840 = vmatprep.subr.bf16.mxu1 %v7418_v2 }
  0x63   : > { %6821 = vmatmul.mubr.msk.bf16.vlgmr.msra.gmra.mxu0 %vm1030_vm2, %v7668_v7 }
  0x64   : > { %6829 = vmatmul.mubr.msk.bf16.vlgmr.msra.gmra.mxu1 %vm1030_vm2, %v7668_v7  ;;  %6836 = vmatprep.mubr.msk.bf16.mxu0 %vm7419_vm1, %v7418_v2 }
  0x65   : > { %6844 = vmatprep.mubr.msk.bf16.mxu1 %vm7419_vm1, %v7418_v2  ;;  %6833 = vmatpush3.bf16.msra.mxu0 %v7175_v20 }
  0x66   : > { %6834 = vmatprep.subr.bf16.mxu0 %v7418_v2  ;;  %6841 = vmatpush3.bf16.msra.mxu1 %v7177_v22 }
  0x67   : > { %6842 = vmatprep.subr.bf16.mxu1 %v7418_v2 }
  0x69   : > { %6835 = vmatpush3.bf16.msra.mxu0 %v7176_v21 }
  0x6a   : > { %6848 = vmatprep.subr.bf16.mxu0 %v7418_v2  ;;  %6843 = vmatpush3.bf16.msra.mxu1 %v7178_v23 }
  0x6b   : > { %6856 = vmatprep.subr.bf16.mxu1 %v7418_v2 }
  0x6c   : > { %6837 = vmatmul.mubr.msk.bf16.vlgmr.msra.gmra.mxu0 %vm1030_vm2, %v7668_v7 }
  0x6d   : > { %6849 = vmatpush3.bf16.msra.mxu0 %v7179_v24  ;;  %6852 = vmatprep.mubr.msk.bf16.mxu0 %vm7419_vm1, %v7418_v2 }
  0x6e   : > { %6850 = vmatprep.subr.bf16.mxu0 %v7418_v2  ;;  %6845 = vmatmul.mubr.msk.bf16.vlgmr.msra.gmra.mxu1 %vm1030_vm2, %v7668_v7 }
  0x6f   : > { %6857 = vmatpush3.bf16.msra.mxu1 %v7181_v26  ;;  %6860 = vmatprep.mubr.msk.bf16.mxu1 %vm7419_vm1, %v7418_v2 }
  0x70   : > { %6858 = vmatprep.subr.bf16.mxu1 %v7418_v2 }
  0x71   : > { %6851 = vmatpush3.bf16.msra.mxu0 %v7180_v25  ;;  %v6199_v25 = vld [vmem:[%s7594_s15 + $0x8] ss:$0 sm:$0xff] }
  0x72   : > { %6864 = vmatprep.subr.bf16.mxu0 %v7418_v2 }
  0x73   : > { %6859 = vmatpush3.bf16.msra.mxu1 %v7182_v27 }
  0x74   : > { %6853 = vmatmul.mubr.msk.bf16.vlgmr.msra.gmra.mxu0 %vm1030_vm2, %v7668_v7  ;;  %6870 = vmatprep.subr.bf16.mxu1 %v7418_v2 }
  0x75   : > { %6866 = vmatprep.mubr.msk.bf16.mxu0 %vm7419_vm1, %v7418_v2 }
  0x76   : > { %6861 = vmatmul.mubr.msk.bf16.vlgmr.msra.gmra.mxu1 %vm1030_vm2, %v7668_v7 }
  0x77   : > { %6872 = vmatprep.mubr.msk.bf16.mxu1 %vm7419_vm1, %v7418_v2 }
 0x10b   : > { %v1068_v28 = vpop.f32.mrf.mxu0 }
 0x10c   : > { %v1120_v29 = vpop.f32.mrf.mxu1  ;;  %v1069_v62 = vadd.f32 %v6167_v53, %v1068_v28 }
 0x10d   : > { %v6774_v30 = vpop.f32.mrf.mxu0  ;;  %v1121_v1 = vadd.f32 %v6168_v56, %v1120_v29  ;;  %v6200_v29 = vld [vmem:[%s7594_s15 + $0x9] ss:$0 sm:$0xff] }
 0x10e   : > { %v6782_v31 = vpop.f32.mrf.mxu1  ;;  %v1694_v8 = vpack.c.bf16 %v1069_v62, %v1069_v62 }
 0x10f   : > { %v1071_v32 = vpop.f32.mrf.mxu0  ;;  %v1695_v11 = vpack.c.bf16 %v1121_v1, %v1121_v1 }
 0x110   : > { %v1123_v33 = vpop.f32.mrf.mxu1 }
 0x111   : > { %v6775_v34 = vpop.f32.mrf.mxu0 }
 0x112   : > { %v6783_v35 = vpop.f32.mrf.mxu1 }
 0x113   : > { %v1172_v36 = vpop.f32.mrf.mxu0 }
 0x114   : > { %v1224_v37 = vpop.f32.mrf.mxu1  ;;  %v1173_v20 = vadd.f32 %v6169_v12, %v1172_v36 }
 0x115   : > { %v6790_v38 = vpop.f32.mrf.mxu0  ;;  %v1225_v22 = vadd.f32 %v6170_v15, %v1224_v37 }
 0x116   : > { %v6798_v39 = vpop.f32.mrf.mxu1  ;;  %v1696_v23 = vpack.c.bf16 %v1173_v20, %v1173_v20 }
 0x117   : > { %v1175_v40 = vpop.f32.mrf.mxu0  ;;  %v1697_v24 = vpack.c.bf16 %v1225_v22, %v1225_v22 }
 0x118   : > { %v1227_v41 = vpop.f32.mrf.mxu1 }
 0x119   : > { %v6791_v42 = vpop.f32.mrf.mxu0 }
 0x11a   : > { %v6799_v44 = vpop.f32.mrf.mxu1 }
 0x11b   : > { %v1300_v46 = vpop.f32.mrf.mxu0 }
 0x11c   : > { %v1301_v47 = vadd.f32 %v6183_v43, %v1300_v46  ;;  %v1352_v48 = vpop.f32.mrf.mxu1 }
 0x11d   : > { %v1353_v49 = vadd.f32 %v6184_v45, %v1352_v48  ;;  %v6806_v50 = vpop.f32.mrf.mxu0 }
 0x11e   : > { %v1698_v51 = vpack.c.bf16 %v1301_v47, %v1301_v47  ;;  %v6814_v52 = vpop.f32.mrf.mxu1 }
 0x11f   : > { %v1699_v54 = vpack.c.bf16 %v1353_v49, %v1353_v49  ;;  %v1303_v55 = vpop.f32.mrf.mxu0 }
 0x120   : > { %v1707_v57 = vsel %vm1702_vm3, %v1698_v51, 0  ;;  %v1355_v58 = vpop.f32.mrf.mxu1 }
 0x121   : > { %v1753_v59 = vsel %vm1702_vm3, %v1699_v54, 0  ;;  %v6807_v60 = vpop.f32.mrf.mxu0  ;;  %6865 = vmatpush3.bf16.xpose.msra.mxu0 %v1707_v57 }
 0x122   : > { %v6815_v63 = vpop.f32.mrf.mxu1  ;;  %6871 = vmatpush3.bf16.xpose.msra.mxu1 %v1753_v59  ;;  %6876 = vmatprep.subr.bf16.mxu0 %v7418_v2 }
 0x123   : > { %v1404_v3 = vpop.f32.mrf.mxu0  ;;  %6882 = vmatprep.subr.bf16.mxu1 %v7418_v2 }
 0x124   : > { %v1405_v4 = vadd.f32 %v6185_v61, %v1404_v3  ;;  %v1456_v5 = vpop.f32.mrf.mxu1 }
 0x125   : > { %v1457_v6 = vadd.f32 %v6186_v0, %v1456_v5  ;;  %v6822_v7 = vpop.f32.mrf.mxu0 }
 0x126   : > { %v1700_v9 = vpack.c.bf16 %v1405_v4, %v1405_v4  ;;  %v6830_v10 = vpop.f32.mrf.mxu1 }
 0x127   : > { %v1701_v13 = vpack.c.bf16 %v1457_v6, %v1457_v6  ;;  %v1407_v14 = vpop.f32.mrf.mxu0 }
 0x128   : > { %v1799_v16 = vsel %vm1702_vm3, %v1700_v9, 0  ;;  %v1459_v17 = vpop.f32.mrf.mxu1  ;;  %6867 = vmatmul.mubr.msk.bf16.vlgmr.msra.gmra.mxu0 %vm1702_vm3, %v1694_v8 }
 0x129   : > { %v1845_v18 = vsel %vm1702_vm3, %v1701_v13, 0  ;;  %6873 = vmatmul.mubr.msk.bf16.vlgmr.msra.gmra.mxu1 %vm1702_vm3, %v1695_v11  ;;  %v6823_v19 = vpop.f32.mrf.mxu0  ;;  %6877 = vmatpush3.bf16.xpose.msra.mxu0 %v1799_v16 }
 0x12a   : > { %v6831_v21 = vpop.f32.mrf.mxu1  ;;  %6883 = vmatpush3.bf16.xpose.msra.mxu1 %v1845_v18  ;;  %6878 = vmatprep.mubr.msk.bf16.mxu0 %vm7419_vm1, %v7418_v2 }
 0x12b   : > { %6884 = vmatprep.mubr.msk.bf16.mxu1 %vm7419_vm1, %v7418_v2  ;;  %6888 = vmatprep.subr.bf16.mxu0 %v7418_v2 }
 0x12c   : > { %6894 = vmatprep.subr.bf16.mxu1 %v7418_v2  ;;  %v1532_v26 = vpop.f32.mrf.mxu0 }
 0x12d   : > { %v1533_v27 = vadd.f32 %v6199_v25, %v1532_v26 }
 0x12e   : > { %v6838_v28 = vpop.f32.mrf.mxu0  ;;  %v1584_v32 = vpop.f32.mrf.mxu1 }
 0x12f   : > { %v1939_v30 = vpack.c.bf16 %v1533_v27, %v1533_v27  ;;  %v1585_v34 = vadd.f32 %v6200_v29, %v1584_v32  ;;  %v6201_v32 = vld [vmem:[%s7594_s15 + $0xa] ss:$0 sm:$0xff] }
 0x130   : > { %6879 = vmatmul.mubr.msk.bf16.vlgmr.msra.gmra.mxu0 %vm1702_vm3, %v1696_v23  ;;  %v1535_v31 = vpop.f32.mrf.mxu0  ;;  %v6846_v36 = vpop.f32.mrf.mxu1 }
 0x131   : > { %6885 = vmatmul.mubr.msk.bf16.vlgmr.msra.gmra.mxu1 %vm1702_vm3, %v1697_v24  ;;  %6890 = vmatprep.mubr.msk.bf16.mxu0 %vm7419_vm1, %v7418_v2  ;;  %v1948_v33 = vsel %vm1946_vm4, %v1939_v30, 0  ;;  %v1940_v37 = vpack.c.bf16 %v1585_v34, %v1585_v34 }
 0x132   : > { %6896 = vmatprep.mubr.msk.bf16.mxu1 %vm7419_vm1, %v7418_v2  ;;  %v6839_v35 = vpop.f32.mrf.mxu0  ;;  %6889 = vmatpush3.bf16.msra.mxu0 %v1948_v33  ;;  %v1587_v38 = vpop.f32.mrf.mxu1 }
 0x133   : > { %6900 = vmatprep.subr.bf16.mxu0 %v7418_v2  ;;  %v1994_v40 = vsel %vm1946_vm4, %v1940_v37, 0  ;;  %v6202_v35 = vld [vmem:[%s7594_s15 + $0xb] ss:$0 sm:$0xff] }
 0x134   : > { %v7792_v39 = vpop.f32.mrf.mxu0  ;;  %v6847_v41 = vpop.f32.mrf.mxu1  ;;  %6895 = vmatpush3.bf16.msra.mxu1 %v1994_v40 }
 0x135   : > { %6906 = vmatprep.subr.bf16.mxu1 %v7418_v2  ;;  %v1637_v34 = vadd.f32 %v6201_v32, %v7792_v39 }
 0x136   : > { %v6854_v42 = vpop.f32.mrf.mxu0  ;;  %v7796_v44 = vpop.f32.mrf.mxu1 }
 0x137   : > { %v1941_v38 = vpack.c.bf16 %v1637_v34, %v1637_v34  ;;  %v1689_v40 = vadd.f32 %v6202_v35, %v7796_v44 }
 0x138   : > { %v1639_v43 = vpop.f32.mrf.mxu0  ;;  %v6862_v46 = vpop.f32.mrf.mxu1 }
 0x139   : > { %v1942_v46 = vpack.c.bf16 %v1689_v40, %v1689_v40 }
 0x13a   : > { %v6855_v45 = vpop.f32.mrf.mxu0  ;;  %v1691_v47 = vpop.f32.mrf.mxu1 }
 0x13b   : > { %v2040_v45 = vsel %vm1946_vm4, %v1941_v38, 0  ;;  %v2086_v44 = vsel %vm1946_vm4, %v1942_v46, 0  ;;  %v7373_v46 = vld [vmem:[#allocation2] sm:$0xff] }
 0x13c   : > { %v6863_v48 = vpop.f32.mrf.mxu1 }
 0x1e8   : > { %v1743_v49 = vpop.f32.mrf.mxu0 }
 0x1e9   : > { %v1887_v50 = vmul.f32 0.35355338, %v1743_v49  ;;  %v1789_v51 = vpop.f32.mrf.mxu1  ;;  %v988_v49 = vld [vmem:[%s7580_s22] sm:$0xf] }
 0x1ea   : > { %v6868_v52 = vpop.f32.mrf.mxu0  ;;  %v1888_v53 = vmul.f32 0.35355338, %v1789_v51 }
 0x1eb   : > { %v6874_v54 = vpop.f32.mrf.mxu1  ;;  %v1891_v55 = vsel %vm1702_vm3, %v1887_v50, -inf  ;;  %v2136_v52 = vsel %vm1946_vm4, %v988_v49, 0 }
 0x1ec   : > { %1892 = vmax.xlane.f32.xlu0 %v1891_v55  ;;  %v1746_v56 = vpop.f32.mrf.mxu0  ;;  %v1894_v60 = vsel %vm1702_vm3, %v1888_v53, -inf }
 0x1ed   : > { %v1792_v57 = vpop.f32.mrf.mxu1  ;;  %v989_v56 = vld [vmem:[%s7580_s22 + $0x4] sm:$0xf] }
 0x1ee   : > { %v6869_v58 = vpop.f32.mrf.mxu0  ;;  %v2182_v57 = vsel %vm1946_vm4, %v989_v56, 0 }
 0x1ef   : > { %v6875_v59 = vpop.f32.mrf.mxu1  ;;  %v990_v58 = vld [vmem:[%s7580_s22 + $0x8] sm:$0xf] }
 0x1f0   : > { %1895 = vmax.xlane.f32.xlu0 %v1894_v60  ;;  %v1835_v61 = vpop.f32.mrf.mxu0 }
 0x1f1   : > { %v1881_v62 = vpop.f32.mrf.mxu1  ;;  %v1889_v63 = vmul.f32 0.35355338, %v1835_v61  ;;  %v2228_v61 = vsel %vm1946_vm4, %v990_v58, 0 }
 0x1f2   : > { %v6880_v0 = vpop.f32.mrf.mxu0  ;;  %v1890_v1 = vmul.f32 0.35355338, %v1881_v62 }
 0x1f3   : > { %v6886_v3 = vpop.f32.mrf.mxu1  ;;  %v1897_v4 = vsel %vm1702_vm3, %v1889_v63, -inf }
 0x1f4   : > { %1898 = vmax.xlane.f32.xlu1 %v1897_v4  ;;  %v1838_v5 = vpop.f32.mrf.mxu0  ;;  %v1900_v9 = vsel %vm1702_vm3, %v1890_v1, -inf }
 0x1f5   : > { %v1884_v6 = vpop.f32.mrf.mxu1 }
 0x1f6   : > { %v6881_v7 = vpop.f32.mrf.mxu0 }
 0x1f7   : > { %v6887_v8 = vpop.f32.mrf.mxu1 }
 0x1f8   : > { %1901 = vmax.xlane.f32.xlu1 %v1900_v9 }
 0x275   : > { %v1893_v10 = vpop.xlane.xlu0 %1892 }
 0x276   : > { %v1903_v11 = vsub.f32 %v1887_v50, %v1893_v10 }
 0x278   : > { %v1907_v12 = vmul.f32 1.442695, %v1903_v11 }
 0x279   : > { %v1896_v13 = vpop.xlane.xlu0 %1895 }
 0x27a   : > { %7335 = vpow2.f32 %v1907_v12  ;;  %v1904_v14 = vsub.f32 %v1888_v53, %v1896_v13 }
 0x27c   : > { %v1909_v15 = vmul.f32 1.442695, %v1904_v14 }
 0x27d   : > { %v1899_v16 = vpop.xlane.xlu1 %1898 }
 0x27e   : > { %7337 = vpow2.f32 %v1909_v15  ;;  %v1905_v17 = vsub.f32 %v1889_v63, %v1899_v16  ;;  %v991_v63 = vld [vmem:[%s7580_s22 + $0xc] sm:$0xf]  ;;  %s8470_s22 = scalar_lea.vmem %s8469_s30, %s7597_s14 }
 0x27f   : > { %v2274_v4 = vsel %vm1946_vm4, %v991_v63, 0 }
 0x280   : > { %v1911_v18 = vmul.f32 1.442695, %v1905_v17 }
 0x281   : > { %v1902_v19 = vpop.xlane.xlu1 %1901 }
 0x282   : > { %7339 = vpow2.f32 %v1911_v18  ;;  %v1906_v20 = vsub.f32 %v1890_v1, %v1902_v19 }
 0x284   : > { %v1913_v21 = vmul.f32 1.442695, %v1906_v20 }
 0x286   : > { %7341 = vpow2.f32 %v1913_v21 }
 0x287   : > { %v7336_v22 = vpop.eup %7335 }
 0x288   : > { %v1915_v23 = vsel %vm1702_vm3, %v7336_v22, 0.0 }
 0x289   : > { %1916 = vadd.xlane.f32.xlu0 %v1915_v23 }
 0x28b   : > { %v7338_v24 = vpop.eup %7337 }
 0x28c   : > { %v1918_v25 = vsel %vm1702_vm3, %v7338_v24, 0.0 }
 0x28d   : > { %1919 = vadd.xlane.f32.xlu1 %v1918_v25 }
 0x28f   : > { %v7340_v26 = vpop.eup %7339 }
 0x290   : > { %v1921_v27 = vsel %vm1702_vm3, %v7340_v26, 0.0 }
 0x291   : > { %1922 = vadd.xlane.f32.xlu0 %v1921_v27 }
 0x293   : > { %v7342_v28 = vpop.eup %7341 }
 0x294   : > { %v1924_v29 = vsel %vm1702_vm3, %v7342_v28, 0.0 }
 0x295   : > { %1925 = vadd.xlane.f32.xlu1 %v1924_v29 }
 0x312   : > { %v1917_v30 = vpop.xlane.xlu0 %1916 }
 0x313   : > { %7343 = vrcp.f32 %v1917_v30 }
 0x316   : > { %v1920_v31 = vpop.xlane.xlu1 %1919 }
 0x317   : > { %7345 = vrcp.f32 %v1920_v31 }
 0x31a   : > { %v1923_v33 = vpop.xlane.xlu0 %1922 }
 0x31b   : > { %7347 = vrcp.f32 %v1923_v33 }
 0x31e   : > { %v1926_v36 = vpop.xlane.xlu1 %1925 }
 0x31f   : > { %7349 = vrcp.f32 %v1926_v36  ;;  %v6227_v36 = vld [vmem:[%s8468_s11] ss:$0 sm:$0xff] }
 0x320   : > { %v7344_v37 = vpop.eup %7343 }
 0x321   : > { %v1928_v41 = vmul.f32 %v7344_v37, %v7336_v22 }
 0x323   : > { %v1935_v42 = vpack.c.bf16 %v1928_v41, %v1928_v41 }
 0x324   : > { %v7346_v43 = vpop.eup %7345 }
 0x325   : > { %6891 = vmatmul.mubr.msk.bf16.vlgmr.msra.gmra.mxu0 %vm1702_vm3, %v1935_v42  ;;  %v1930_v47 = vmul.f32 %v7346_v43, %v7338_v24 }
 0x326   : > { %6901 = vmatpush3.bf16.msra.mxu0 %v2040_v45  ;;  %6902 = vmatprep.mubr.msk.bf16.mxu0 %vm7419_vm1, %v7418_v2 }
 0x327   : > { %v1936_v39 = vpack.c.bf16 %v1930_v47, %v1930_v47  ;;  %6912 = vmatprep.subr.bf16.mxu0 %v7418_v2 }
 0x328   : > { %v7348_v48 = vpop.eup %7347 }
 0x329   : > { %6897 = vmatmul.mubr.msk.bf16.vlgmr.msra.gmra.mxu1 %vm1702_vm3, %v1936_v39  ;;  %v1932_v50 = vmul.f32 %v7348_v48, %v7340_v26 }
 0x32a   : > { %6907 = vmatpush3.bf16.msra.mxu1 %v2086_v44  ;;  %6908 = vmatprep.mubr.msk.bf16.mxu1 %vm7419_vm1, %v7418_v2 }
 0x32b   : > { %v1937_v51 = vpack.c.bf16 %v1932_v50, %v1932_v50  ;;  %6918 = vmatprep.subr.bf16.mxu1 %v7418_v2 }
 0x32c   : > { %v7350_v53 = vpop.eup %7349 }
 0x32d   : > { %6903 = vmatmul.mubr.msk.bf16.vlgmr.msra.gmra.mxu0 %vm1702_vm3, %v1937_v51  ;;  %v1934_v54 = vmul.f32 %v7350_v53, %v7342_v28  ;;  %v7184_v53 = vld [vmem:[%s7606_s1 + $0x18] sm:$0xff]  }
 0x32e   : > { %6913 = vmatpush3.bf16.msra.mxu0 %v2136_v52  ;;  %6914 = vmatprep.mubr.msk.bf16.mxu0 %vm7419_vm1, %v7418_v2  ;;  %v7183_v52 = vld [vmem:[%s7606_s1 + $0x8] sm:$0xff]  }
 0x32f   : > { %v1938_v55 = vpack.c.bf16 %v1934_v54, %v1934_v54  ;;  %6924 = vmatprep.subr.bf16.mxu0 %v7418_v2  ;;  %v7185_v54 = vld [vmem:[%s7606_s1] sm:$0xff]  }
 0x331   : > { %6909 = vmatmul.mubr.msk.bf16.vlgmr.msra.gmra.mxu1 %vm1702_vm3, %v1938_v55  ;;  %v7186_v55 = vld [vmem:[%s7606_s1 + $0x10] sm:$0xff]  }
 0x332   : > { %6920 = vmatprep.mubr.msk.bf16.mxu1 %vm7419_vm1, %v7418_v2  ;;  %6919 = vmatpush3.bf16.msra.mxu1 %v2182_v57 }
 0x333   : > { %6930 = vmatprep.subr.bf16.mxu1 %v7418_v2 }
 0x3e5   : > { %v1984_v59 = vpop.f32.mrf.mxu0 }
 0x3e6   : > { %v2128_v60 = vpack.c.bf16 %v1984_v59, %v1984_v59  ;;  %v2346_v59 = vlaneseq }
 0x3e7   : > { %v6892_v62 = vpop.f32.mrf.mxu0 }
 0x3e8   : > { %6915 = vmatmul.mubr.msk.bf16.vlgmr.msra.gmra.mxu0 %vm1702_vm3, %v2128_v60  ;;  %v7869_v60 = vshrl.u32 %v2346_v59, 7  ;;  %v2331_v62 = vld [vmem:[%s8470_s22] sm:$0x3]  ;;  %s8482_s22 = sld [smem:[#allocation26_spill]] (!%p6458_p8) }
 0x3e9   : > { %v1987_v0 = vpop.f32.mrf.mxu0  ;;  %v2030_v1 = vpop.f32.mrf.mxu1  ;;  %6925 = vmatpush3.bf16.msra.mxu0 %v2228_v61  ;;  %6926 = vmatprep.mubr.msk.bf16.mxu0 %vm7419_vm1, %v7418_v2 }
 0x3ea   : > { %v2129_v3 = vpack.c.bf16 %v2030_v1, %v2030_v1  ;;  %6936 = vmatprep.subr.bf16.mxu0 %v7418_v2  ;;  %v7872_v61 = vsub.s32 0, %v7869_v60  ;;  %v7880_v63 = vsub.s32 1, %v7869_v60 }
 0x3eb   : > { %v6893_v5 = vpop.f32.mrf.mxu0  ;;  %v6898_v6 = vpop.f32.mrf.mxu1 }
 0x3ec   : > { %6921 = vmatmul.mubr.msk.bf16.vlgmr.msra.gmra.mxu1 %vm1702_vm3, %v2129_v3  ;;  %v2349_v0 = vrot.slane %v2331_v62, %v7872_v61 }
 0x3ed   : > { %v2033_v7 = vpop.f32.mrf.mxu1  ;;  %v2076_v8 = vpop.f32.mrf.mxu0  ;;  %6931 = vmatpush3.bf16.msra.mxu1 %v2274_v4  ;;  %6932 = vmatprep.mubr.msk.bf16.mxu1 %vm7419_vm1, %v7418_v2  ;;  %v2354_v4 = vrot.slane %v2331_v62, %v7880_v63 }
 0x3ee   : > { %v2130_v9 = vpack.c.bf16 %v2076_v8, %v2076_v8  ;;  %6944 = vmatprep.subr.bf16.mxu1 %v7418_v2  ;;  %v7187_v7 = vld [vmem:[%s7606_s1 + $0x28] sm:$0xff]   ;;  %v7188_v8 = vld [vmem:[%s7606_s1 + $0x38] sm:$0xff]  }
 0x3ef   : > { %v6899_v10 = vpop.f32.mrf.mxu1  ;;  %v6904_v11 = vpop.f32.mrf.mxu0 }
 0x3f0   : > { %6927 = vmatmul.mubr.msk.bf16.vlgmr.msra.gmra.mxu0 %vm1702_vm3, %v2130_v9  ;;  %v7189_v10 = vld [vmem:[%s7606_s1 + $0x20] sm:$0xff]   ;;  %v7190_v11 = vld [vmem:[%s7606_s1 + $0x30] sm:$0xff]  }
 0x3f1   : > { %v2079_v12 = vpop.f32.mrf.mxu0  ;;  %v2122_v13 = vpop.f32.mrf.mxu1  ;;  %6940 = vmatprep.mubr.msk.bf16.mxu0 %vm7419_vm1, %v7418_v2  ;;  %6937 = vmatpush3.bf16.msra.mxu0 %v7183_v52 }
 0x3f2   : > { %v2131_v14 = vpack.c.bf16 %v2122_v13, %v2122_v13  ;;  %6938 = vmatprep.subr.bf16.mxu0 %v7418_v2  ;;  %v7191_v12 = vld [vmem:[%s7606_s1 + $0x48] sm:$0xff]   ;;  %v7192_v13 = vld [vmem:[%s7606_s1 + $0x58] sm:$0xff]  }
 0x3f3   : > { %v6905_v15 = vpop.f32.mrf.mxu0  ;;  %v6910_v16 = vpop.f32.mrf.mxu1 }
 0x3f4   : > { %6933 = vmatmul.mubr.msk.bf16.vlgmr.msra.gmra.mxu1 %vm1702_vm3, %v2131_v14  ;;  %v7193_v14 = vld [vmem:[%s7606_s1 + $0x40] sm:$0xff]   ;;  %v7194_v15 = vld [vmem:[%s7606_s1 + $0x50] sm:$0xff]  }
 0x3f5   : > { %v2125_v17 = vpop.f32.mrf.mxu1  ;;  %6948 = vmatprep.mubr.msk.bf16.mxu1 %vm7419_vm1, %v7418_v2  ;;  %6945 = vmatpush3.bf16.msra.mxu1 %v7184_v53  ;;  %v927_v16 = vld [vmem:[%s8472_s29] sm:$0xff] }
 0x3f6   : > { %6946 = vmatprep.subr.bf16.mxu1 %v7418_v2  ;;  %6939 = vmatpush3.bf16.msra.mxu0 %v7185_v54  ;;  %v2422_v17 = vpack.c.bf16 %v927_v16, %v927_v16 }
 0x3f7   : > { %v6911_v18 = vpop.f32.mrf.mxu1  ;;  %6952 = vmatprep.subr.bf16.mxu0 %v7418_v2 }
 0x3f8   : > { %v7195_v18 = vld [vmem:[%s7606_s1 + $0x68] sm:$0xff]  }
 0x3f9   : > { %6947 = vmatpush3.bf16.msra.mxu1 %v7186_v55 }
 0x3fa   : > { %6960 = vmatprep.subr.bf16.mxu1 %v7418_v2 }
 0x4a8   : > { %v2172_v19 = vpop.f32.mrf.mxu0 }
 0x4a9   : > { %v2316_v28 = vsel %vm1030_vm2, %v2172_v19, 0.0  ;;  %v7196_v19 = vld [vmem:[%s7606_s1 + $0x78] sm:$0xff]  }
 0x4aa   : > { %v6916_v20 = vpop.f32.mrf.mxu0 }
 0x4ab   : > { %v7197_v20 = vld [vmem:[%s7606_s1 + $0x60] sm:$0xff]  }
 0x4ac   : > { %v2175_v21 = vpop.f32.mrf.mxu0  ;;  %v2218_v22 = vpop.f32.mrf.mxu1 }
 0x4ad   : > { %v2317_v25 = vsel %vm1030_vm2, %v2218_v22, 0.0  ;;  %v7198_v21 = vld [vmem:[%s7606_s1 + $0x70] sm:$0xff]   ;;  %v7199_v22 = vld [vmem:[%s7606_s1 + $0x88] sm:$0xff]  }
 0x4ae   : > { %v6917_v23 = vpop.f32.mrf.mxu0  ;;  %v6922_v24 = vpop.f32.mrf.mxu1  ;;  %v2318_v30 = vadd.f32 %v2317_v25, %v2316_v28  ;;  %v7202_v25 = vld [vmem:[%s7606_s1 + $0x90] sm:$0xff]   ;;  %v7205_v28 = vld [vmem:[%s7606_s1 + $0xa0] sm:$0xff]  }
 0x4af   : > { %v7200_v23 = vld [vmem:[%s7606_s1 + $0x98] sm:$0xff]   ;;  %v7201_v24 = vld [vmem:[%s7606_s1 + $0x80] sm:$0xff]  }
 0x4b0   : > { %v2221_v26 = vpop.f32.mrf.mxu1  ;;  %v2264_v27 = vpop.f32.mrf.mxu0 }
 0x4b1   : > { %v2319_v29 = vsel %vm1030_vm2, %v2264_v27, 0.0  ;;  %v7203_v26 = vld [vmem:[%s7606_s1 + $0xa8] sm:$0xff]   ;;  %v7204_v27 = vld [vmem:[%s7606_s1 + $0xb8] sm:$0xff]  }
 0x4b2   : > { %v6923_v31 = vpop.f32.mrf.mxu1  ;;  %v6928_v32 = vpop.f32.mrf.mxu0  ;;  %v2320_v33 = vadd.f32 %v2319_v29, %v2318_v30  ;;  %v7206_v29 = vld [vmem:[%s7606_s1 + $0xb0] sm:$0xff]  }
 0x4b4   : > { %v2267_v34 = vpop.f32.mrf.mxu0  ;;  %v2310_v35 = vpop.f32.mrf.mxu1 }
 0x4b5   : > { %v2321_v37 = vsel %vm1030_vm2, %v2310_v35, 0.0 }
 0x4b6   : > { %v2322_v38 = vadd.f32 %v2321_v37, %v2320_v33  ;;  %v6929_v40 = vpop.f32.mrf.mxu0  ;;  %v6934_v41 = vpop.f32.mrf.mxu1 }
 0x4b8   : > { %v2329_v42 = vadd.f32 %v6227_v36, %v2322_v38  ;;  %v2313_v43 = vpop.f32.mrf.mxu1 }
 0x4ba   : > { %v6935_v45 = vpop.f32.mrf.mxu1  ;;  %v2330_v47 = vadd.f32 %v7373_v46, %v2329_v42 }
 0x4bc   : > { %v2332_v39 = vsel %vm1030_vm2, %v2330_v47, 0.0 }
 0x4bd   : > { %2333 = vadd.xlane.f32.xlu0 %v2332_v39  ;;  %v6244_v39 = vld [vmem:[%s7611_s3 + $0x4] ss:$0 sm:$0xff] }
 0x546   : > { %v2334_v48 = vpop.xlane.xlu0 %2333 }
 0x547   : > { %v2336_v49 = vmul.f32 0.03125, %v2334_v48  ;;  %v6245_v48 = vld [vmem:[%s7611_s3 + $0x5] ss:$0 sm:$0xff] }
 0x549   : > { %v2337_v44 = vsub.f32 %v2330_v47, %v2336_v49 }
 0x54b   : > { %v2338_v50 = vmul.f32 %v2337_v44, %v2337_v44 }
 0x54d   : > { %v2339_v51 = vsel %vm1030_vm2, %v2338_v50, 0.0 }
 0x54e   : > { %2340 = vadd.xlane.f32.xlu1 %v2339_v51 }
 0x5d7   : > { %v2341_v56 = vpop.xlane.xlu1 %2340 }
 0x5d8   : > { %v2342_v57 = vmul.f32 0.03125, %v2341_v56  ;;  %v6228_v56 = vld [vmem:[%s7611_s3] ss:$0 sm:$0xff] }
 0x5da   : > { %v2343_v58 = vadd.f32 1e-05, %v2342_v57  ;;  %v6229_v57 = vld [vmem:[%s7611_s3 + $0x1] ss:$0 sm:$0xff] }
 0x5dc   : > { %7351 = vrsqrt.f32 %v2343_v58 }
 0x5e9   : > { %v7352_v1 = vpop.eup %7351 }
 0x5ea   : > { %v2345_v3 = vmul.f32 %v7352_v1, %v2337_v44 }
 0x5ec   : > { %v2350_v5 = vmul.f32 %v2349_v0, %v2345_v3 }
 0x5ee   : > { %v7884_v6 = vadd.f32 %v2354_v4, %v2350_v5  ;;  %v6246_v4 = vld [vmem:[%s7611_s3 + $0x6] ss:$0 sm:$0xff]  ;;  %v6247_v5 = vld [vmem:[%s7611_s3 + $0x7] ss:$0 sm:$0xff] }
 0x5f0   : > { %v2421_v9 = vpack.c.bf16 %v7884_v6, %v7884_v6 }
 0x5f2   : > { %6941 = vmatmul.mubr.msk.bf16.vlgmr.msra.gmra.mxu0 %vm1030_vm2, %v2421_v9  ;;  %6949 = vmatmul.mubr.msk.bf16.vlgmr.msra.gmra.mxu1 %vm1030_vm2, %v2421_v9 }
 0x5f3   : > { %6953 = vmatpush3.bf16.msra.mxu0 %v7187_v7  ;;  %6961 = vmatpush3.bf16.msra.mxu1 %v7188_v8 }
 0x5f4   : > { %6954 = vmatprep.subr.bf16.mxu0 %v7418_v2  ;;  %6962 = vmatprep.subr.bf16.mxu1 %v7418_v2 }
 0x5f5   : > { %6956 = vmatprep.mubr.msk.bf16.mxu0 %vm7419_vm1, %v7418_v2  ;;  %6964 = vmatprep.mubr.msk.bf16.mxu1 %vm7419_vm1, %v7418_v2 }
 0x5f7   : > { %6955 = vmatpush3.bf16.msra.mxu0 %v7189_v10  ;;  %6963 = vmatpush3.bf16.msra.mxu1 %v7190_v11 }
 0x5f8   : > { %6968 = vmatprep.subr.bf16.mxu0 %v7418_v2  ;;  %6976 = vmatprep.subr.bf16.mxu1 %v7418_v2 }
 0x5fa   : > { %6957 = vmatmul.mubr.msk.bf16.vlgmr.msra.gmra.mxu0 %vm1030_vm2, %v2421_v9  ;;  %6965 = vmatmul.mubr.msk.bf16.vlgmr.msra.gmra.mxu1 %vm1030_vm2, %v2421_v9 }
 0x5fb   : > { %6969 = vmatpush3.bf16.msra.mxu0 %v7191_v12  ;;  %6977 = vmatpush3.bf16.msra.mxu1 %v7192_v13 }
 0x5fc   : > { %6970 = vmatprep.subr.bf16.mxu0 %v7418_v2  ;;  %6978 = vmatprep.subr.bf16.mxu1 %v7418_v2 }
 0x5fd   : > { %6972 = vmatprep.mubr.msk.bf16.mxu0 %vm7419_vm1, %v7418_v2  ;;  %6980 = vmatprep.mubr.msk.bf16.mxu1 %vm7419_vm1, %v7418_v2 }
 0x5ff   : > { %6971 = vmatpush3.bf16.msra.mxu0 %v7193_v14  ;;  %6979 = vmatpush3.bf16.msra.mxu1 %v7194_v15 }
 0x600   : > { %6984 = vmatprep.subr.bf16.mxu0 %v7418_v2  ;;  %6992 = vmatprep.subr.bf16.mxu1 %v7418_v2 }
 0x602   : > { %6973 = vmatmul.mubr.msk.bf16.vlgmr.msra.gmra.mxu0 %vm1030_vm2, %v2422_v17  ;;  %6981 = vmatmul.mubr.msk.bf16.vlgmr.msra.gmra.mxu1 %vm1030_vm2, %v2422_v17 }
 0x603   : > { %6985 = vmatpush3.bf16.msra.mxu0 %v7195_v18  ;;  %6993 = vmatpush3.bf16.msra.mxu1 %v7196_v19  ;;  %v6230_v19 = vld [vmem:[%s7611_s3 + $0x2] ss:$0 sm:$0xff] }
 0x604   : > { %6986 = vmatprep.subr.bf16.mxu0 %v7418_v2  ;;  %6994 = vmatprep.subr.bf16.mxu1 %v7418_v2 }
 0x605   : > { %6988 = vmatprep.mubr.msk.bf16.mxu0 %vm7419_vm1, %v7418_v2  ;;  %6996 = vmatprep.mubr.msk.bf16.mxu1 %vm7419_vm1, %v7418_v2 }
 0x607   : > { %6987 = vmatpush3.bf16.msra.mxu0 %v7197_v20  ;;  %6995 = vmatpush3.bf16.msra.mxu1 %v7198_v21  ;;  %v6231_v20 = vld [vmem:[%s7611_s3 + $0x3] ss:$0 sm:$0xff] }
 0x608   : > { %7000 = vmatprep.subr.bf16.mxu0 %v7418_v2  ;;  %7008 = vmatprep.subr.bf16.mxu1 %v7418_v2 }
 0x60a   : > { %6989 = vmatmul.mubr.msk.bf16.vlgmr.msra.gmra.mxu0 %vm1030_vm2, %v2422_v17  ;;  %6997 = vmatmul.mubr.msk.bf16.vlgmr.msra.gmra.mxu1 %vm1030_vm2, %v2422_v17 }
 0x60b   : > { %7004 = vmatprep.mubr.msk.bf16.mxu0 %vm7419_vm1, %v7418_v2  ;;  %7012 = vmatprep.mubr.msk.bf16.mxu1 %vm7419_vm1, %v7418_v2 }
 0x60c   : > { %7001 = vmatpush3.bf16.msra.mxu0 %v7199_v22  ;;  %7009 = vmatpush3.bf16.msra.mxu1 %v7200_v23 }
 0x60d   : > { %7002 = vmatprep.subr.bf16.mxu0 %v7418_v2  ;;  %7010 = vmatprep.subr.bf16.mxu1 %v7418_v2 }
 0x610   : > { %7003 = vmatpush3.bf16.msra.mxu0 %v7201_v24  ;;  %7011 = vmatpush3.bf16.msra.mxu1 %v7202_v25 }
 0x611   : > { %7016 = vmatprep.subr.bf16.mxu0 %v7418_v2  ;;  %7024 = vmatprep.subr.bf16.mxu1 %v7418_v2 }
 0x613   : > { %7005 = vmatmul.mubr.msk.bf16.vlgmr.msra.gmra.mxu0 %vm1030_vm2, %v2422_v17  ;;  %7013 = vmatmul.mubr.msk.bf16.vlgmr.msra.gmra.mxu1 %vm1030_vm2, %v2422_v17 }
 0x614   : > { %7017 = vmatpush3.bf16.msra.mxu0 %v7203_v26  ;;  %7020 = vmatprep.mubr.msk.bf16.mxu0 %vm7419_vm1, %v7418_v2 }
 0x615   : > { %7018 = vmatprep.subr.bf16.mxu0 %v7418_v2  ;;  %7025 = vmatpush3.bf16.msra.mxu1 %v7204_v27 }
 0x616   : > { %7028 = vmatprep.mubr.msk.bf16.mxu1 %vm7419_vm1, %v7418_v2  ;;  %7026 = vmatprep.subr.bf16.mxu1 %v7418_v2 }
 0x618   : > { %7019 = vmatpush3.bf16.msra.mxu0 %v7205_v28 }
 0x619   : > { %7032 = vmatprep.subr.bf16.mxu0 %v7418_v2  ;;  %7027 = vmatpush3.bf16.msra.mxu1 %v7206_v29 }
 0x61a   : > { %7038 = vmatprep.subr.bf16.mxu1 %v7418_v2 }
 0x61b   : > { %7021 = vmatmul.mubr.msk.bf16.vlgmr.msra.gmra.mxu0 %vm1030_vm2, %v2422_v17 }
 0x61c   : > { %7034 = vmatprep.mubr.msk.bf16.mxu0 %vm7419_vm1, %v7418_v2  ;;  %7029 = vmatmul.mubr.msk.bf16.vlgmr.msra.gmra.mxu1 %vm1030_vm2, %v2422_v17 }
 0x61d   : > { %7040 = vmatprep.mubr.msk.bf16.mxu1 %vm7419_vm1, %v7418_v2 }
 0x6b2   : > { %v2496_v30 = vpop.f32.mrf.mxu0  ;;  %v2548_v31 = vpop.f32.mrf.mxu1 }
 0x6b3   : > { %v2497_v7 = vadd.f32 %v6228_v56, %v2496_v30  ;;  %v2549_v8 = vadd.f32 %v6229_v57, %v2548_v31  ;;  %v6260_v31 = vld [vmem:[%s7611_s3 + $0x8] ss:$0 sm:$0xff] }
 0x6b4   : > { %v6942_v32 = vpop.f32.mrf.mxu0  ;;  %v6950_v33 = vpop.f32.mrf.mxu1 }
 0x6b5   : > { %v3125_v15 = vpack.c.bf16 %v2497_v7, %v2497_v7  ;;  %v3126_v16 = vpack.c.bf16 %v2549_v8, %v2549_v8  ;;  %v6261_v33 = vld [vmem:[%s7611_s3 + $0x9] ss:$0 sm:$0xff] }
 0x6b6   : > { %v2499_v34 = vpop.f32.mrf.mxu0  ;;  %v2551_v35 = vpop.f32.mrf.mxu1 }
 0x6b8   : > { %v6943_v36 = vpop.f32.mrf.mxu0  ;;  %v6951_v37 = vpop.f32.mrf.mxu1 }
 0x6ba   : > { %v2600_v38 = vpop.f32.mrf.mxu0  ;;  %v2652_v40 = vpop.f32.mrf.mxu1 }
 0x6bb   : > { %v2601_v27 = vadd.f32 %v6230_v19, %v2600_v38  ;;  %v2653_v28 = vadd.f32 %v6231_v20, %v2652_v40 }
 0x6bc   : > { %v6958_v41 = vpop.f32.mrf.mxu0  ;;  %v6966_v42 = vpop.f32.mrf.mxu1 }
 0x6bd   : > { %v3127_v29 = vpack.c.bf16 %v2601_v27, %v2601_v27  ;;  %v3128_v30 = vpack.c.bf16 %v2653_v28, %v2653_v28 }
 0x6be   : > { %v2603_v43 = vpop.f32.mrf.mxu0  ;;  %v2655_v45 = vpop.f32.mrf.mxu1 }
 0x6c0   : > { %v6959_v46 = vpop.f32.mrf.mxu0  ;;  %v6967_v47 = vpop.f32.mrf.mxu1 }
 0x6c2   : > { %v2731_v49 = vpop.f32.mrf.mxu0  ;;  %v2783_v44 = vpop.f32.mrf.mxu1 }
 0x6c3   : > { %v2732_v50 = vadd.f32 %v6244_v39, %v2731_v49  ;;  %v2784_v51 = vadd.f32 %v6245_v48, %v2783_v44 }
 0x6c4   : > { %v6974_v52 = vpop.f32.mrf.mxu0  ;;  %v6982_v53 = vpop.f32.mrf.mxu1 }
 0x6c5   : > { %v3129_v54 = vpack.c.bf16 %v2732_v50, %v2732_v50  ;;  %v3130_v55 = vpack.c.bf16 %v2784_v51, %v2784_v51 }
 0x6c6   : > { %v2734_v58 = vpop.f32.mrf.mxu0  ;;  %v2786_v59 = vpop.f32.mrf.mxu1 }
 0x6c7   : > { %v3137_v62 = vsel %vm1702_vm3, %v3129_v54, 0  ;;  %v3183_v0 = vsel %vm1702_vm3, %v3130_v55, 0 }
 0x6c8   : > { %v6975_v1 = vpop.f32.mrf.mxu0  ;;  %v6983_v3 = vpop.f32.mrf.mxu1  ;;  %7033 = vmatpush3.bf16.xpose.msra.mxu0 %v3137_v62  ;;  %7039 = vmatpush3.bf16.xpose.msra.mxu1 %v3183_v0 }
 0x6c9   : > { %7044 = vmatprep.subr.bf16.mxu0 %v7418_v2  ;;  %7050 = vmatprep.subr.bf16.mxu1 %v7418_v2 }
 0x6ca   : > { %v2835_v9 = vpop.f32.mrf.mxu0  ;;  %v2887_v10 = vpop.f32.mrf.mxu1 }
 0x6cb   : > { %v2836_v11 = vadd.f32 %v6246_v4, %v2835_v9  ;;  %v2888_v12 = vadd.f32 %v6247_v5, %v2887_v10 }
 0x6cc   : > { %v6990_v13 = vpop.f32.mrf.mxu0  ;;  %v6998_v14 = vpop.f32.mrf.mxu1 }
 0x6cd   : > { %v3131_v17 = vpack.c.bf16 %v2836_v11, %v2836_v11  ;;  %v3132_v18 = vpack.c.bf16 %v2888_v12, %v2888_v12 }
 0x6ce   : > { %v2838_v21 = vpop.f32.mrf.mxu0  ;;  %v2890_v22 = vpop.f32.mrf.mxu1 }
 0x6cf   : > { %v3229_v23 = vsel %vm1702_vm3, %v3131_v17, 0  ;;  %v3275_v24 = vsel %vm1702_vm3, %v3132_v18, 0  ;;  %7035 = vmatmul.mubr.msk.bf16.vlgmr.msra.gmra.mxu0 %vm1702_vm3, %v3125_v15  ;;  %7041 = vmatmul.mubr.msk.bf16.vlgmr.msra.gmra.mxu1 %vm1702_vm3, %v3126_v16 }
 0x6d0   : > { %v6991_v25 = vpop.f32.mrf.mxu0  ;;  %v6999_v26 = vpop.f32.mrf.mxu1  ;;  %7045 = vmatpush3.bf16.xpose.msra.mxu0 %v3229_v23  ;;  %7051 = vmatpush3.bf16.xpose.msra.mxu1 %v3275_v24 }
 0x6d1   : > { %7046 = vmatprep.mubr.msk.bf16.mxu0 %vm7419_vm1, %v7418_v2  ;;  %7052 = vmatprep.mubr.msk.bf16.mxu1 %vm7419_vm1, %v7418_v2 }
 0x6d2   : > { %7056 = vmatprep.subr.bf16.mxu0 %v7418_v2  ;;  %7062 = vmatprep.subr.bf16.mxu1 %v7418_v2 }
 0x6d3   : > { %v2963_v32 = vpop.f32.mrf.mxu0  ;;  %v3015_v36 = vpop.f32.mrf.mxu1 }
 0x6d4   : > { %v2964_v34 = vadd.f32 %v6260_v31, %v2963_v32  ;;  %v3016_v38 = vadd.f32 %v6261_v33, %v3015_v36 }
 0x6d5   : > { %v7006_v35 = vpop.f32.mrf.mxu0  ;;  %v7014_v41 = vpop.f32.mrf.mxu1 }
 0x6d6   : > { %v3369_v37 = vpack.c.bf16 %v2964_v34, %v2964_v34  ;;  %v3370_v43 = vpack.c.bf16 %v3016_v38, %v3016_v38 }
 0x6d7   : > { %7047 = vmatmul.mubr.msk.bf16.vlgmr.msra.gmra.mxu0 %vm1702_vm3, %v3127_v29  ;;  %7053 = vmatmul.mubr.msk.bf16.vlgmr.msra.gmra.mxu1 %vm1702_vm3, %v3128_v30  ;;  %v2966_v40 = vpop.f32.mrf.mxu0  ;;  %v3018_v46 = vpop.f32.mrf.mxu1 }
 0x6d8   : > { %7058 = vmatprep.mubr.msk.bf16.mxu0 %vm7419_vm1, %v7418_v2  ;;  %7064 = vmatprep.mubr.msk.bf16.mxu1 %vm7419_vm1, %v7418_v2  ;;  %v3377_v42 = vsel %vm1946_vm4, %v3369_v37, 0  ;;  %v3423_v47 = vsel %vm1946_vm4, %v3370_v43, 0  ;;  %v6263_v43 = vld [vmem:[%s7611_s3 + $0xb] ss:$0 sm:$0xff]  ;;  %v6262_v46 = vld [vmem:[%s7611_s3 + $0xa] ss:$0 sm:$0xff] }
 0x6d9   : > { %v7007_v45 = vpop.f32.mrf.mxu0  ;;  %7057 = vmatpush3.bf16.msra.mxu0 %v3377_v42  ;;  %v7015_v39 = vpop.f32.mrf.mxu1  ;;  %7063 = vmatpush3.bf16.msra.mxu1 %v3423_v47  ;;  %s8473_s3 = sld [smem:[#allocation20_spill]] }
 0x6da   : > { %7068 = vmatprep.subr.bf16.mxu0 %v7418_v2  ;;  %7074 = vmatprep.subr.bf16.mxu1 %v7418_v2 }
 0x6db   : > { %v8002_v48 = vpop.f32.mrf.mxu0 }
 0x6dc   : > { %v8005_v44 = vpop.f32.mrf.mxu1 }
 0x6dd   : > { %v7022_v49 = vpop.f32.mrf.mxu0  ;;  %v3120_v39 = vadd.f32 %v6263_v43, %v8005_v44  ;;  %v2417_v44 = vld [vmem:[%s7616_s0 + $0x4] sm:$0xf] }
 0x6de   : > { %v7030_v51 = vpop.f32.mrf.mxu1  ;;  %v3068_v49 = vadd.f32 %v6262_v46, %v8002_v48 }
 0x6df   : > { %v3070_v50 = vpop.f32.mrf.mxu0  ;;  %s8474_s21 = scalar_lea.vmem %s8473_s3, %s7562_s26 }
 0x6e0   : > { %v3122_v53 = vpop.f32.mrf.mxu1 }
 0x6e1   : > { %v7023_v52 = vpop.f32.mrf.mxu0 }
 0x6e2   : > { %v7031_v54 = vpop.f32.mrf.mxu1  ;;  %v3372_v52 = vpack.c.bf16 %v3120_v39, %v3120_v39 }
 0x6e3   : > { %v3371_v54 = vpack.c.bf16 %v3068_v49, %v3068_v49 }
 0x78f   : > { %v3173_v55 = vpop.f32.mrf.mxu0  ;;  %v3219_v56 = vpop.f32.mrf.mxu1 }
 0x790   : > { %v3317_v57 = vmul.f32 0.35355338, %v3173_v55  ;;  %v3318_v58 = vmul.f32 0.35355338, %v3219_v56 }
 0x791   : > { %v7036_v59 = vpop.f32.mrf.mxu0  ;;  %v7042_v62 = vpop.f32.mrf.mxu1 }
 0x792   : > { %v3324_v0 = vsel %vm1702_vm3, %v3318_v58, -inf  ;;  %v3321_v1 = vsel %vm1702_vm3, %v3317_v57, -inf  ;;  %v3469_v59 = vsel %vm1946_vm4, %v3371_v54, 0 }
 0x793   : > { %3325 = vmax.xlane.f32.xlu1 %v3324_v0  ;;  %v3222_v3 = vpop.f32.mrf.mxu1  ;;  %3322 = vmax.xlane.f32.xlu0 %v3321_v1  ;;  %v3176_v4 = vpop.f32.mrf.mxu0  ;;  %v2416_v1 = vld [vmem:[%s7616_s0] sm:$0xf] }
 0x795   : > { %v7037_v5 = vpop.f32.mrf.mxu0  ;;  %v7043_v7 = vpop.f32.mrf.mxu1 }
 0x796   : > { %v3611_v5 = vsel %vm1946_vm4, %v2417_v44, 0 }
 0x797   : > { %v3265_v8 = vpop.f32.mrf.mxu0  ;;  %v3311_v9 = vpop.f32.mrf.mxu1 }
 0x798   : > { %v3319_v10 = vmul.f32 0.35355338, %v3265_v8  ;;  %v3320_v11 = vmul.f32 0.35355338, %v3311_v9  ;;  %v3565_v8 = vsel %vm1946_vm4, %v2416_v1, 0 }
 0x799   : > { %v7048_v12 = vpop.f32.mrf.mxu0  ;;  %v7054_v13 = vpop.f32.mrf.mxu1  ;;  %v2419_v9 = vld [vmem:[%s7616_s0 + $0xc] sm:$0xf] }
 0x79a   : > { %v3330_v14 = vsel %vm1702_vm3, %v3320_v11, -inf  ;;  %v3327_v15 = vsel %vm1702_vm3, %v3319_v10, -inf }
 0x79b   : > { %3331 = vmax.xlane.f32.xlu1 %v3330_v14  ;;  %v3314_v16 = vpop.f32.mrf.mxu1  ;;  %3328 = vmax.xlane.f32.xlu0 %v3327_v15  ;;  %v3268_v17 = vpop.f32.mrf.mxu0  ;;  %v3703_v14 = vsel %vm1946_vm4, %v2419_v9, 0  ;;  %v3809_v9 = vld [vmem:[%s7635_s25 + $0xc8] sm:$0xff] }
 0x79d   : > { %v7049_v18 = vpop.f32.mrf.mxu0  ;;  %v7055_v19 = vpop.f32.mrf.mxu1 }
 0x81c   : > { %v3326_v20 = vpop.xlane.xlu1 %3325  ;;  %v3323_v21 = vpop.xlane.xlu0 %3322 }
 0x81d   : > { %v3334_v22 = vsub.f32 %v3318_v58, %v3326_v20  ;;  %v3333_v23 = vsub.f32 %v3317_v57, %v3323_v21  ;;  %v3515_v58 = vsel %vm1946_vm4, %v3372_v52, 0 }
 0x81f   : > { %v3339_v24 = vmul.f32 1.442695, %v3334_v22  ;;  %v3337_v25 = vmul.f32 1.442695, %v3333_v23 }
 0x821   : > { %7353 = vpow2.f32 %v3339_v24 }
 0x822   : > { %7355 = vpow2.f32 %v3337_v25 }
 0x824   : > { %v3332_v26 = vpop.xlane.xlu1 %3331  ;;  %v3329_v27 = vpop.xlane.xlu0 %3328 }
 0x825   : > { %v3336_v28 = vsub.f32 %v3320_v11, %v3332_v26  ;;  %v3335_v29 = vsub.f32 %v3319_v10, %v3329_v27  ;;  %v2418_v10 = vld [vmem:[%s7616_s0 + $0x8] sm:$0xf] }
 0x826   : > { %v3657_v17 = vsel %vm1946_vm4, %v2418_v10, 0 }
 0x827   : > { %v3343_v30 = vmul.f32 1.442695, %v3336_v28  ;;  %v3341_v31 = vmul.f32 1.442695, %v3335_v29 }
 0x829   : > { %7357 = vpow2.f32 %v3343_v30 }
 0x82a   : > { %7359 = vpow2.f32 %v3341_v31 }
 0x82e   : > { %v7354_v32 = vpop.eup %7353 }
 0x82f   : > { %v7356_v33 = vpop.eup %7355  ;;  %v3348_v34 = vsel %vm1702_vm3, %v7354_v32, 0.0 }
 0x830   : > { %3349 = vadd.xlane.f32.xlu1 %v3348_v34  ;;  %v3345_v35 = vsel %vm1702_vm3, %v7356_v33, 0.0 }
 0x831   : > { %3346 = vadd.xlane.f32.xlu0 %v3345_v35 }
 0x836   : > { %v7358_v36 = vpop.eup %7357 }
 0x837   : > { %v7360_v37 = vpop.eup %7359  ;;  %v3354_v38 = vsel %vm1702_vm3, %v7358_v36, 0.0 }
 0x838   : > { %3355 = vadd.xlane.f32.xlu1 %v3354_v38  ;;  %v3351_v40 = vsel %vm1702_vm3, %v7360_v37, 0.0 }
 0x839   : > { %3352 = vadd.xlane.f32.xlu0 %v3351_v40 }
 0x8b9   : > { %v3350_v41 = vpop.xlane.xlu1 %3349 }
 0x8ba   : > { %7361 = vrcp.f32 %v3350_v41  ;;  %v3347_v42 = vpop.xlane.xlu0 %3346 }
 0x8bb   : > { %7363 = vrcp.f32 %v3347_v42 }
 0x8c1   : > { %v3356_v45 = vpop.xlane.xlu1 %3355 }
 0x8c2   : > { %7365 = vrcp.f32 %v3356_v45  ;;  %v3353_v47 = vpop.xlane.xlu0 %3352 }
 0x8c3   : > { %7367 = vrcp.f32 %v3353_v47 }
 0x8c7   : > { %v7362_v50 = vpop.eup %7361 }
 0x8c8   : > { %v7364_v51 = vpop.eup %7363  ;;  %v3360_v53 = vmul.f32 %v7362_v50, %v7354_v32 }
 0x8c9   : > { %v3358_v55 = vmul.f32 %v7364_v51, %v7356_v33  ;;  %v6288_v51 = vld [vmem:[%s8474_s21] ss:$0 sm:$0xff] }
 0x8ca   : > { %v3366_v56 = vpack.c.bf16 %v3360_v53, %v3360_v53 }
 0x8cb   : > { %v3365_v57 = vpack.c.bf16 %v3358_v55, %v3358_v55 }
 0x8cc   : > { %7065 = vmatmul.mubr.msk.bf16.vlgmr.msra.gmra.mxu1 %vm1702_vm3, %v3366_v56 }
 0x8cd   : > { %7059 = vmatmul.mubr.msk.bf16.vlgmr.msra.gmra.mxu0 %vm1702_vm3, %v3365_v57  ;;  %7075 = vmatpush3.bf16.msra.mxu1 %v3515_v58 }
 0x8ce   : > { %7069 = vmatpush3.bf16.msra.mxu0 %v3469_v59  ;;  %7070 = vmatprep.mubr.msk.bf16.mxu0 %vm7419_vm1, %v7418_v2 }
 0x8cf   : > { %v7366_v48 = vpop.eup %7365  ;;  %7076 = vmatprep.mubr.msk.bf16.mxu1 %vm7419_vm1, %v7418_v2  ;;  %7080 = vmatprep.subr.bf16.mxu0 %v7418_v2 }
 0x8d0   : > { %v7368_v62 = vpop.eup %7367  ;;  %v3364_v0 = vmul.f32 %v7366_v48, %v7358_v36  ;;  %7086 = vmatprep.subr.bf16.mxu1 %v7418_v2 }
 0x8d1   : > { %v3362_v3 = vmul.f32 %v7368_v62, %v7360_v37 }
 0x8d2   : > { %v3368_v4 = vpack.c.bf16 %v3364_v0, %v3364_v0 }
 0x8d3   : > { %v3367_v7 = vpack.c.bf16 %v3362_v3, %v3362_v3 }
 0x8d4   : > { %7077 = vmatmul.mubr.msk.bf16.vlgmr.msra.gmra.mxu1 %vm1702_vm3, %v3368_v4  ;;  %v3800_v4 = vld [vmem:[%s7635_s25 + $0x80] sm:$0xff] }
 0x8d5   : > { %7071 = vmatmul.mubr.msk.bf16.vlgmr.msra.gmra.mxu0 %vm1702_vm3, %v3367_v7  ;;  %7087 = vmatpush3.bf16.msra.mxu1 %v3611_v5  ;;  %v3808_v5 = vld [vmem:[%s7635_s25 + $0xc0] sm:$0xff]  ;;  %v3801_v7 = vld [vmem:[%s7635_s25 + $0x88] sm:$0xff] }
 0x8d6   : > { %7081 = vmatpush3.bf16.msra.mxu0 %v3565_v8  ;;  %7082 = vmatprep.mubr.msk.bf16.mxu0 %vm7419_vm1, %v7418_v2  ;;  %v6306_v8 = vcombine.high %v3800_v4, %v3808_v5  ;;  %v6307_v10 = vcombine.low %v3801_v7, %v3809_v9 }
 0x8d7   : > { %7088 = vmatprep.mubr.msk.bf16.mxu1 %vm7419_vm1, %v7418_v2  ;;  %7092 = vmatprep.subr.bf16.mxu0 %v7418_v2 }
 0x8d8   : > { %7098 = vmatprep.subr.bf16.mxu1 %v7418_v2 }
 0x98c   : > { %v3459_v11 = vpop.f32.mrf.mxu1 }
 0x98d   : > { %v3413_v12 = vpop.f32.mrf.mxu0  ;;  %v3558_v13 = vpack.c.bf16 %v3459_v11, %v3459_v11  ;;  %v6308_v11 = vcombine.high %v3801_v7, %v3809_v9 }
 0x98e   : > { %v3557_v15 = vpack.c.bf16 %v3413_v12, %v3413_v12  ;;  %v7066_v16 = vpop.f32.mrf.mxu1  ;;  %v3784_v12 = vld [vmem:[%s7635_s25] sm:$0xff] }
 0x98f   : > { %v7060_v18 = vpop.f32.mrf.mxu0  ;;  %7089 = vmatmul.mubr.msk.bf16.vlgmr.msra.gmra.mxu1 %vm1702_vm3, %v3558_v13  ;;  %v3792_v13 = vld [vmem:[%s7635_s25 + $0x40] sm:$0xff]  ;;  %v3793_v16 = vld [vmem:[%s7635_s25 + $0x48] sm:$0xff] }
 0x990   : > { %7083 = vmatmul.mubr.msk.bf16.vlgmr.msra.gmra.mxu0 %vm1702_vm3, %v3557_v15  ;;  %v3462_v19 = vpop.f32.mrf.mxu1  ;;  %7099 = vmatpush3.bf16.msra.mxu1 %v3703_v14  ;;  %v3785_v14 = vld [vmem:[%s7635_s25 + $0x8] sm:$0xff]  ;;  %v6290_v15 = vcombine.high %v3784_v12, %v3792_v13 }
 0x991   : > { %v3416_v20 = vpop.f32.mrf.mxu0  ;;  %7093 = vmatpush3.bf16.msra.mxu0 %v3657_v17  ;;  %7094 = vmatprep.mubr.msk.bf16.mxu0 %vm7419_vm1, %v7418_v2  ;;  %v6289_v17 = vcombine.low %v3784_v12, %v3792_v13  ;;  %v6291_v18 = vcombine.low %v3785_v14, %v3793_v16  ;;  %v6292_v19 = vcombine.high %v3785_v14, %v3793_v16  ;;  %v3799_v12 = vld [vmem:[%s7635_s25 + $0x78] sm:$0xff] }
 0x992   : > { %v7067_v21 = vpop.f32.mrf.mxu1  ;;  %7100 = vmatprep.mubr.msk.bf16.mxu1 %vm7419_vm1, %v7418_v2  ;;  %4333 = vmatprep.subr.bf16.mxu0 %v6306_v8  ;;  %v3802_v20 = vld [vmem:[%s7635_s25 + $0x90] sm:$0xff] }
 0x993   : > { %v7061_v22 = vpop.f32.mrf.mxu0  ;;  %4374 = vmatprep.subr.bf16.mxu1 %v6308_v11  ;;  %v3810_v21 = vld [vmem:[%s7635_s25 + $0xd0] sm:$0xff]  ;;  %v3791_v11 = vld [vmem:[%s7635_s25 + $0x38] sm:$0xff] }
 0x994   : > { %v3551_v23 = vpop.f32.mrf.mxu1  ;;  %v3803_v22 = vld [vmem:[%s7635_s25 + $0x98] sm:$0xff]  ;;  %v6304_v16 = vcombine.high %v3791_v11, %v3799_v12 }
 0x995   : > { %v3505_v24 = vpop.f32.mrf.mxu0  ;;  %v3560_v25 = vpack.c.bf16 %v3551_v23, %v3551_v23  ;;  %v7420_v23 = vmov 0  }
 0x996   : > { %v3559_v26 = vpack.c.bf16 %v3505_v24, %v3505_v24  ;;  %v7078_v27 = vpop.f32.mrf.mxu1  ;;  %v6310_v24 = vcombine.high %v3802_v20, %v3810_v21 }
 0x997   : > { %v7072_v28 = vpop.f32.mrf.mxu0  ;;  %7101 = vmatmul.mubr.msk.bf16.vlgmr.msra.gmra.mxu1 %vm1702_vm3, %v3560_v25  ;;  %v3811_v25 = vld [vmem:[%s7635_s25 + $0xd8] sm:$0xff] }
 0x998   : > { %7095 = vmatmul.mubr.msk.bf16.vlgmr.msra.gmra.mxu0 %vm1702_vm3, %v3559_v26  ;;  %v3554_v29 = vpop.f32.mrf.mxu1  ;;  %4375 = vmatpush1.bf16.msra.mxu1 %v6307_v10  ;;  %v6309_v26 = vcombine.low %v3802_v20, %v3810_v21  ;;  %v6311_v27 = vcombine.low %v3803_v22, %v3811_v25  ;;  %v6312_v28 = vcombine.high %v3803_v22, %v3811_v25  ;;  %v3798_v10 = vld [vmem:[%s7635_s25 + $0x70] sm:$0xff]  ;;  %v7208_v20 = vld [vmem:[%s7641_s17 + $0xf8] sm:$0xff]  }
 0x999   : > { %v3508_v30 = vpop.f32.mrf.mxu0  ;;  %4376 = vmatprep.subr.bf16.mxu1 %v6292_v19  ;;  %4353 = vmatprep.mubr.bf16.mxu0 %v7420_v23  ;;  %v7207_v19 = vld [vmem:[%s7641_s17 + $0x78] sm:$0xff]   ;;  %v7212_v25 = vld [vmem:[%s7641_s17 + $0xf0] sm:$0xff]  }
 0x99a   : > { %v7079_v31 = vpop.f32.mrf.mxu1  ;;  %4394 = vmatprep.mubr.bf16.mxu1 %v7420_v23  ;;  %v7209_v21 = vld [vmem:[%s7641_s17 + $0x38] sm:$0xff]  }
 0x99b   : > { %v7073_v32 = vpop.f32.mrf.mxu0  ;;  %v7210_v22 = vld [vmem:[%s7641_s17 + $0xb8] sm:$0xff]  }
 0x99c   : > { %4377 = vmatpush1.bf16.msra.mxu1 %v6291_v18  ;;  %v3760_v32 = vld [vmem:[%s8476_s7] sm:$0x3]  ;;  %v6303_v18 = vcombine.low %v3791_v11, %v3799_v12  ;;  %v4100_v11 = vsub.s32 5, %v7869_v60  ;;  %v4108_v12 = vsub.s32 7, %v7869_v60 }
 0x99d   : > { %4456 = vmatprep.subr.bf16.mxu1 %v6312_v28  ;;  %v7216_v28 = vld [vmem:[%s7641_s17 + $0xe8] sm:$0xff]  }
 0xa4f   : > { %v3647_v33 = vpop.f32.mrf.mxu1 }
 0xa50   : > { %v3601_v34 = vpop.f32.mrf.mxu0  ;;  %v3746_v40 = vsel %vm1030_vm2, %v3647_v33, 0.0  ;;  %v3777_v33 = vrot.slane %v3760_v32, %v7872_v61 }
 0xa51   : > { %v7090_v35 = vpop.f32.mrf.mxu1  ;;  %v3745_v38 = vsel %vm1030_vm2, %v3601_v34, 0.0 }
 0xa52   : > { %v7084_v2 = vpop.f32.mrf.mxu0  ;;  %v3747_v45 = vadd.f32 %v3746_v40, %v3745_v38  ;;  %v3782_v35 = vrot.slane %v3760_v32, %v7880_v63  ;;  %v3794_v38 = vld [vmem:[%s7635_s25 + $0x50] sm:$0xff]  ;;  %v3787_v40 = vld [vmem:[%s7635_s25 + $0x18] sm:$0xff]  ;;  %v7220_v32 = vld [vmem:[%s7641_s17 + $0xe0] sm:$0xff]  }
 0xa53   : > { %v3650_v36 = vpop.f32.mrf.mxu1 }
 0xa54   : > { %v3604_v37 = vpop.f32.mrf.mxu0 }
 0xa55   : > { %v7091_v41 = vpop.f32.mrf.mxu1  ;;  %v3786_v37 = vld [vmem:[%s7635_s25 + $0x10] sm:$0xff] }
 0xa56   : > { %v7085_v42 = vpop.f32.mrf.mxu0  ;;  %v3795_v41 = vld [vmem:[%s7635_s25 + $0x58] sm:$0xff] }
 0xa57   : > { %v3739_v43 = vpop.f32.mrf.mxu1 }
 0xa58   : > { %v3693_v46 = vpop.f32.mrf.mxu0  ;;  %v3750_v52 = vsel %vm1030_vm2, %v3739_v43, 0.0 }
 0xa59   : > { %v3748_v47 = vsel %vm1030_vm2, %v3693_v46, 0.0  ;;  %v7102_v39 = vpop.f32.mrf.mxu1  ;;  %v6296_v46 = vcombine.high %v3787_v40, %v3795_v41 }
 0xa5a   : > { %v3749_v49 = vadd.f32 %v3748_v47, %v3747_v45  ;;  %v7096_v50 = vpop.f32.mrf.mxu0  ;;  %v6294_v45 = vcombine.high %v3786_v37, %v3794_v38  ;;  %v3804_v47 = vld [vmem:[%s7635_s25 + $0xa0] sm:$0xff] }
 0xa5b   : > { %v3742_v53 = vpop.f32.mrf.mxu1  ;;  %v3812_v39 = vld [vmem:[%s7635_s25 + $0xe0] sm:$0xff]  ;;  %v3813_v50 = vld [vmem:[%s7635_s25 + $0xe8] sm:$0xff] }
 0xa5c   : > { %v3751_v54 = vadd.f32 %v3750_v52, %v3749_v49  ;;  %v3696_v55 = vpop.f32.mrf.mxu0  ;;  %v3805_v49 = vld [vmem:[%s7635_s25 + $0xa8] sm:$0xff]  ;;  %v6295_v52 = vcombine.low %v3787_v40, %v3795_v41  ;;  %v6314_v53 = vcombine.high %v3804_v47, %v3812_v39  ;;  %v7228_v40 = vld [vmem:[%s7641_s17 + $0xd0] sm:$0xff]  }
 0xa5d   : > { %v7103_v56 = vpop.f32.mrf.mxu1  ;;  %v3788_v55 = vld [vmem:[%s7635_s25 + $0x20] sm:$0xff]  ;;  %v7229_v41 = vld [vmem:[%s7641_s17 + $0x10] sm:$0xff]  }
 0xa5e   : > { %v3758_v57 = vadd.f32 %v6288_v51, %v3751_v54  ;;  %v7097_v58 = vpop.f32.mrf.mxu0  ;;  %v6293_v51 = vcombine.low %v3786_v37, %v3794_v38  ;;  %v6316_v54 = vcombine.high %v3805_v49, %v3813_v50  ;;  %v3796_v56 = vld [vmem:[%s7635_s25 + $0x60] sm:$0xff]  ;;  %v7226_v37 = vld [vmem:[%s7641_s17 + $0x98] sm:$0xff]   ;;  %v7227_v38 = vld [vmem:[%s7641_s17 + $0x50] sm:$0xff]  }
 0xa5f   : > { %v3797_v58 = vld [vmem:[%s7635_s25 + $0x68] sm:$0xff] }
 0xa60   : > { %v3759_v59 = vadd.f32 %v3758_v57, %v7884_v6  ;;  %v6305_v6 = vcombine.low %v3800_v4, %v3808_v5  ;;  %v3789_v57 = vld [vmem:[%s7635_s25 + $0x28] sm:$0xff]  ;;  %v3815_v4 = vld [vmem:[%s7635_s25 + $0xf8] sm:$0xff]  ;;  %v6297_v5 = vcombine.low %v3788_v55, %v3796_v56 }
 0xa61   : > { %v6299_v7 = vcombine.low %v3789_v57, %v3797_v58 }
 0xa62   : > { %v3761_v48 = vsel %vm1030_vm2, %v3759_v59, 0.0  ;;  %4334 = vmatpush1.bf16.msra.mxu0 %v6305_v6  ;;  %v3790_v6 = vld [vmem:[%s7635_s25 + $0x30] sm:$0xff] }
 0xa63   : > { %3762 = vadd.xlane.f32.xlu0 %v3761_v48  ;;  %4335 = vmatprep.subr.bf16.mxu0 %v6290_v15  ;;  %v6315_v48 = vcombine.low %v3805_v49, %v3813_v50  ;;  %v6302_v15 = vcombine.high %v3790_v6, %v3798_v10  ;;  %v7235_v49 = vld [vmem:[%s7641_s17 + $0x40] sm:$0xff]  }
 0xa64   : > { %v7236_v50 = vld [vmem:[%s7641_s17 + $0xc0] sm:$0xff]  }
 0xa66   : > { %4336 = vmatpush1.bf16.msra.mxu0 %v6289_v17  ;;  %v6301_v17 = vcombine.low %v3790_v6, %v3798_v10 }
 0xa67   : > { %4415 = vmatprep.subr.bf16.mxu0 %v6310_v24  ;;  %v7211_v24 = vld [vmem:[%s7641_s17 + $0x70] sm:$0xff]  }
 0xaec   : > { %v3763_v44 = vpop.xlane.xlu0 %3762 }
 0xaed   : > { %v3764_v62 = vmul.f32 0.03125, %v3763_v44  ;;  %v6298_v44 = vcombine.high %v3788_v55, %v3796_v56  ;;  %v4104_v55 = vsub.s32 6, %v7869_v60 }
 0xaef   : > { %v3765_v0 = vsub.f32 %v3759_v59, %v3764_v62  ;;  %v6313_v59 = vcombine.low %v3804_v47, %v3812_v39  ;;  %v6300_v62 = vcombine.high %v3789_v57, %v3797_v58  ;;  %v7233_v47 = vld [vmem:[%s7641_s17 + $0x8] sm:$0xff]   ;;  %v4088_v58 = vsub.s32 2, %v7869_v60 }
 0xaf0   : > { %v7234_v39 = vld [vmem:[%s7641_s17 + $0x88] sm:$0xff]  }
 0xaf1   : > { %v3766_v1 = vmul.f32 %v3765_v0, %v3765_v0 }
 0xaf3   : > { %v3767_v3 = vsel %vm1030_vm2, %v3766_v1, 0.0  ;;  %v3814_v1 = vld [vmem:[%s7635_s25 + $0xf0] sm:$0xff] }
 0xaf4   : > { %3768 = vadd.xlane.f32.xlu1 %v3767_v3  ;;  %v3807_v3 = vld [vmem:[%s7635_s25 + $0xb8] sm:$0xff] }
 0xaf5   : > { %v6320_v9 = vcombine.high %v3807_v3, %v3815_v4  ;;  %v6319_v14 = vcombine.low %v3807_v3, %v3815_v4 }
 0xb7d   : > { %v3769_v29 = vpop.xlane.xlu1 %3768 }
 0xb7e   : > { %v3770_v30 = vmul.f32 0.03125, %v3769_v29  ;;  %v7217_v29 = vld [vmem:[%s7641_s17 + $0x28] sm:$0xff]  }
 0xb80   : > { %v3771_v31 = vadd.f32 1e-05, %v3770_v30  ;;  %v7218_v30 = vld [vmem:[%s7641_s17 + $0xa8] sm:$0xff]  }
 0xb82   : > { %7369 = vrsqrt.f32 %v3771_v31  ;;  %v7219_v31 = vld [vmem:[%s7641_s17 + $0x60] sm:$0xff]  }
 0xb8f   : > { %v7370_v34 = vpop.eup %7369 }
 0xb90   : > { %v3773_v2 = vmul.f32 %v7370_v34, %v3765_v0  ;;  %v3806_v0 = vld [vmem:[%s7635_s25 + $0xb0] sm:$0xff]  ;;  %v7222_v34 = vld [vmem:[%s7641_s17 + $0xa0] sm:$0xff]   ;;  %s8477_s25 = sld [smem:[#allocation9_spill]] }
 0xb91   : > { %v6318_v8 = vcombine.high %v3806_v0, %v3814_v1  ;;  %v6317_v13 = vcombine.low %v3806_v0, %v3814_v1 }
 0xb92   : > { %v3778_v36 = vmul.f32 %v3777_v33, %v3773_v2  ;;  %v7221_v33 = vld [vmem:[%s7641_s17 + $0x20] sm:$0xff]   ;;  %v7224_v2 = vld [vmem:[%s7641_s17 + $0xd8] sm:$0xff]  }
 0xb94   : > { %v8090_v42 = vadd.f32 %v3782_v35, %v3778_v36  ;;  %v7223_v35 = vld [vmem:[%s7641_s17 + $0x58] sm:$0xff]  }
 0xb95   : > { %v7225_v36 = vld [vmem:[%s7641_s17 + $0x18] sm:$0xff]  }
 0xb96   : > { %v8094_v43 = vpack.c.bf16 %v8090_v42, %v8090_v42  ;;  %v8170_v56 = vld [vmem:[%s8477_s25 + $0x8] sm:$0xff] }
 0xb97   : > { %v8175_v57 = vrot.slane %v8170_v56, %v4104_v55 }
 0xb98   : > { %6321 = vmatmul.mubr.msk.bf16.vlgmr.msra.gmra.mxu0 %vm1030_vm2, %v8094_v43  ;;  %6322 = vmatmul.mubr.msk.bf16.vlgmr.msra.gmra.mxu1 %vm1030_vm2, %v8094_v43 }
 0xb99   : > { %4416 = vmatpush1.bf16.msra.mxu0 %v6309_v26  ;;  %4457 = vmatpush1.bf16.msra.mxu1 %v6311_v27  ;;  %v7214_v26 = vld [vmem:[%s7641_s17 + $0xb0] sm:$0xff]   ;;  %v7215_v27 = vld [vmem:[%s7641_s17 + $0x68] sm:$0xff]  }
 0xb9a   : > { %4417 = vmatprep.subr.bf16.mxu0 %v6294_v45  ;;  %4458 = vmatprep.subr.bf16.mxu1 %v6296_v46  ;;  %v7231_v45 = vld [vmem:[%s7641_s17 + $0x48] sm:$0xff]  }
 0xb9b   : > { %4435 = vmatprep.mubr.bf16.mxu0 %v7420_v23  ;;  %4476 = vmatprep.mubr.bf16.mxu1 %v7420_v23  ;;  %v7232_v46 = vld [vmem:[%s7641_s17 + $0xc8] sm:$0xff]  }
 0xb9d   : > { %4418 = vmatpush1.bf16.msra.mxu0 %v6293_v51  ;;  %4459 = vmatpush1.bf16.msra.mxu1 %v6295_v52  ;;  %v7237_v51 = vld [vmem:[%s7641_s17] sm:$0xff]  }
 0xb9e   : > { %4497 = vmatprep.subr.bf16.mxu0 %v6314_v53  ;;  %4538 = vmatprep.subr.bf16.mxu1 %v6316_v54  ;;  %v7238_v52 = vld [vmem:[%s7641_s17 + $0x80] sm:$0xff]   ;;  %v7239_v53 = vld [vmem:[%s7641_s17 + $0x178] sm:$0xff]  }
 0xb9f   : > { %v7240_v54 = vld [vmem:[%s7641_s17 + $0x1f8] sm:$0xff]  }
 0xba0   : > { %6323 = vmatmul.mubr.msk.bf16.vlgmr.msra.gmra.mxu0 %vm1030_vm2, %v8094_v43  ;;  %6324 = vmatmul.mubr.msk.bf16.vlgmr.msra.gmra.mxu1 %vm1030_vm2, %v8094_v43 }
 0xba1   : > { %4498 = vmatpush1.bf16.msra.mxu0 %v6313_v59  ;;  %4539 = vmatpush1.bf16.msra.mxu1 %v6315_v48  ;;  %v8179_v59 = vld [vmem:[%s8477_s25] sm:$0xff]  ;;  %v4092_v48 = vsub.s32 3, %v7869_v60 }
 0xba2   : > { %4499 = vmatprep.subr.bf16.mxu0 %v6298_v44  ;;  %4540 = vmatprep.subr.bf16.mxu1 %v6300_v62  ;;  %v4081_v44 = vrot.slane %v8179_v59, %v7872_v61  ;;  %v4089_v62 = vrot.slane %v8179_v59, %v4088_v58  ;;  %v4085_v0 = vrot.slane %v8179_v59, %v7880_v63 }
 0xba3   : > { %4517 = vmatprep.mubr.bf16.mxu0 %v7420_v23  ;;  %4558 = vmatprep.mubr.bf16.mxu1 %v7420_v23  ;;  %v4093_v1 = vrot.slane %v8179_v59, %v4092_v48 }
 0xba5   : > { %4500 = vmatpush1.bf16.msra.mxu0 %v6297_v5  ;;  %4541 = vmatpush1.bf16.msra.mxu1 %v6299_v7 }
 0xba6   : > { %4579 = vmatprep.subr.bf16.mxu0 %v6318_v8  ;;  %4620 = vmatprep.subr.bf16.mxu1 %v6320_v9 }
 0xba8   : > { %6325 = vmatmul.mubr.msk.bf16.vlgmr.msra.gmra.mxu0 %vm1030_vm2, %v8094_v43  ;;  %6326 = vmatmul.mubr.msk.bf16.vlgmr.msra.gmra.mxu1 %vm1030_vm2, %v8094_v43 }
 0xba9   : > { %4580 = vmatpush1.bf16.msra.mxu0 %v6317_v13  ;;  %4621 = vmatpush1.bf16.msra.mxu1 %v6319_v14 }
 0xbaa   : > { %4581 = vmatprep.subr.bf16.mxu0 %v6302_v15  ;;  %4622 = vmatprep.subr.bf16.mxu1 %v6304_v16 }
 0xbab   : > { %4599 = vmatprep.mubr.bf16.mxu0 %v7420_v23  ;;  %4640 = vmatprep.mubr.bf16.mxu1 %v7420_v23  ;;  %v7213_v23 = vld [vmem:[%s7641_s17 + $0x30] sm:$0xff]  }
 0xbad   : > { %4582 = vmatpush1.bf16.msra.mxu0 %v6301_v17  ;;  %4623 = vmatpush1.bf16.msra.mxu1 %v6303_v18 }
 0xbae   : > { %6589 = vmatprep.subr.bf16.mxu0 %v7207_v19  ;;  %6611 = vmatprep.subr.bf16.mxu1 %v7208_v20 }
 0xbb0   : > { %6327 = vmatmul.mubr.msk.bf16.vlgmr.msra.gmra.mxu0 %vm1030_vm2, %v8094_v43  ;;  %6328 = vmatmul.mubr.msk.bf16.vlgmr.msra.gmra.mxu1 %vm1030_vm2, %v8094_v43  ;;  %v7230_v43 = vld [vmem:[%s7641_s17 + $0x90] sm:$0xff]  }
 0xbb1   : > { %6590 = vmatpush3.bf16.msra.mxu0 %v7209_v21  ;;  %6612 = vmatpush3.bf16.msra.mxu1 %v7210_v22 }
 0xbb2   : > { %6591 = vmatprep.subr.bf16.mxu0 %v7211_v24  ;;  %6613 = vmatprep.subr.bf16.mxu1 %v7212_v25  ;;  %v4101_v24 = vrot.slane %v8179_v59, %v4100_v11  ;;  %v4109_v25 = vrot.slane %v8179_v59, %v4108_v12 }
 0xbb5   : > { %6592 = vmatpush3.bf16.msra.mxu0 %v7213_v23  ;;  %6614 = vmatpush3.bf16.msra.mxu1 %v7214_v26  ;;  %v7241_v23 = vld [vmem:[%s7641_s17 + $0x138] sm:$0xff]  }
 0xbb6   : > { %6593 = vmatprep.subr.bf16.mxu0 %v7215_v27  ;;  %6615 = vmatprep.subr.bf16.mxu1 %v7216_v28  ;;  %v7242_v26 = vld [vmem:[%s7641_s17 + $0x1b8] sm:$0xff]  }
 0xbb9   : > { %6594 = vmatpush3.bf16.msra.mxu0 %v7217_v29  ;;  %6616 = vmatpush3.bf16.msra.mxu1 %v7218_v30 }
 0xbba   : > { %6595 = vmatprep.subr.bf16.mxu0 %v7219_v31  ;;  %6617 = vmatprep.subr.bf16.mxu1 %v7220_v32  ;;  %v7243_v31 = vld [vmem:[%s7641_s17 + $0x170] sm:$0xff]  }
 0xbbb   : > { %v7244_v32 = vld [vmem:[%s7641_s17 + $0x1f0] sm:$0xff]  }
 0xbbd   : > { %6596 = vmatpush3.bf16.msra.mxu0 %v7221_v33  ;;  %6618 = vmatpush3.bf16.msra.mxu1 %v7222_v34 }
 0xbbe   : > { %6597 = vmatprep.subr.bf16.mxu0 %v7223_v35  ;;  %6619 = vmatprep.subr.bf16.mxu1 %v7224_v2 }
 0xbc1   : > { %6598 = vmatpush3.bf16.msra.mxu0 %v7225_v36  ;;  %6620 = vmatpush3.bf16.msra.mxu1 %v7226_v37  ;;  %v7245_v36 = vld [vmem:[%s7641_s17 + $0x130] sm:$0xff]  }
 0xbc2   : > { %6599 = vmatprep.subr.bf16.mxu0 %v7227_v38  ;;  %6621 = vmatprep.subr.bf16.mxu1 %v7228_v40  ;;  %v7246_v37 = vld [vmem:[%s7641_s17 + $0x1b0] sm:$0xff]  }
 0xbc5   : > { %6600 = vmatpush3.bf16.msra.mxu0 %v7229_v41  ;;  %6622 = vmatpush3.bf16.msra.mxu1 %v7230_v43  ;;  %v7247_v41 = vld [vmem:[%s7641_s17 + $0x168] sm:$0xff]  }
 0xbc6   : > { %6601 = vmatprep.subr.bf16.mxu0 %v7231_v45  ;;  %6623 = vmatprep.subr.bf16.mxu1 %v7232_v46  ;;  %v7248_v43 = vld [vmem:[%s7641_s17 + $0x1e8] sm:$0xff]  }
 0xbc9   : > { %6602 = vmatpush3.bf16.msra.mxu0 %v7233_v47  ;;  %6624 = vmatpush3.bf16.msra.mxu1 %v7234_v39 }
 0xbca   : > { %6603 = vmatprep.subr.bf16.mxu0 %v7235_v49  ;;  %6625 = vmatprep.subr.bf16.mxu1 %v7236_v50 }
 0xbcd   : > { %6604 = vmatpush3.bf16.msra.mxu0 %v7237_v51  ;;  %6626 = vmatpush3.bf16.msra.mxu1 %v7238_v52  ;;  %v7249_v51 = vld [vmem:[%s7641_s17 + $0x128] sm:$0xff]  }
 0xbce   : > { %6633 = vmatprep.subr.bf16.mxu0 %v7239_v53  ;;  %6655 = vmatprep.subr.bf16.mxu1 %v7240_v54  ;;  %v7250_v52 = vld [vmem:[%s7641_s17 + $0x1a8] sm:$0xff]  }
 0xc58   : > { %v4355_v3 = vpop.f32.mrf.mxu0  ;;  %v4396_v4 = vpop.f32.mrf.mxu1 }
 0xc59   : > { %v4356_v5 = vadd.f32 %v4355_v3, %v4081_v44  ;;  %v4397_v7 = vadd.f32 %v4396_v4, %v4089_v62  ;;  %v7251_v44 = vld [vmem:[%s7641_s17 + $0x160] sm:$0xff]   ;;  %v4096_v3 = vsub.s32 4, %v7869_v60 }
 0xc5a   : > { %v4357_v8 = vpop.f32.mrf.mxu0  ;;  %v4398_v9 = vpop.f32.mrf.mxu1  ;;  %v7252_v62 = vld [vmem:[%s7641_s17 + $0x1e0] sm:$0xff]  }
 0xc5b   : > { %v4358_v6 = vadd.f32 %v4357_v8, %v4085_v0  ;;  %v4399_v10 = vadd.f32 %v4398_v9, %v4093_v1  ;;  %v4649_v13 = vmax.f32 %v4356_v5, 0.0  ;;  %v4651_v14 = vmax.f32 %v4397_v7, 0.0  ;;  %v7253_v4 = vld [vmem:[%s7641_s17 + $0x120] sm:$0xff]   ;;  %v7255_v9 = vld [vmem:[%s7641_s17 + $0x158] sm:$0xff]  }
 0xc5c   : > { %v4359_v15 = vpop.f32.mrf.mxu0  ;;  %v4400_v16 = vpop.f32.mrf.mxu1  ;;  %v7254_v5 = vld [vmem:[%s7641_s17 + $0x1a0] sm:$0xff]  }
 0xc5d   : > { %v4650_v17 = vmax.f32 %v4358_v6, 0.0  ;;  %v4652_v18 = vmax.f32 %v4399_v10, 0.0  ;;  %v4665_v27 = vpack.c.bf16 %v4649_v13, %v4649_v13  ;;  %v4667_v28 = vpack.c.bf16 %v4651_v14, %v4651_v14  ;;  %v7256_v6 = vld [vmem:[%s7641_s17 + $0x1d8] sm:$0xff]  }
 0xc5e   : > { %v4360_v19 = vpop.f32.mrf.mxu0  ;;  %v4401_v20 = vpop.f32.mrf.mxu1  ;;  %v4129_v10 = vrot.slane %v8170_v56, %v4096_v3  ;;  %v7257_v15 = vld [vmem:[%s7641_s17 + $0x118] sm:$0xff]  }
 0xc5f   : > { %v4666_v21 = vpack.c.bf16 %v4650_v17, %v4650_v17  ;;  %v4668_v22 = vpack.c.bf16 %v4652_v18, %v4652_v18  ;;  %v7258_v16 = vld [vmem:[%s7641_s17 + $0x198] sm:$0xff]   ;;  %v7259_v19 = vld [vmem:[%s7641_s17 + $0x150] sm:$0xff]  }
 0xc60   : > { %v8202_v29 = vpop.f32.mrf.mxu0  ;;  %v8204_v30 = vpop.f32.mrf.mxu1  ;;  %v7260_v20 = vld [vmem:[%s7641_s17 + $0x1d0] sm:$0xff]  }
 0xc61   : > { %5487 = vmatprep.mubr.bf16.mxu0 %v4666_v21  ;;  %5527 = vmatprep.mubr.bf16.mxu1 %v4668_v22 }
 0xc62   : > { %v4439_v33 = vpop.f32.mrf.mxu0  ;;  %v4480_v34 = vpop.f32.mrf.mxu1  ;;  %5488 = vmatmul.mubr.bf16.vlgmr.msra.gmra.mxu0 %v4665_v27  ;;  %5528 = vmatmul.mubr.bf16.vlgmr.msra.gmra.mxu1 %v4667_v28  ;;  %v4097_v27 = vrot.slane %v8179_v59, %v4096_v3  ;;  %v4105_v28 = vrot.slane %v8179_v59, %v4104_v55  ;;  %v7265_v55 = vld [vmem:[%s7641_s17 + $0x108] sm:$0xff]   ;;  %v7276_v3 = vld [vmem:[%s7641_s17 + $0x2f0] sm:$0xff]  }
 0xc63   : > { %v4440_v35 = vadd.f32 %v4439_v33, %v4101_v24  ;;  %v4481_v2 = vadd.f32 %v4480_v34, %v4109_v25  ;;  %6634 = vmatpush3.bf16.msra.mxu0 %v7241_v23  ;;  %6656 = vmatpush3.bf16.msra.mxu1 %v7242_v26  ;;  %v7261_v23 = vld [vmem:[%s7641_s17 + $0x110] sm:$0xff]   ;;  %v7264_v33 = vld [vmem:[%s7641_s17 + $0x1c8] sm:$0xff]   ;;  %v4117_v34 = vrot.slane %v8170_v56, %v7880_v63 }
 0xc64   : > { %v4441_v38 = vpop.f32.mrf.mxu0  ;;  %v4482_v40 = vpop.f32.mrf.mxu1  ;;  %6635 = vmatprep.subr.bf16.mxu0 %v7243_v31  ;;  %6657 = vmatprep.subr.bf16.mxu1 %v7244_v32  ;;  %v7262_v26 = vld [vmem:[%s7641_s17 + $0x190] sm:$0xff]   ;;  %v7266_v59 = vld [vmem:[%s7641_s17 + $0x188] sm:$0xff]  }
 0xc65   : > { %v4654_v45 = vmax.f32 %v4440_v35, 0.0  ;;  %v4656_v46 = vmax.f32 %v4481_v2, 0.0  ;;  %v4125_v35 = vrot.slane %v8170_v56, %v4092_v48  ;;  %v4479_v38 = vadd.f32 %v8204_v30, %v4105_v28  ;;  %v7267_v40 = vld [vmem:[%s7641_s17 + $0x140] sm:$0xff]   ;;  %v7272_v30 = vld [vmem:[%s7641_s17 + $0x2f8] sm:$0xff]  }
 0xc66   : > { %v4442_v47 = vpop.f32.mrf.mxu0  ;;  %v4483_v39 = vpop.f32.mrf.mxu1  ;;  %v4113_v28 = vrot.slane %v8170_v56, %v7872_v61 }
 0xc67   : > { %v4670_v49 = vpack.c.bf16 %v4654_v45, %v4654_v45  ;;  %v4672_v50 = vpack.c.bf16 %v4656_v46, %v4656_v46  ;;  %6636 = vmatpush3.bf16.msra.mxu0 %v7245_v36  ;;  %6658 = vmatpush3.bf16.msra.mxu1 %v7246_v37  ;;  %v4438_v37 = vadd.f32 %v8202_v29, %v4097_v27  ;;  %v7269_v45 = vld [vmem:[%s7641_s17 + $0x100] sm:$0xff]   ;;  %v4655_v39 = vmax.f32 %v4479_v38, 0.0  ;;  %v7271_v29 = vld [vmem:[%s7641_s17 + $0x278] sm:$0xff]   ;;  %v7293_v27 = vld [vmem:[%s7641_s17 + $0x210] sm:$0xff]  }
 0xc68   : > { %v8214_v53 = vpop.f32.mrf.mxu0  ;;  %v8216_v54 = vpop.f32.mrf.mxu1  ;;  %6637 = vmatprep.subr.bf16.mxu0 %v7247_v41  ;;  %6659 = vmatprep.subr.bf16.mxu1 %v7248_v43  ;;  %v7268_v41 = vld [vmem:[%s7641_s17 + $0x1c0] sm:$0xff]   ;;  %v7303_v38 = vld [vmem:[%s7641_s17 + $0x378] sm:$0xff]  }
 0xc69   : > { %5567 = vmatprep.mubr.bf16.mxu0 %v4670_v49  ;;  %5607 = vmatprep.mubr.bf16.mxu1 %v4672_v50  ;;  %v7270_v46 = vld [vmem:[%s7641_s17 + $0x180] sm:$0xff]   ;;  %v4653_v47 = vmax.f32 %v4438_v37, 0.0 }
 0xc6a   : > { %v4521_v0 = vpop.f32.mrf.mxu0  ;;  %v4562_v1 = vpop.f32.mrf.mxu1  ;;  %v7300_v37 = vld [vmem:[%s7641_s17 + $0x2c0] sm:$0xff]  }
 0xc6b   : > { %6638 = vmatpush3.bf16.msra.mxu0 %v7249_v51  ;;  %6660 = vmatpush3.bf16.msra.mxu1 %v7250_v52  ;;  %v4522_v43 = vadd.f32 %v4521_v0, %v4117_v34  ;;  %v4563_v48 = vadd.f32 %v4562_v1, %v4125_v35  ;;  %v7273_v51 = vld [vmem:[%s7641_s17 + $0x238] sm:$0xff]   ;;  %v4669_v52 = vpack.c.bf16 %v4653_v47, %v4653_v47  ;;  %v7275_v1 = vld [vmem:[%s7641_s17 + $0x270] sm:$0xff]  }
 0xc6c   : > { %v4523_v7 = vpop.f32.mrf.mxu0  ;;  %v4564_v8 = vpop.f32.mrf.mxu1  ;;  %6639 = vmatprep.subr.bf16.mxu0 %v7251_v44  ;;  %6661 = vmatprep.subr.bf16.mxu1 %v7252_v62  ;;  %v4671_v44 = vpack.c.bf16 %v4655_v39, %v4655_v39  ;;  %v7274_v62 = vld [vmem:[%s7641_s17 + $0x2b8] sm:$0xff]   ;;  %v4133_v34 = vrot.slane %v8170_v56, %v4100_v11  ;;  %v4141_v35 = vrot.slane %v8170_v56, %v4108_v12  ;;  %v7301_v11 = vld [vmem:[%s7641_s17 + $0x200] sm:$0xff]   ;;  %v7308_v39 = vld [vmem:[%s7641_s17 + $0x3f0] sm:$0xff]  }
 0xc6d   : > { %v4658_v49 = vmax.f32 %v4522_v43, 0.0  ;;  %v4660_v50 = vmax.f32 %v4563_v48, 0.0  ;;  %v7278_v7 = vld [vmem:[%s7641_s17 + $0x2b0] sm:$0xff]   ;;  %v7279_v8 = vld [vmem:[%s7641_s17 + $0x268] sm:$0xff]  }
 0xc6e   : > { %v4524_v13 = vpop.f32.mrf.mxu0  ;;  %v4565_v14 = vpop.f32.mrf.mxu1 }
 0xc6f   : > { %6640 = vmatpush3.bf16.msra.mxu0 %v7253_v4  ;;  %6662 = vmatpush3.bf16.msra.mxu1 %v7254_v5  ;;  %v4674_v0 = vpack.c.bf16 %v4658_v49, %v4658_v49  ;;  %v4676_v4 = vpack.c.bf16 %v4660_v50, %v4660_v50  ;;  %v7277_v5 = vld [vmem:[%s7641_s17 + $0x230] sm:$0xff]   ;;  %v7283_v13 = vld [vmem:[%s7641_s17 + $0x260] sm:$0xff]   ;;  %v7311_v50 = vld [vmem:[%s7641_s17 + $0x368] sm:$0xff]  }
 0xc70   : > { %v4601_v17 = vpop.f32.mrf.mxu0  ;;  %v4642_v18 = vpop.f32.mrf.mxu1  ;;  %6641 = vmatprep.subr.bf16.mxu0 %v7255_v9  ;;  %6663 = vmatprep.subr.bf16.mxu1 %v7256_v6  ;;  %v7280_v9 = vld [vmem:[%s7641_s17 + $0x2e8] sm:$0xff]   ;;  %v7284_v14 = vld [vmem:[%s7641_s17 + $0x2e0] sm:$0xff]   ;;  %v7310_v49 = vld [vmem:[%s7641_s17 + $0x3b0] sm:$0xff]  }
 0xc71   : > { %v8230_v21 = vadd.f32 %v4601_v17, %v4129_v10  ;;  %v8233_v22 = vadd.f32 %v4642_v18, %v8175_v57  ;;  %v7263_v57 = vld [vmem:[%s7641_s17 + $0x148] sm:$0xff]   ;;  %v7287_v17 = vld [vmem:[%s7641_s17 + $0x258] sm:$0xff]  }
 0xc72   : > { %v8235_v24 = vpop.f32.mrf.mxu0  ;;  %v8237_v25 = vpop.f32.mrf.mxu1  ;;  %v7281_v6 = vld [vmem:[%s7641_s17 + $0x228] sm:$0xff]   ;;  %v7288_v18 = vld [vmem:[%s7641_s17 + $0x2d8] sm:$0xff]  }
 0xc73   : > { %6642 = vmatpush3.bf16.msra.mxu0 %v7257_v15  ;;  %6664 = vmatpush3.bf16.msra.mxu1 %v7258_v16  ;;  %v7282_v10 = vld [vmem:[%s7641_s17 + $0x2a8] sm:$0xff]   ;;  %v7285_v15 = vld [vmem:[%s7641_s17 + $0x220] sm:$0xff]   ;;  %v4604_v60 = vadd.f32 %v8235_v24, %v4133_v34  ;;  %v7305_v24 = vld [vmem:[%s7641_s17 + $0x338] sm:$0xff]  }
 0xc74   : > { %v4605_v31 = vpop.f32.mrf.mxu0  ;;  %v4646_v32 = vpop.f32.mrf.mxu1  ;;  %6643 = vmatprep.subr.bf16.mxu0 %v7259_v19  ;;  %6665 = vmatprep.subr.bf16.mxu1 %v7260_v20  ;;  %v7286_v16 = vld [vmem:[%s7641_s17 + $0x2a0] sm:$0xff]   ;;  %v7289_v19 = vld [vmem:[%s7641_s17 + $0x218] sm:$0xff]  }
 0xc75   : > { %v7290_v20 = vld [vmem:[%s7641_s17 + $0x298] sm:$0xff]   ;;  %v7294_v31 = vld [vmem:[%s7641_s17 + $0x290] sm:$0xff]   ;;  %v7295_v32 = vld [vmem:[%s7641_s17 + $0x248] sm:$0xff]  }
 0xc76   : > { %v4606_v2 = vpop.f32.mrf.mxu0  ;;  %v4647_v36 = vpop.f32.mrf.mxu1 }
 0xc77   : > { %6644 = vmatpush3.bf16.msra.mxu0 %v7261_v23  ;;  %6666 = vmatpush3.bf16.msra.mxu1 %v7262_v26  ;;  %v7291_v23 = vld [vmem:[%s7641_s17 + $0x250] sm:$0xff]   ;;  %v7297_v2 = vld [vmem:[%s7641_s17 + $0x208] sm:$0xff]   ;;  %v4520_v36 = vadd.f32 %v8214_v53, %v4113_v28  ;;  %v7302_v53 = vld [vmem:[%s7641_s17 + $0x280] sm:$0xff]  }
 0xc78   : > { %6645 = vmatprep.subr.bf16.mxu0 %v7263_v57  ;;  %6667 = vmatprep.subr.bf16.mxu1 %v7264_v33  ;;  %v7292_v26 = vld [vmem:[%s7641_s17 + $0x2d0] sm:$0xff]   ;;  %v4121_v57 = vrot.slane %v8170_v56, %v4088_v58  ;;  %v7296_v33 = vld [vmem:[%s7641_s17 + $0x2c8] sm:$0xff]   ;;  %v4645_v56 = vadd.f32 %v8237_v25, %v4141_v35  ;;  %v7306_v25 = vld [vmem:[%s7641_s17 + $0x3b8] sm:$0xff]  }
 0xc79   : > { %v7298_v58 = vld [vmem:[%s7641_s17 + $0x288] sm:$0xff]   ;;  %v4657_v12 = vmax.f32 %v4520_v36, 0.0 }
 0xc7a   : > { %v4664_v43 = vmax.f32 %v4645_v56, 0.0 }
 0xc7b   : > { %6646 = vmatpush3.bf16.msra.mxu0 %v7265_v55  ;;  %6668 = vmatpush3.bf16.msra.mxu1 %v7266_v59  ;;  %v7299_v55 = vld [vmem:[%s7641_s17 + $0x240] sm:$0xff]   ;;  %v4561_v59 = vadd.f32 %v8216_v54, %v4121_v57  ;;  %v7304_v54 = vld [vmem:[%s7641_s17 + $0x3f8] sm:$0xff]   ;;  %v4673_v48 = vpack.c.bf16 %v4657_v12, %v4657_v12 }
 0xc7c   : > { %6647 = vmatprep.subr.bf16.mxu0 %v7267_v40  ;;  %6669 = vmatprep.subr.bf16.mxu1 %v7268_v41  ;;  %v4662_v41 = vmax.f32 %v4604_v60, 0.0 }
 0xc7d   : > { %v4659_v40 = vmax.f32 %v4561_v59, 0.0 }
 0xc7e   : > { %v4678_v47 = vpack.c.bf16 %v4662_v41, %v4662_v41 }
 0xc7f   : > { %6648 = vmatpush3.bf16.msra.mxu0 %v7269_v45  ;;  %6670 = vmatpush3.bf16.msra.mxu1 %v7270_v46  ;;  %v4675_v45 = vpack.c.bf16 %v4659_v40, %v4659_v40  ;;  %v7307_v46 = vld [vmem:[%s7641_s17 + $0x370] sm:$0xff]  }
 0xc80   : > { %6677 = vmatprep.subr.bf16.mxu0 %v7271_v29  ;;  %6699 = vmatprep.subr.bf16.mxu1 %v7272_v30  ;;  %v4680_v29 = vpack.c.bf16 %v4664_v43, %v4664_v43  ;;  %v7309_v30 = vld [vmem:[%s7641_s17 + $0x330] sm:$0xff]  }
 0xc82   : > { %5568 = vmatmul.mubr.bf16.vlgmr.msra.gmra.mxu0 %v4669_v52  ;;  %5608 = vmatmul.mubr.bf16.vlgmr.msra.gmra.mxu1 %v4671_v44  ;;  %v7313_v52 = vld [vmem:[%s7641_s17 + $0x328] sm:$0xff]  }
 0xc83   : > { %6678 = vmatpush3.bf16.msra.mxu0 %v7273_v51  ;;  %5647 = vmatprep.mubr.bf16.mxu0 %v4674_v0  ;;  %v7312_v51 = vld [vmem:[%s7641_s17 + $0x3e8] sm:$0xff]   ;;  %v7316_v0 = vld [vmem:[%s7641_s17 + $0x3e0] sm:$0xff]  }
 0xc84   : > { %6700 = vmatpush3.bf16.msra.mxu1 %v7274_v62  ;;  %5687 = vmatprep.mubr.bf16.mxu1 %v4676_v4  ;;  %v7314_v44 = vld [vmem:[%s7641_s17 + $0x3a8] sm:$0xff]   ;;  %v7315_v62 = vld [vmem:[%s7641_s17 + $0x360] sm:$0xff]   ;;  %v7319_v4 = vld [vmem:[%s7641_s17 + $0x358] sm:$0xff]  }
 0xc85   : > { %6679 = vmatprep.subr.bf16.mxu0 %v7275_v1  ;;  %6701 = vmatprep.subr.bf16.mxu1 %v7276_v3  ;;  %v7317_v1 = vld [vmem:[%s7641_s17 + $0x320] sm:$0xff]  }
 0xc86   : > { %v7318_v3 = vld [vmem:[%s7641_s17 + $0x3a0] sm:$0xff]  }
 0xc87   : > { %6680 = vmatpush3.bf16.msra.mxu0 %v7277_v5  ;;  %v7320_v5 = vld [vmem:[%s7641_s17 + $0x3d8] sm:$0xff]  }
 0xc88   : > { %6702 = vmatpush3.bf16.msra.mxu1 %v7278_v7  ;;  %6681 = vmatprep.subr.bf16.mxu0 %v7279_v8  ;;  %v7321_v7 = vld [vmem:[%s7641_s17 + $0x318] sm:$0xff]  }
 0xc89   : > { %6703 = vmatprep.subr.bf16.mxu1 %v7280_v9  ;;  %v7322_v8 = vld [vmem:[%s7641_s17 + $0x398] sm:$0xff]   ;;  %v7323_v9 = vld [vmem:[%s7641_s17 + $0x350] sm:$0xff]  }
 0xc8b   : > { %6682 = vmatpush3.bf16.msra.mxu0 %v7281_v6  ;;  %v7324_v6 = vld [vmem:[%s7641_s17 + $0x3d0] sm:$0xff]  }
 0xc8c   : > { %6704 = vmatpush3.bf16.msra.mxu1 %v7282_v10  ;;  %6683 = vmatprep.subr.bf16.mxu0 %v7283_v13  ;;  %v7325_v10 = vld [vmem:[%s7641_s17 + $0x310] sm:$0xff]  }
 0xc8d   : > { %6705 = vmatprep.subr.bf16.mxu1 %v7284_v14  ;;  %v7326_v13 = vld [vmem:[%s7641_s17 + $0x390] sm:$0xff]   ;;  %v7327_v14 = vld [vmem:[%s7641_s17 + $0x348] sm:$0xff]  }
 0xc8f   : > { %6684 = vmatpush3.bf16.msra.mxu0 %v7285_v15  ;;  %v7328_v15 = vld [vmem:[%s7641_s17 + $0x3c8] sm:$0xff]  }
 0xc90   : > { %6706 = vmatpush3.bf16.msra.mxu1 %v7286_v16  ;;  %6685 = vmatprep.subr.bf16.mxu0 %v7287_v17  ;;  %v7329_v16 = vld [vmem:[%s7641_s17 + $0x308] sm:$0xff]  }
 0xc91   : > { %6707 = vmatprep.subr.bf16.mxu1 %v7288_v18  ;;  %v7330_v17 = vld [vmem:[%s7641_s17 + $0x388] sm:$0xff]   ;;  %v7331_v18 = vld [vmem:[%s7641_s17 + $0x340] sm:$0xff]  }
 0xc93   : > { %6686 = vmatpush3.bf16.msra.mxu0 %v7289_v19  ;;  %v7332_v19 = vld [vmem:[%s7641_s17 + $0x3c0] sm:$0xff]  }
 0xc94   : > { %6708 = vmatpush3.bf16.msra.mxu1 %v7290_v20  ;;  %6687 = vmatprep.subr.bf16.mxu0 %v7291_v23  ;;  %v7333_v20 = vld [vmem:[%s7641_s17 + $0x300] sm:$0xff]   ;;  %v4661_v23 = vmax.f32 %v8230_v21, 0.0 }
 0xc95   : > { %6709 = vmatprep.subr.bf16.mxu1 %v7292_v26  ;;  %v7334_v26 = vld [vmem:[%s7641_s17 + $0x380] sm:$0xff]  }
 0xc96   : > { %v4677_v28 = vpack.c.bf16 %v4661_v23, %v4661_v23 }
 0xc97   : > { %6688 = vmatpush3.bf16.msra.mxu0 %v7293_v27  ;;  %v4663_v27 = vmax.f32 %v8233_v22, 0.0 }
 0xc98   : > { %6710 = vmatpush3.bf16.msra.mxu1 %v7294_v31  ;;  %6689 = vmatprep.subr.bf16.mxu0 %v7295_v32 }
 0xc99   : > { %6711 = vmatprep.subr.bf16.mxu1 %v7296_v33  ;;  %v4679_v31 = vpack.c.bf16 %v4663_v27, %v4663_v27  ;;  %v6329_v33 = vld [vmem:[%s909_s19] ss:$0 sm:$0xff] }
 0xc9b   : > { %6690 = vmatpush3.bf16.msra.mxu0 %v7297_v2 }
 0xc9c   : > { %6712 = vmatpush3.bf16.msra.mxu1 %v7298_v58  ;;  %6691 = vmatprep.subr.bf16.mxu0 %v7299_v55 }
 0xc9d   : > { %6713 = vmatprep.subr.bf16.mxu1 %v7300_v37 }
 0xc9f   : > { %6692 = vmatpush3.bf16.msra.mxu0 %v7301_v11 }
 0xca0   : > { %6714 = vmatpush3.bf16.msra.mxu1 %v7302_v53  ;;  %6721 = vmatprep.subr.bf16.mxu0 %v7303_v38 }
 0xca1   : > { %6743 = vmatprep.subr.bf16.mxu1 %v7304_v54 }
 0xca2   : > { %5648 = vmatmul.mubr.bf16.vlgmr.msra.gmra.mxu0 %v4673_v48 }
 0xca3   : > { %5688 = vmatmul.mubr.bf16.vlgmr.msra.gmra.mxu1 %v4675_v45  ;;  %6722 = vmatpush3.bf16.msra.mxu0 %v7305_v24 }
 0xca4   : > { %5727 = vmatprep.mubr.bf16.mxu0 %v4678_v47  ;;  %6744 = vmatpush3.bf16.msra.mxu1 %v7306_v25 }
 0xca5   : > { %5767 = vmatprep.mubr.bf16.mxu1 %v4680_v29  ;;  %6723 = vmatprep.subr.bf16.mxu0 %v7307_v46 }
 0xca6   : > { %6745 = vmatprep.subr.bf16.mxu1 %v7308_v39 }
 0xca7   : > { %6724 = vmatpush3.bf16.msra.mxu0 %v7309_v30 }
 0xca8   : > { %6746 = vmatpush3.bf16.msra.mxu1 %v7310_v49  ;;  %6725 = vmatprep.subr.bf16.mxu0 %v7311_v50 }
 0xca9   : > { %6747 = vmatprep.subr.bf16.mxu1 %v7312_v51 }
 0xcab   : > { %6726 = vmatpush3.bf16.msra.mxu0 %v7313_v52 }
 0xcac   : > { %6748 = vmatpush3.bf16.msra.mxu1 %v7314_v44  ;;  %6727 = vmatprep.subr.bf16.mxu0 %v7315_v62 }
 0xcad   : > { %6749 = vmatprep.subr.bf16.mxu1 %v7316_v0 }
 0xcaf   : > { %6728 = vmatpush3.bf16.msra.mxu0 %v7317_v1 }
 0xcb0   : > { %6750 = vmatpush3.bf16.msra.mxu1 %v7318_v3  ;;  %6729 = vmatprep.subr.bf16.mxu0 %v7319_v4 }
 0xcb1   : > { %6751 = vmatprep.subr.bf16.mxu1 %v7320_v5 }
 0xcb3   : > { %6730 = vmatpush3.bf16.msra.mxu0 %v7321_v7 }
 0xcb4   : > { %6752 = vmatpush3.bf16.msra.mxu1 %v7322_v8  ;;  %6731 = vmatprep.subr.bf16.mxu0 %v7323_v9 }
 0xcb5   : > { %6753 = vmatprep.subr.bf16.mxu1 %v7324_v6 }
 0xcb7   : > { %6732 = vmatpush3.bf16.msra.mxu0 %v7325_v10 }
 0xcb8   : > { %6754 = vmatpush3.bf16.msra.mxu1 %v7326_v13  ;;  %6733 = vmatprep.subr.bf16.mxu0 %v7327_v14 }
 0xcb9   : > { %6755 = vmatprep.subr.bf16.mxu1 %v7328_v15 }
 0xcbb   : > { %6734 = vmatpush3.bf16.msra.mxu0 %v7329_v16 }
 0xcbc   : > { %6756 = vmatpush3.bf16.msra.mxu1 %v7330_v17  ;;  %6735 = vmatprep.subr.bf16.mxu0 %v7331_v18 }
 0xcbd   : > { %6757 = vmatprep.subr.bf16.mxu1 %v7332_v19 }
 0xcbf   : > { %6736 = vmatpush3.bf16.msra.mxu0 %v7333_v20 }
 0xcc0   : > { %6758 = vmatpush3.bf16.msra.mxu1 %v7334_v26 }
 0xcc2   : > { %5728 = vmatmul.mubr.bf16.vlgmr.msra.gmra.mxu0 %v4677_v28  ;;  %v5776_v28 = vld [vmem:[%s913_s23] sm:$0x3] }
 0xcc3   : > { %5768 = vmatmul.mubr.bf16.vlgmr.msra.gmra.mxu1 %v4679_v31 }
 0xd22   : > { %v6605_v32 = vpop.f32.mrf.mxu0  ;;  %v6627_v57 = vpop.f32.mrf.mxu1 }
 0xd24   : > { %v6606_v21 = vpop.f32.mrf.mxu0  ;;  %v6628_v34 = vpop.f32.mrf.mxu1 }
 0xd25   : > { %v6607_v35 = vadd.f32 %v6606_v21, %v6605_v32  ;;  %v6629_v2 = vadd.f32 %v6628_v34, %v6627_v57  ;;  %v5798_v32 = vrot.slane %v5776_v28, %v7880_v63 }
 0xd26   : > { %v6608_v36 = vpop.f32.mrf.mxu0  ;;  %v6630_v22 = vpop.f32.mrf.mxu1 }
 0xd27   : > { %v5490_v58 = vadd.f32 %v6607_v35, %v6329_v33 }
 0xd28   : > { %v6609_v55 = vpop.f32.mrf.mxu0  ;;  %v6631_v59 = vpop.f32.mrf.mxu1 }
 0xd29   : > { %v5530_v37 = vadd.f32 %v6629_v2, %v5490_v58 }
 0xd42   : > { %v6649_v60 = vpop.f32.mrf.mxu0  ;;  %v6671_v56 = vpop.f32.mrf.mxu1 }
 0xd44   : > { %v6650_v11 = vpop.f32.mrf.mxu0  ;;  %v6672_v12 = vpop.f32.mrf.mxu1 }
 0xd45   : > { %v6651_v39 = vadd.f32 %v6650_v11, %v6649_v60  ;;  %v6673_v30 = vadd.f32 %v6672_v12, %v6671_v56 }
 0xd46   : > { %v6652_v53 = vpop.f32.mrf.mxu0  ;;  %v6674_v38 = vpop.f32.mrf.mxu1 }
 0xd47   : > { %v5570_v29 = vadd.f32 %v6651_v39, %v5530_v37 }
 0xd48   : > { %v6653_v40 = vpop.f32.mrf.mxu0  ;;  %v6675_v54 = vpop.f32.mrf.mxu1 }
 0xd49   : > { %v5610_v50 = vadd.f32 %v6673_v30, %v5570_v29 }
 0xd62   : > { %v6693_v41 = vpop.f32.mrf.mxu0 }
 0xd63   : > { %v6715_v43 = vpop.f32.mrf.mxu1 }
 0xd64   : > { %v6694_v24 = vpop.f32.mrf.mxu0 }
 0xd65   : > { %v6716_v48 = vpop.f32.mrf.mxu1  ;;  %v6695_v49 = vadd.f32 %v6694_v24, %v6693_v41 }
 0xd66   : > { %v6696_v25 = vpop.f32.mrf.mxu0  ;;  %v6717_v44 = vadd.f32 %v6716_v48, %v6715_v43 }
 0xd67   : > { %v6718_v45 = vpop.f32.mrf.mxu1  ;;  %v5650_v51 = vadd.f32 %v6695_v49, %v5610_v50 }
 0xd68   : > { %v6697_v46 = vpop.f32.mrf.mxu0 }
 0xd69   : > { %v6719_v47 = vpop.f32.mrf.mxu1  ;;  %v5690_v1 = vadd.f32 %v6717_v44, %v5650_v51 }
 0xd82   : > { %v6737_v52 = vpop.f32.mrf.mxu0 }
 0xd83   : > { %v6759_v62 = vpop.f32.mrf.mxu1 }
 0xd84   : > { %v6738_v0 = vpop.f32.mrf.mxu0 }
 0xd85   : > { %v6739_v3 = vadd.f32 %v6738_v0, %v6737_v52  ;;  %v6760_v4 = vpop.f32.mrf.mxu1 }
 0xd86   : > { %v6740_v5 = vpop.f32.mrf.mxu0  ;;  %v6761_v8 = vadd.f32 %v6760_v4, %v6759_v62 }
 0xd87   : > { %v5730_v7 = vadd.f32 %v6739_v3, %v5690_v1  ;;  %v6762_v9 = vpop.f32.mrf.mxu1 }
 0xd88   : > { %v6741_v6 = vpop.f32.mrf.mxu0 }
 0xd89   : > { %v5770_v10 = vadd.f32 %v6761_v8, %v5730_v7  ;;  %v6763_v13 = vpop.f32.mrf.mxu1 }
 0xd8b   : > { %v5775_v14 = vadd.f32 %v5770_v10, %v8090_v42  ;;  %v5793_v42 = vrot.slane %v5776_v28, %v7872_v61 }
 0xd8d   : > { %v5777_v15 = vsel %vm1030_vm2, %v5775_v14, 0.0 }
 0xd8e   : > { %5778 = vadd.xlane.f32.xlu0 %v5777_v15 }
 0xe17   : > { %v5779_v16 = vpop.xlane.xlu0 %5778 }
 0xe18   : > { %v5780_v17 = vmul.f32 0.03125, %v5779_v16 }
 0xe1a   : > { %v5781_v18 = vsub.f32 %v5775_v14, %v5780_v17 }
 0xe1c   : > { %v5782_v19 = vmul.f32 %v5781_v18, %v5781_v18 }
 0xe1e   : > { %v5783_v20 = vsel %vm1030_vm2, %v5782_v19, 0.0 }
 0xe1f   : > { %5784 = vadd.xlane.f32.xlu1 %v5783_v20 }
 0xea8   : > { %v5785_v23 = vpop.xlane.xlu1 %5784 }
 0xea9   : > { %v5786_v26 = vmul.f32 0.03125, %v5785_v23 }
 0xeab   : > { %v5787_v27 = vadd.f32 1e-05, %v5786_v26 }
 0xead   : > { %7371 = vrsqrt.f32 %v5787_v27 }
 0xeba   : > { %v7372_v31 = vpop.eup %7371 }
 0xebb   : > { %v5789_v57 = vmul.f32 %v7372_v31, %v5781_v18 }
 0xebd   : > { %v5794_v33 = vmul.f32 %v5793_v42, %v5789_v57  ;;  %5804 = sbr.rel (%p6458_p8) target bundleno = 4287 (0x10bf), region = 108 }
 0xebf   : > { %v5799_v21 = vadd.f32 %v5798_v32, %v5794_v33 }
 0xec1   : > { %5800 = vst.msk [vmem:[#allocation2] sm:$0xff] %vm1030_vm2, %v5799_v21 }
 0xec2   : > { %v5806_v34 = vsel %vm1030_vm2, %v5799_v21, 0.0  ;;  %v7374_v55 = vld [vmem:[%s8481_s10 + $0x8] sm:$0xff]   ;;  %v7421_v59 = vmov 0.0   ;;  %vm7422_vm5 = vmmov 0   ;;  %v7375_v37 = vld [vmem:[%s8481_s10] sm:$0xff]  }
 0xec3   : > { %5807 = vadd.xlane.f32.xlu0 %v5806_v34  ;;  %7104 = vmatprep.subr.bf16.mxu0 %v7421_v59  ;;  %v5805_v12 = vld [vmem:[%s8482_s22] sm:$0x3] }
 0xec4   : > { %7108 = vmatprep.mubr.msk.bf16.mxu0 %vm7422_vm5, %v7421_v59  ;;  %7105 = vmatpush3.bf16.msra.mxu0 %v7374_v55  ;;  %v5822_v53 = vrot.slane %v5805_v12, %v7872_v61  ;;  %v5827_v54 = vrot.slane %v5805_v12, %v7880_v63  ;;  %v6459_v48 = vld [vmem:[%s8483_s4] ss:$0 sm:$0xff] }
 0xec5   : > { %7106 = vmatprep.subr.bf16.mxu0 %v7421_v59 }
 0xec8   : > { %7107 = vmatpush3.bf16.msra.mxu0 %v7375_v37 }
 0xf4c   : > { %v5808_v35 = vpop.xlane.xlu0 %5807 }
 0xf4d   : > { %v5809_v2 = vmul.f32 0.03125, %v5808_v35 }
 0xf4f   : > { %v5810_v36 = vsub.f32 %v5799_v21, %v5809_v2 }
 0xf51   : > { %v5811_v22 = vmul.f32 %v5810_v36, %v5810_v36 }
 0xf53   : > { %v5812_v58 = vsel %vm1030_vm2, %v5811_v22, 0.0 }
 0xf54   : > { %5813 = vadd.xlane.f32.xlu0 %v5812_v58 }
 0xfdd   : > { %v5814_v60 = vpop.xlane.xlu0 %5813 }
 0xfde   : > { %v5815_v56 = vmul.f32 0.03125, %v5814_v60 }
 0xfe0   : > { %v5816_v11 = vadd.f32 1e-05, %v5815_v56 }
 0xfe2   : > { %7376 = vrsqrt.f32 %v5816_v11 }
 0xfef   : > { %v7377_v38 = vpop.eup %7376 }
 0xff0   : > { %v5818_v40 = vmul.f32 %v7377_v38, %v5810_v36 }
 0xff2   : > { %v5823_v41 = vmul.f32 %v5822_v53, %v5818_v40 }
 0xff4   : > { %v5828_v43 = vadd.f32 %v5827_v54, %v5823_v41 }
 0xff6   : > { %v5829_v24 = vpack.c.bf16 %v5828_v43, %v5828_v43 }
 0xff8   : > { %7109 = vmatmul.mubr.msk.bf16.vlgmr.msra.gmra.mxu0 %vm1030_vm2, %v5829_v24 }
0x10b8   : > { %v5890_v25 = vpop.f32.mrf.mxu0 }
0x10b9   : > { %v5891_v45 = vadd.f32 %v6459_v48, %v5890_v25 }
0x10ba   : > { %v7110_v46 = vpop.f32.mrf.mxu0 }
0x10bb   : > { %5896 = vst [vmem:[%s917_s2] sm:$0xff] %v5891_v45 }
0x10bc   : > { %v5893_v61 = vpop.f32.mrf.mxu0 }
0x10be   : > { %v7111_v47 = vpop.f32.mrf.mxu0 }
0x10bf PF: > { %s8485_s3 = sld [smem:[#allocation6_spill]] }
0x10c0   : > { %s8486_s1 = sld [smem:[#allocation4_spill]] }
0x10c1   : > { %s8487_s22 = sld [smem:[#allocation5_spill]] }
0x10c2   : > { %s8488_s23 = sld [smem:[#allocation7_spill]] }
0x10c3   : > { %s8489_s24 = sld [smem:[#allocation8_spill]] }
0x10c5   : > { %s30_s2 = sadd.s32 1, %s8485_s3  }
0x10c6   : > { %p27_p9 = scmp.ge.s32.totalorder %s30_s2, 6  }
0x10c8   :  { %29 = sbr.rel (!%p27_p9) target bundleno = 21 (0x15), region = 186 }

</bundles_post_ra>
